<compile_context>
chip_gen: v7x
topology: tpu7x:2x2x1
jax: 0.10.0
libtpu: 0.0.40
codegen_flags: <defaults>
</compile_context>

<pallas_src>
import math
import functools

import jax
import jax.numpy as jnp
from jax.experimental import pallas as pl
from jax.experimental.pallas import tpu as pltpu


# ----------------------------------------------------------------------------
# Kernel: per (batch, q-tile) — attention + residual/LN1 + MLP + residual/LN2
# ----------------------------------------------------------------------------
def bev_attention_kernel(
    qh_ref, qres_ref, kT_ref, v_ref,            # activations (Q/K/V hoisted)
    wo_ref, bo_ref,                             # attention output projection
    n1g_ref, n1b_ref,                           # LayerNorm 1
    ow1_ref, ob1_ref, ow2_ref, ob2_ref,         # output_projection MLP
    n2g_ref, n2b_ref,                           # LayerNorm 2
    out_ref,
    *, scale, num_keys,
):
    f32, bf16 = jnp.float32, jnp.bfloat16
    eps = 1e-5

    n_heads = qh_ref.shape[0]
    s_pad = kT_ref.shape[-1]

    # ---- multi-head cross attention (head-batched, K pre-transposed) ----
    # scores [H, tq, S_pad]; f32 accumulation on the MXU
    s = jax.lax.dot_general(
        qh_ref[...], kT_ref[...],
        dimension_numbers=(((2,), (1,)), ((0,), (0,))),
        preferred_element_type=f32)
    if s_pad > num_keys:                         # static: mask lane-padded keys
        kidx = jax.lax.broadcasted_iota(jnp.int32, s.shape, 2)
        s = jnp.where(kidx < num_keys, s, -1e30)

    # softmax with the 1/sqrt(d_k) scale folded into the exp argument;
    # probabilities go to bf16 immediately (keeps live f32 score copies ~2).
    m = jnp.max(s, axis=-1, keepdims=True)
    e = jnp.exp((s - m) * scale)
    p = (e * pl.reciprocal(jnp.sum(e, axis=-1, keepdims=True),
                           approx=True)).astype(bf16)

    ctx = jax.lax.dot_general(                   # [H, tq, d_k]
        p, v_ref[...],
        dimension_numbers=(((2,), (1,)), ((0,), (0,))),
        preferred_element_type=f32)
    # merge heads along the lane dim (static concat; no major-dim transpose),
    # then a single full-depth (C) matmul against Wo.
    ctx = jnp.concatenate([ctx[h] for h in range(n_heads)], axis=-1)  # [tq, C]
    attn = jnp.dot(ctx.astype(bf16), wo_ref[...],
                   preferred_element_type=f32) + bo_ref[...]

    # ---- residual + LayerNorm 1 (f32) ----
    x1 = qres_ref[...] + attn
    mu1 = jnp.mean(x1, axis=-1, keepdims=True)
    xc1 = x1 - mu1
    var1 = jnp.mean(xc1 * xc1, axis=-1, keepdims=True)
    x1n = xc1 * jax.lax.rsqrt(var1 + eps) * n1g_ref[...] + n1b_ref[...]

    # ---- output projection MLP: Linear -> ReLU -> (Dropout=id) -> Linear ----
    h2 = jnp.dot(x1n.astype(bf16), ow1_ref[...],
                 preferred_element_type=f32) + ob1_ref[...]
    h2 = jnp.maximum(h2, 0.0)
    y = jnp.dot(h2.astype(bf16), ow2_ref[...],
                preferred_element_type=f32) + ob2_ref[...]

    # ---- residual + LayerNorm 2 (f32) ----
    x2 = x1n + y
    mu2 = jnp.mean(x2, axis=-1, keepdims=True)
    xc2 = x2 - mu2
    var2 = jnp.mean(xc2 * xc2, axis=-1, keepdims=True)
    x2n = xc2 * jax.lax.rsqrt(var2 + eps) * n2g_ref[...] + n2b_ref[...]

    # lane-dense store, already transposed to [C, tile_q] -> wrapper NCHW
    # conversion becomes a free reshape (no extra HBM transpose pass).
    out_ref[...] = jnp.transpose(x2n, (1, 0)).astype(out_ref.dtype)


# ----------------------------------------------------------------------------
# Helpers
# ----------------------------------------------------------------------------
def _vmem_capacity_bytes():
    try:
        return int(pltpu.get_tpu_info().vmem_capacity_bytes)
    except Exception:
        return 64 * 1024 * 1024                  # conservative: v7x per-TC VMEM


def _derive_tile_q(nq, c, num_heads, s_pad, budget_bytes):
    """Largest lane-dense q tile whose working set fits the VMEM budget."""
    # tile-size independent residents: 3 CxC bf16 weights (single-buffered),
    # double-buffered K^T / V bf16 slabs, padded bias / LN vectors.
    fixed = 3 * c * c * 2
    fixed += 2 * (2 * c * s_pad * 2)
    fixed += 16 * 8 * max(c, 128) * 4
    avail = budget_bytes - fixed
    # per query row: ~3 live f32 copies of the [H, ., S_pad] score tensor,
    # double-buffered qh (bf16) / residual (f32) / out (f32) tiles, and ~8
    # f32 [., C] intermediates of the fused MLP / LayerNorms.
    per_row = (3 * 4 * num_heads * s_pad
               + 2 * 2 * c + 2 * 4 * c + 2 * 4 * c
               + 8 * 4 * c)
    cap = max(avail // per_row, 8)
    cands = [t for t in range(128, nq + 1, 128) if nq % t == 0 and t <= cap]
    if cands:
        return max(cands)
    return nq                                    # full-extent block (always legal)


def _const_spec(shape):
    """BlockSpec for a weight/bias: constant block index, single-buffered."""
    nd = len(shape)
    def index_map(b, qi):
        return (0,) * nd
    try:
        return pl.BlockSpec(shape, index_map, pipeline_mode=pl.Buffered(1))
    except (TypeError, AttributeError):          # fall back if unsupported
        return pl.BlockSpec(shape, index_map)


# ----------------------------------------------------------------------------
# Wrapper
# ----------------------------------------------------------------------------
def bev_projection(camera_features, camera_poses, params, bev_size, num_heads,
                   *, tile_q=None):
    """Pallas-TPU forward of BEVProjection. Returns [B, C, H, W] float32."""
    del camera_poses                             # unused by the reference forward
    f32, bf16 = jnp.float32, jnp.bfloat16

    cam = jnp.concatenate(camera_features, axis=1)          # [B, S, F]
    B, S, _F = cam.shape
    Nq, C = params["bev_emb"].shape
    Hb, Wb = bev_size
    assert Nq == Hb * Wb
    assert C % num_heads == 0, "bev_channels must be divisible by num_heads"
    d_k = C // num_heads
    scale = 1.0 / math.sqrt(d_k)

    # -------- hoisted precompute (plain XLA GEMMs, f32) --------
    # Q projection: bev_emb is a parameter, so Q never depends on the input.
    bev = params["bev_emb"].astype(f32)                      # [Nq, C] residual base
    q = bev @ params["wq"] + params["bq"]
    qh = jnp.transpose(q.reshape(Nq, num_heads, d_k), (1, 0, 2)).astype(bf16)

    # camera token MLP (token-wise, so concat-then-project == PyTorch order)
    h = jax.nn.relu(cam @ params["cw1"] + params["cb1"])
    kvf = h @ params["cw2"] + params["cb2"]                  # [B, S, C]

    # fused K|V projection: one [C, 2C] GEMM (fills the 256-wide MXU)
    wkv = jnp.concatenate([params["wk"], params["wv"]], axis=1)
    bkv = jnp.concatenate([params["bk"], params["bv"]], axis=1)
    kv = kvf @ wkv + bkv                                     # [B, S, 2C]
    k, v = kv[..., :C], kv[..., C:]

    # head split; K pre-transposed to [B, H, d_k, S]; keys padded lane-dense
    s_pad = max(128, ((S + 127) // 128) * 128)
    kT = jnp.transpose(k.reshape(B, S, num_heads, d_k), (0, 2, 3, 1))
    vh = jnp.transpose(v.reshape(B, S, num_heads, d_k), (0, 2, 1, 3))
    if s_pad > S:
        kT = jnp.pad(kT, ((0, 0), (0, 0), (0, 0), (0, s_pad - S)))
        vh = jnp.pad(vh, ((0, 0), (0, 0), (0, s_pad - S), (0, 0)))
    kT = kT.astype(bf16)
    vh = vh.astype(bf16)

    # -------- tiling / VMEM budget --------
    vmem_cap = _vmem_capacity_bytes()
    vmem_limit = min(int(vmem_cap * 3 // 4), 100 * 1024 * 1024)
    if tile_q is None:
        tile_q = _derive_tile_q(Nq, C, num_heads, s_pad,
                                vmem_limit - 4 * 1024 * 1024)
    assert Nq % tile_q == 0
    assert tile_q == Nq or tile_q % 128 == 0, \
        "tile_q must be a multiple of 128 (lane-dense [C, tile_q] store) or Nq"

    w_order = ["wo", "bo", "n1g", "n1b", "ow1", "ob1", "ow2", "ob2", "n2g", "n2b"]
    matmul_w = {"wo", "ow1", "ow2"}
    w_args = [params[k].astype(bf16 if k in matmul_w else f32) for k in w_order]

    in_specs = [
        pl.BlockSpec((num_heads, tile_q, d_k), lambda b, qi: (0, qi, 0)),   # qh
        pl.BlockSpec((tile_q, C), lambda b, qi: (qi, 0)),                   # residual
        pl.BlockSpec((pl.Squeezed(), num_heads, d_k, s_pad),
                     lambda b, qi: (b, 0, 0, 0)),                           # K^T
        pl.BlockSpec((pl.Squeezed(), num_heads, s_pad, d_k),
                     lambda b, qi: (b, 0, 0, 0)),                           # V
    ] + [_const_spec(w.shape) for w in w_args]

    kernel = functools.partial(bev_attention_kernel, scale=scale, num_keys=S)

    out = pl.pallas_call(
        kernel,
        out_shape=jax.ShapeDtypeStruct((B, C, Nq), f32),
        grid=(B, Nq // tile_q),
        in_specs=in_specs,
        out_specs=pl.BlockSpec((pl.Squeezed(), C, tile_q),
                               lambda b, qi: (b, 0, qi)),
        compiler_params=pltpu.CompilerParams(
            # no cross-step state -> both axes parallel (v7x megacore shards q)
            dimension_semantics=("parallel", "parallel"),
            vmem_limit_bytes=vmem_limit,
        ),
    )(qh, bev, kT, vh, *w_args)

    # [B, C, Nq] -> NCHW [B, C, H, W]: pure (free) reshape
    return out.reshape(B, C, Hb, Wb)


# ----------------------------------------------------------------------------
# Pure-JAX f32 reference (PyTorch-equivalent forward, dropout = identity)
# ----------------------------------------------------------------------------
def _layer_norm(x, g, b, eps=1e-5):
    mu = jnp.mean(x, axis=-1, keepdims=True)
    var = jnp.mean((x - mu) ** 2, axis=-1, keepdims=True)
    return (x - mu) * jax.lax.rsqrt(var + eps) * g + b


def bev_projection_reference(camera_features, params, bev_size, num_heads):
    cam = jnp.concatenate(camera_features, axis=1)
    B, S, _F = cam.shape
    Nq, C = params["bev_emb"].shape
    d_k = C // num_heads

    q_in = jnp.broadcast_to(params["bev_emb"][None], (B, Nq, C))
    h = jax.nn.relu(cam @ params["cw1"] + params["cb1"])
    kvf = h @ params["cw2"] + params["cb2"]

    def heads(x, n):
        return x.reshape(B, n, num_heads, d_k).transpose(0, 2, 1, 3)

    Q = heads(q_in @ params["wq"] + params["bq"], Nq)
    K = heads(kvf @ params["wk"] + params["bk"], S)
    V = heads(kvf @ params["wv"] + params["bv"], S)
    scores = jnp.einsum("bhqd,bhkd->bhqk", Q, K) / math.sqrt(d_k)
    p = jax.nn.softmax(scores, axis=-1)
    ctx = jnp.einsum("bhqk,bhkd->bhqd", p, V).transpose(0, 2, 1, 3).reshape(B, Nq, C)
    attended = ctx @ params["wo"] + params["bo"]

    x1 = _layer_norm(q_in + attended, params["n1g"], params["n1b"])
    y = jax.nn.relu(x1 @ params["ow1"] + params["ob1"]) @ params["ow2"] + params["ob2"]
    x2 = _layer_norm(x1 + y, params["n2g"], params["n2b"])
    return x2.reshape(B, bev_size[0], bev_size[1], C).transpose(0, 3, 1, 2)


def init_params(key, feature_dim, bev_channels, bev_size):
    Nq = bev_size[0] * bev_size[1]
    C = bev_channels
    ks = jax.random.split(key, 21)

    def w(k, shape, s=0.02):
        return jax.random.normal(k, shape, jnp.float32) * s

    def b(k, s=0.02):
        return jax.random.normal(k, (1, C), jnp.float32) * s

    return {
        "bev_emb": w(ks[0], (Nq, C)),
        # camera_projection: Linear(F, C), ReLU, Dropout, Linear(C, C)
        "cw1": w(ks[1], (feature_dim, C)), "cb1": b(ks[2]),
        "cw2": w(ks[3], (C, C)), "cb2": b(ks[4]),
        # cross attention projections
        "wq": w(ks[5], (C, C)), "bq": b(ks[6]),
        "wk": w(ks[7], (C, C)), "bk": b(ks[8]),
        "wv": w(ks[9], (C, C)), "bv": b(ks[10]),
        "wo": w(ks[11], (C, C)), "bo": b(ks[12]),
        # layer norms
        "n1g": 1.0 + w(ks[13], (1, C)), "n1b": b(ks[14]),
        "n2g": 1.0 + w(ks[15], (1, C)), "n2b": b(ks[16]),
        # output_projection: Linear(C, C), ReLU, Dropout, Linear(C, C)
        "ow1": w(ks[17], (C, C)), "ob1": b(ks[18]),
        "ow2": w(ks[19], (C, C)), "ob2": b(ks[20]),
    }


if __name__ == "__main__":
    # small, lane-dense shapes consistent with the module's forward contract
    B = 2
    num_cameras = 2
    seq_len = 8                  # S_total = 16 camera tokens (padded to 128 keys)
    feature_dim = 128            # lane-dense feature width
    bev_channels = 128           # lane-dense BEV channel width
    num_heads = 4                # d_k = 32
    bev_size = (16, 16)          # Nq = 256 -> two 128-row q tiles per batch elem
    tile_q = 128

    key = jax.random.PRNGKey(0)
    k_params, k_f0, k_f1, k_pose = jax.random.split(key, 4)

    params = init_params(k_params, feature_dim, bev_channels, bev_size)

    # camera_features: list of [B, seq_len, feature_dim]
    camera_features = [
        jax.random.normal(k_f0, (B, seq_len, feature_dim), jnp.float32),
        jax.random.normal(k_f1, (B, seq_len, feature_dim), jnp.float32),
    ]
    # camera_poses: [B, num_cameras, 7] — unused by the reference forward pass
    camera_poses = jax.random.normal(k_pose, (B, num_cameras, 7), jnp.float32)

    bev = bev_projection(camera_features, camera_poses, params, bev_size,
                         num_heads, tile_q=tile_q)
    jax.block_until_ready(bev)

    assert bev.shape == (B, bev_channels, bev_size[0], bev_size[1])
    assert bool(jnp.all(jnp.isfinite(bev)))

    ref = bev_projection_reference(camera_features, params, bev_size, num_heads)
    err = float(jnp.max(jnp.abs(bev.astype(jnp.float32) - ref)))
    assert err < 0.25, f"max abs error vs f32 reference too large: {err}"

    print("KERNEL_OK")
</pallas_src>

<mosaic_0001>
module attributes {stable_mosaic.version = 11 : i64} {
  func.func @bev_attention_kernel(%arg0: i32, %arg1: i32, %arg2: memref<4x128x32xbf16, #tpu.memory_space<vmem>>, %arg3: memref<128x128xf32, #tpu.memory_space<vmem>>, %arg4: memref<1x4x32x128xbf16, #tpu.memory_space<vmem>>, %arg5: memref<1x4x128x32xbf16, #tpu.memory_space<vmem>>, %arg6: memref<128x128xbf16, #tpu.memory_space<vmem>>, %arg7: memref<1x128xf32, #tpu.memory_space<vmem>>, %arg8: memref<1x128xf32, #tpu.memory_space<vmem>>, %arg9: memref<1x128xf32, #tpu.memory_space<vmem>>, %arg10: memref<128x128xbf16, #tpu.memory_space<vmem>>, %arg11: memref<1x128xf32, #tpu.memory_space<vmem>>, %arg12: memref<128x128xbf16, #tpu.memory_space<vmem>>, %arg13: memref<1x128xf32, #tpu.memory_space<vmem>>, %arg14: memref<1x128xf32, #tpu.memory_space<vmem>>, %arg15: memref<1x128xf32, #tpu.memory_space<vmem>>, %arg16: memref<1x128x128xf32, #tpu.memory_space<vmem>>) attributes {dimension_semantics = [#tpu.dimension_semantics<parallel>, #tpu.dimension_semantics<parallel>], iteration_bounds = array<i64: 2, 2>, scalar_prefetch = 0 : i64, scratch_operands = 0 : i64, tpu.core_type = #tpu.core_type<tc>, window_params = [{transform_indices = @transform_0, window_bounds = array<i64: 4, 128, 32>}, {transform_indices = @transform_1, window_bounds = array<i64: 128, 128>}, {transform_indices = @transform_2, window_bounds = array<i64: 1, 4, 32, 128>}, {transform_indices = @transform_3, window_bounds = array<i64: 1, 4, 128, 32>}, {pipeline_mode = #tpu.pipeline_mode<synchronous>, transform_indices = @transform_4, window_bounds = array<i64: 128, 128>}, {pipeline_mode = #tpu.pipeline_mode<synchronous>, transform_indices = @transform_5, window_bounds = array<i64: 1, 128>}, {pipeline_mode = #tpu.pipeline_mode<synchronous>, transform_indices = @transform_6, window_bounds = array<i64: 1, 128>}, {pipeline_mode = #tpu.pipeline_mode<synchronous>, transform_indices = @transform_7, window_bounds = array<i64: 1, 128>}, {pipeline_mode = #tpu.pipeline_mode<synchronous>, transform_indices = @transform_8, window_bounds = array<i64: 128, 128>}, {pipeline_mode = #tpu.pipeline_mode<synchronous>, transform_indices = @transform_9, window_bounds = array<i64: 1, 128>}, {pipeline_mode = #tpu.pipeline_mode<synchronous>, transform_indices = @transform_10, window_bounds = array<i64: 128, 128>}, {pipeline_mode = #tpu.pipeline_mode<synchronous>, transform_indices = @transform_11, window_bounds = array<i64: 1, 128>}, {pipeline_mode = #tpu.pipeline_mode<synchronous>, transform_indices = @transform_12, window_bounds = array<i64: 1, 128>}, {pipeline_mode = #tpu.pipeline_mode<synchronous>, transform_indices = @transform_13, window_bounds = array<i64: 1, 128>}, {transform_indices = @transform_14, window_bounds = array<i64: 1, 128, 128>}]} {
    %c0 = arith.constant 0 : index
    %c0_0 = arith.constant 0 : index
    %c0_1 = arith.constant 0 : index
    %0 = vector.load %arg2[%c0, %c0_0, %c0_1] : memref<4x128x32xbf16, #tpu.memory_space<vmem>>, vector<4x128x32xbf16>
    %c0_2 = arith.constant 0 : index
    %c0_3 = arith.constant 0 : index
    %c0_4 = arith.constant 0 : index
    %c0_5 = arith.constant 0 : index
    %1 = vector.load %arg4[%c0_2, %c0_3, %c0_4, %c0_5] : memref<1x4x32x128xbf16, #tpu.memory_space<vmem>>, vector<1x4x32x128xbf16>
    %2 = vector.shape_cast %1 : vector<1x4x32x128xbf16> to vector<4x32x128xbf16>
    %cst = arith.constant dense<0.000000e+00> : vector<4x128x128xf32>
    %3 = tpu.matmul %0, %2, %cst {dimension_numbers = #tpu.dot_dimension_numbers<[2], [1], [1], [2], [0, 0, 0, 1, 1, 2], [0], [0]>} : vector<4x128x32xbf16>, vector<4x32x128xbf16>, vector<4x128x128xf32> -> vector<4x128x128xf32>
    %4 = tpu.iota {dimensions = array<i32: 2>} : vector<4x128x128xi32>
    %c16_i32 = arith.constant 16 : i32
    %5 = vector.broadcast %c16_i32 : i32 to vector<4x128x128xi32>
    %6 = arith.cmpi slt, %4, %5 : vector<4x128x128xi32>
    %cst_6 = arith.constant -1.000000e+30 : f32
    %7 = vector.broadcast %cst_6 : f32 to vector<4x128x128xf32>
    %8 = arith.select %6, %3, %7 : vector<4x128x128xi1>, vector<4x128x128xf32>
    %cst_7 = arith.constant dense<0xFF800000> : vector<4x128xf32>
    %9 = vector.multi_reduction <maximumf>, %8, %cst_7 [2] : vector<4x128x128xf32> to vector<4x128xf32>
    %10 = vector.shape_cast %9 : vector<4x128xf32> to vector<4x128x1xf32>
    %11 = vector.broadcast %10 : vector<4x128x1xf32> to vector<4x128x128xf32>
    %12 = arith.subf %8, %11 : vector<4x128x128xf32>
    %cst_8 = arith.constant 0.176776692 : f32
    %13 = vector.broadcast %cst_8 : f32 to vector<4x128x128xf32>
    %14 = arith.mulf %12, %13 : vector<4x128x128xf32>
    %15 = math.exp %14 : vector<4x128x128xf32>
    %cst_9 = arith.constant dense<0.000000e+00> : vector<4x128xf32>
    %16 = vector.multi_reduction <add>, %15, %cst_9 [2] : vector<4x128x128xf32> to vector<4x128xf32>
    %17 = vector.shape_cast %16 : vector<4x128xf32> to vector<4x128x1xf32>
    %18 = tpu.reciprocal %17 {approx = true} : vector<4x128x1xf32> -> vector<4x128x1xf32>
    %19 = vector.broadcast %18 : vector<4x128x1xf32> to vector<4x128x128xf32>
    %20 = arith.mulf %15, %19 : vector<4x128x128xf32>
    %21 = arith.truncf %20 : vector<4x128x128xf32> to vector<4x128x128xbf16>
    %c0_10 = arith.constant 0 : index
    %c0_11 = arith.constant 0 : index
    %c0_12 = arith.constant 0 : index
    %c0_13 = arith.constant 0 : index
    %22 = vector.load %arg5[%c0_10, %c0_11, %c0_12, %c0_13] : memref<1x4x128x32xbf16, #tpu.memory_space<vmem>>, vector<1x4x128x32xbf16>
    %23 = vector.shape_cast %22 : vector<1x4x128x32xbf16> to vector<4x128x32xbf16>
    %cst_14 = arith.constant dense<0.000000e+00> : vector<4x128x32xf32>
    %24 = tpu.matmul %21, %23, %cst_14 {dimension_numbers = #tpu.dot_dimension_numbers<[2], [1], [1], [2], [0, 0, 0, 1, 1, 2], [0], [0]>} : vector<4x128x128xbf16>, vector<4x128x32xbf16>, vector<4x128x32xf32> -> vector<4x128x32xf32>
    %25 = vector.extract_strided_slice %24 {offsets = [0, 0, 0], sizes = [1, 128, 32], strides = [1, 1, 1]} : vector<4x128x32xf32> to vector<1x128x32xf32>
    %26 = vector.shape_cast %25 : vector<1x128x32xf32> to vector<128x32xf32>
    %27 = vector.extract_strided_slice %24 {offsets = [1, 0, 0], sizes = [1, 128, 32], strides = [1, 1, 1]} : vector<4x128x32xf32> to vector<1x128x32xf32>
    %28 = vector.shape_cast %27 : vector<1x128x32xf32> to vector<128x32xf32>
    %29 = vector.extract_strided_slice %24 {offsets = [2, 0, 0], sizes = [1, 128, 32], strides = [1, 1, 1]} : vector<4x128x32xf32> to vector<1x128x32xf32>
    %30 = vector.shape_cast %29 : vector<1x128x32xf32> to vector<128x32xf32>
    %31 = vector.extract_strided_slice %24 {offsets = [3, 0, 0], sizes = [1, 128, 32], strides = [1, 1, 1]} : vector<4x128x32xf32> to vector<1x128x32xf32>
    %32 = vector.shape_cast %31 : vector<1x128x32xf32> to vector<128x32xf32>
    %33 = tpu.concatenate %26, %28, %30, %32 in 1 : vector<128x32xf32>, vector<128x32xf32>, vector<128x32xf32>, vector<128x32xf32> -> vector<128x128xf32>
    %34 = arith.truncf %33 : vector<128x128xf32> to vector<128x128xbf16>
    %c0_15 = arith.constant 0 : index
    %c0_16 = arith.constant 0 : index
    %35 = vector.load %arg6[%c0_15, %c0_16] : memref<128x128xbf16, #tpu.memory_space<vmem>>, vector<128x128xbf16>
    %cst_17 = arith.constant dense<0.000000e+00> : vector<128x128xf32>
    %36 = tpu.matmul %34, %35, %cst_17 {dimension_numbers = #tpu.dot_dimension_numbers<[1], [0], [0], [1], [0, 0, 1, 1], [], []>} : vector<128x128xbf16>, vector<128x128xbf16>, vector<128x128xf32> -> vector<128x128xf32>
    %c0_18 = arith.constant 0 : index
    %c0_19 = arith.constant 0 : index
    %37 = vector.load %arg7[%c0_18, %c0_19] : memref<1x128xf32, #tpu.memory_space<vmem>>, vector<1x128xf32>
    %38 = vector.broadcast %37 : vector<1x128xf32> to vector<128x128xf32>
    %39 = arith.addf %36, %38 : vector<128x128xf32>
    %c0_20 = arith.constant 0 : index
    %c0_21 = arith.constant 0 : index
    %40 = vector.load %arg3[%c0_20, %c0_21] : memref<128x128xf32, #tpu.memory_space<vmem>>, vector<128x128xf32>
    %41 = arith.addf %40, %39 : vector<128x128xf32>
    %cst_22 = arith.constant dense<0.000000e+00> : vector<128xf32>
    %42 = vector.multi_reduction <add>, %41, %cst_22 [1] : vector<128x128xf32> to vector<128xf32>
    %43 = vector.shape_cast %42 : vector<128xf32> to vector<128x1xf32>
    %cst_23 = arith.constant 1.280000e+02 : f32
    %44 = vector.broadcast %cst_23 : f32 to vector<128x1xf32>
    %45 = arith.divf %43, %44 : vector<128x1xf32>
    %46 = vector.broadcast %45 : vector<128x1xf32> to vector<128x128xf32>
    %47 = arith.subf %41, %46 : vector<128x128xf32>
    %48 = arith.mulf %47, %47 : vector<128x128xf32>
    %cst_24 = arith.constant dense<0.000000e+00> : vector<128xf32>
    %49 = vector.multi_reduction <add>, %48, %cst_24 [1] : vector<128x128xf32> to vector<128xf32>
    %50 = vector.shape_cast %49 : vector<128xf32> to vector<128x1xf32>
    %cst_25 = arith.constant 1.280000e+02 : f32
    %51 = vector.broadcast %cst_25 : f32 to vector<128x1xf32>
    %52 = arith.divf %50, %51 : vector<128x1xf32>
    %cst_26 = arith.constant 9.99999974E-6 : f32
    %53 = vector.broadcast %cst_26 : f32 to vector<128x1xf32>
    %54 = arith.addf %52, %53 : vector<128x1xf32>
    %55 = math.rsqrt %54 : vector<128x1xf32>
    %56 = vector.broadcast %55 : vector<128x1xf32> to vector<128x128xf32>
    %57 = arith.mulf %47, %56 : vector<128x128xf32>
    %c0_27 = arith.constant 0 : index
    %c0_28 = arith.constant 0 : index
    %58 = vector.load %arg8[%c0_27, %c0_28] : memref<1x128xf32, #tpu.memory_space<vmem>>, vector<1x128xf32>
    %59 = vector.broadcast %58 : vector<1x128xf32> to vector<128x128xf32>
    %60 = arith.mulf %57, %59 : vector<128x128xf32>
    %c0_29 = arith.constant 0 : index
    %c0_30 = arith.constant 0 : index
    %61 = vector.load %arg9[%c0_29, %c0_30] : memref<1x128xf32, #tpu.memory_space<vmem>>, vector<1x128xf32>
    %62 = vector.broadcast %61 : vector<1x128xf32> to vector<128x128xf32>
    %63 = arith.addf %60, %62 : vector<128x128xf32>
    %64 = arith.truncf %63 : vector<128x128xf32> to vector<128x128xbf16>
    %c0_31 = arith.constant 0 : index
    %c0_32 = arith.constant 0 : index
    %65 = vector.load %arg10[%c0_31, %c0_32] : memref<128x128xbf16, #tpu.memory_space<vmem>>, vector<128x128xbf16>
    %cst_33 = arith.constant dense<0.000000e+00> : vector<128x128xf32>
    %66 = tpu.matmul %64, %65, %cst_33 {dimension_numbers = #tpu.dot_dimension_numbers<[1], [0], [0], [1], [0, 0, 1, 1], [], []>} : vector<128x128xbf16>, vector<128x128xbf16>, vector<128x128xf32> -> vector<128x128xf32>
    %c0_34 = arith.constant 0 : index
    %c0_35 = arith.constant 0 : index
    %67 = vector.load %arg11[%c0_34, %c0_35] : memref<1x128xf32, #tpu.memory_space<vmem>>, vector<1x128xf32>
    %68 = vector.broadcast %67 : vector<1x128xf32> to vector<128x128xf32>
    %69 = arith.addf %66, %68 : vector<128x128xf32>
    %cst_36 = arith.constant 0.000000e+00 : f32
    %70 = vector.broadcast %cst_36 : f32 to vector<128x128xf32>
    %71 = arith.maximumf %69, %70 : vector<128x128xf32>
    %72 = arith.truncf %71 : vector<128x128xf32> to vector<128x128xbf16>
    %c0_37 = arith.constant 0 : index
    %c0_38 = arith.constant 0 : index
    %73 = vector.load %arg12[%c0_37, %c0_38] : memref<128x128xbf16, #tpu.memory_space<vmem>>, vector<128x128xbf16>
    %cst_39 = arith.constant dense<0.000000e+00> : vector<128x128xf32>
    %74 = tpu.matmul %72, %73, %cst_39 {dimension_numbers = #tpu.dot_dimension_numbers<[1], [0], [0], [1], [0, 0, 1, 1], [], []>} : vector<128x128xbf16>, vector<128x128xbf16>, vector<128x128xf32> -> vector<128x128xf32>
    %c0_40 = arith.constant 0 : index
    %c0_41 = arith.constant 0 : index
    %75 = vector.load %arg13[%c0_40, %c0_41] : memref<1x128xf32, #tpu.memory_space<vmem>>, vector<1x128xf32>
    %76 = vector.broadcast %75 : vector<1x128xf32> to vector<128x128xf32>
    %77 = arith.addf %74, %76 : vector<128x128xf32>
    %78 = arith.addf %63, %77 : vector<128x128xf32>
    %cst_42 = arith.constant dense<0.000000e+00> : vector<128xf32>
    %79 = vector.multi_reduction <add>, %78, %cst_42 [1] : vector<128x128xf32> to vector<128xf32>
    %80 = vector.shape_cast %79 : vector<128xf32> to vector<128x1xf32>
    %cst_43 = arith.constant 1.280000e+02 : f32
    %81 = vector.broadcast %cst_43 : f32 to vector<128x1xf32>
    %82 = arith.divf %80, %81 : vector<128x1xf32>
    %83 = vector.broadcast %82 : vector<128x1xf32> to vector<128x128xf32>
    %84 = arith.subf %78, %83 : vector<128x128xf32>
    %85 = arith.mulf %84, %84 : vector<128x128xf32>
    %cst_44 = arith.constant dense<0.000000e+00> : vector<128xf32>
    %86 = vector.multi_reduction <add>, %85, %cst_44 [1] : vector<128x128xf32> to vector<128xf32>
    %87 = vector.shape_cast %86 : vector<128xf32> to vector<128x1xf32>
    %cst_45 = arith.constant 1.280000e+02 : f32
    %88 = vector.broadcast %cst_45 : f32 to vector<128x1xf32>
    %89 = arith.divf %87, %88 : vector<128x1xf32>
    %cst_46 = arith.constant 9.99999974E-6 : f32
    %90 = vector.broadcast %cst_46 : f32 to vector<128x1xf32>
    %91 = arith.addf %89, %90 : vector<128x1xf32>
    %92 = math.rsqrt %91 : vector<128x1xf32>
    %93 = vector.broadcast %92 : vector<128x1xf32> to vector<128x128xf32>
    %94 = arith.mulf %84, %93 : vector<128x128xf32>
    %c0_47 = arith.constant 0 : index
    %c0_48 = arith.constant 0 : index
    %95 = vector.load %arg14[%c0_47, %c0_48] : memref<1x128xf32, #tpu.memory_space<vmem>>, vector<1x128xf32>
    %96 = vector.broadcast %95 : vector<1x128xf32> to vector<128x128xf32>
    %97 = arith.mulf %94, %96 : vector<128x128xf32>
    %c0_49 = arith.constant 0 : index
    %c0_50 = arith.constant 0 : index
    %98 = vector.load %arg15[%c0_49, %c0_50] : memref<1x128xf32, #tpu.memory_space<vmem>>, vector<1x128xf32>
    %99 = vector.broadcast %98 : vector<1x128xf32> to vector<128x128xf32>
    %100 = arith.addf %97, %99 : vector<128x128xf32>
    %101 = tpu.transpose %100, [1, 0] : vector<128x128xf32> -> vector<128x128xf32>
    %c0_51 = arith.constant 0 : index
    %c0_52 = arith.constant 0 : index
    %c0_53 = arith.constant 0 : index
    %102 = vector.load %arg16[%c0_51, %c0_52, %c0_53] : memref<1x128x128xf32, #tpu.memory_space<vmem>>, vector<1x128x128xf32>
    %103 = vector.shape_cast %102 : vector<1x128x128xf32> to vector<128x128xf32>
    %104 = vector.shape_cast %101 : vector<128x128xf32> to vector<1x128x128xf32>
    tpu.vector_store %arg16[%c0_51, %c0_52, %c0_53], %104 {strides = array<i32>} : memref<1x128x128xf32, #tpu.memory_space<vmem>>, vector<1x128x128xf32>,
    return
  }
  func.func @transform_0(%arg0: i32, %arg1: i32) -> (i32, i32, i32) {
    %c0_i32 = arith.constant 0 : i32
    %c0_i32_0 = arith.constant 0 : i32
    %c0_i32_1 = arith.constant 0 : i32
    return %c0_i32, %arg1, %c0_i32_0 : i32, i32, i32
  }
  func.func @transform_1(%arg0: i32, %arg1: i32) -> (i32, i32) {
    %c0_i32 = arith.constant 0 : i32
    %c0_i32_0 = arith.constant 0 : i32
    return %arg1, %c0_i32 : i32, i32
  }
  func.func @transform_2(%arg0: i32, %arg1: i32) -> (i32, i32, i32, i32) {
    %c0_i32 = arith.constant 0 : i32
    %c0_i32_0 = arith.constant 0 : i32
    %c0_i32_1 = arith.constant 0 : i32
    %c0_i32_2 = arith.constant 0 : i32
    return %arg0, %c0_i32, %c0_i32_0, %c0_i32_1 : i32, i32, i32, i32
  }
  func.func @transform_3(%arg0: i32, %arg1: i32) -> (i32, i32, i32, i32) {
    %c0_i32 = arith.constant 0 : i32
    %c0_i32_0 = arith.constant 0 : i32
    %c0_i32_1 = arith.constant 0 : i32
    %c0_i32_2 = arith.constant 0 : i32
    return %arg0, %c0_i32, %c0_i32_0, %c0_i32_1 : i32, i32, i32, i32
  }
  func.func @transform_4(%arg0: i32, %arg1: i32) -> (i32, i32) {
    %c0_i32 = arith.constant 0 : i32
    %c0_i32_0 = arith.constant 0 : i32
    %c0_i32_1 = arith.constant 0 : i32
    return %c0_i32, %c0_i32_0 : i32, i32
  }
  func.func @transform_5(%arg0: i32, %arg1: i32) -> (i32, i32) {
    %c0_i32 = arith.constant 0 : i32
    %c0_i32_0 = arith.constant 0 : i32
    %c0_i32_1 = arith.constant 0 : i32
    return %c0_i32, %c0_i32_0 : i32, i32
  }
  func.func @transform_6(%arg0: i32, %arg1: i32) -> (i32, i32) {
    %c0_i32 = arith.constant 0 : i32
    %c0_i32_0 = arith.constant 0 : i32
    %c0_i32_1 = arith.constant 0 : i32
    return %c0_i32, %c0_i32_0 : i32, i32
  }
  func.func @transform_7(%arg0: i32, %arg1: i32) -> (i32, i32) {
    %c0_i32 = arith.constant 0 : i32
    %c0_i32_0 = arith.constant 0 : i32
    %c0_i32_1 = arith.constant 0 : i32
    return %c0_i32, %c0_i32_0 : i32, i32
  }
  func.func @transform_8(%arg0: i32, %arg1: i32) -> (i32, i32) {
    %c0_i32 = arith.constant 0 : i32
    %c0_i32_0 = arith.constant 0 : i32
    %c0_i32_1 = arith.constant 0 : i32
    return %c0_i32, %c0_i32_0 : i32, i32
  }
  func.func @transform_9(%arg0: i32, %arg1: i32) -> (i32, i32) {
    %c0_i32 = arith.constant 0 : i32
    %c0_i32_0 = arith.constant 0 : i32
    %c0_i32_1 = arith.constant 0 : i32
    return %c0_i32, %c0_i32_0 : i32, i32
  }
  func.func @transform_10(%arg0: i32, %arg1: i32) -> (i32, i32) {
    %c0_i32 = arith.constant 0 : i32
    %c0_i32_0 = arith.constant 0 : i32
    %c0_i32_1 = arith.constant 0 : i32
    return %c0_i32, %c0_i32_0 : i32, i32
  }
  func.func @transform_11(%arg0: i32, %arg1: i32) -> (i32, i32) {
    %c0_i32 = arith.constant 0 : i32
    %c0_i32_0 = arith.constant 0 : i32
    %c0_i32_1 = arith.constant 0 : i32
    return %c0_i32, %c0_i32_0 : i32, i32
  }
  func.func @transform_12(%arg0: i32, %arg1: i32) -> (i32, i32) {
    %c0_i32 = arith.constant 0 : i32
    %c0_i32_0 = arith.constant 0 : i32
    %c0_i32_1 = arith.constant 0 : i32
    return %c0_i32, %c0_i32_0 : i32, i32
  }
  func.func @transform_13(%arg0: i32, %arg1: i32) -> (i32, i32) {
    %c0_i32 = arith.constant 0 : i32
    %c0_i32_0 = arith.constant 0 : i32
    %c0_i32_1 = arith.constant 0 : i32
    return %c0_i32, %c0_i32_0 : i32, i32
  }
  func.func @transform_14(%arg0: i32, %arg1: i32) -> (i32, i32, i32) {
    %c0_i32 = arith.constant 0 : i32
    %c0_i32_0 = arith.constant 0 : i32
    return %arg0, %c0_i32, %arg1 : i32, i32, i32
  }
}

</mosaic_0001>

<bundles_post_ra>
// kernel: tpu_custom_call.1
= control target key start
LH: loop header
LB: loop body
LE: loop exit
PB: predicated region body
PF: predicated region fallthrough
CT: control target
= control target key end

     0   :  { %s7646_s0 = inlined_call_operand.vmem [shape: bf16[4,256,32], index: 0, kind: input, shape index: {}]   ;;  %s7647_s1 = inlined_call_operand.vmem [shape: f32[256,128], index: 1, kind: input, shape index: {}]   ;;  %s7648_s2 = inlined_call_operand.vmem [shape: bf16[2,4,32,128], index: 2, kind: input, shape index: {}]   ;;  %s7649_s3 = inlined_call_operand.vmem [shape: bf16[2,4,128,32], index: 3, kind: input, shape index: {}]   ;;  %s7650_s4 = inlined_call_operand.vmem [shape: bf16[128,128], index: 4, kind: input, shape index: {}]   ;;  %s7651_s5 = inlined_call_operand.vmem [shape: f32[1,128], index: 5, kind: input, shape index: {}]   ;;  %s7652_s6 = inlined_call_operand.vmem [shape: f32[1,128], index: 6, kind: input, shape index: {}]   ;;  %s7653_s7 = inlined_call_operand.vmem [shape: f32[1,128], index: 7, kind: input, shape index: {}]   ;;  %s7654_s8 = inlined_call_operand.vmem [shape: bf16[128,128], index: 8, kind: input, shape index: {}]   ;;  %s7655_s9 = inlined_call_operand.vmem [shape: f32[1,128], index: 9, kind: input, shape index: {}]   ;;  %s7656_s10 = inlined_call_operand.vmem [shape: bf16[128,128], index: 10, kind: input, shape index: {}]   ;;  %s7657_s11 = inlined_call_operand.vmem [shape: f32[1,128], index: 11, kind: input, shape index: {}]   ;;  %s7658_s12 = inlined_call_operand.vmem [shape: f32[1,128], index: 12, kind: input, shape index: {}]   ;;  %s7659_s13 = inlined_call_operand.vmem [shape: f32[1,128], index: 13, kind: input, shape index: {}]   ;;  %s7660_s14 = inlined_call_operand.hbm [shape: f32[2,128,256], index: 14, kind: output, shape index: {}]  }
   0x1   :  { %7707 = sst [smem:[#allocation31_spill]] %s7646_s0 }
   0x2   :  { %7708 = sst [smem:[#allocation32_spill]] %s7647_s1 }
   0x3   :  { %7709 = sst [smem:[#allocation33_spill]] %s7652_s6 }
   0x4   :  { %7710 = sst [smem:[#allocation34_spill]] %s7653_s7 }
   0x5   :  { %7711 = sst [smem:[#allocation35_spill]] %s7655_s9 }
   0x6   :  { %7712 = sst [smem:[#allocation36_spill]] %s7657_s11 }
   0x7   :  { %7713 = sst [smem:[#allocation37_spill]] %s7658_s12 }
   0x8   :  { %7714 = sst [smem:[#allocation38_spill]] %s7659_s13 }
   0x9   :  { %7715 = sst [smem:[#allocation39_spill]] %s7660_s14 }
   0xa   :  { %19 = vsyncpa [#allocation4], 0 }
   0xb   :  { %21 = vsyncpa [#allocation4 + $0x1], 0  ;;  %s5895_s29 = smov 0   ;;  %s5897_s30 = smov 0  }
   0xc   :  { %s5899_s15 = smov 0   ;;  %s5901_s16 = smov 0  }
   0xd   :  { %s5903_s17 = smov 0   ;;  %s5905_s18 = smov 0  }
   0xe   :  { %s5907_s19 = smov 0   ;;  %s5909_s20 = smov 0  }
   0xf   :  { %s5911_s21 = smov 0   ;;  %s5913_s22 = smov 0  }
  0x10 LB: > { %s4453_s23 = sadd.s32 4294967295, %s5811_s22   ;;  %s4454_s24 = sadd.s32 4294967294, %s5811_s22   ;;  %s5811_s22 = sphi %s5913_s22, %s27_s22   ;;  %s5807_s21 = sphi %s5911_s21, %s7822_s21   ;;  %s5803_s20 = sphi %s5909_s20, %s7821_s20   ;;  %s5799_s19 = sphi %s5907_s19, %s7820_s19   ;;  %s5795_s18 = sphi %s5905_s18, %s7819_s18   ;;  %s5791_s17 = sphi %s5903_s17, %s7818_s17   ;;  %s5787_s16 = sphi %s5901_s16, %s7817_s16   ;;  %s5783_s15 = sphi %s5899_s15, %s7816_s15   ;;  %s5779_s30 = sphi %s5897_s30, %s7815_s30   ;;  %s5775_s29 = sphi %s5895_s29, %s7814_s29  }
  0x11   : > { %s36_s25 = sadd.s32 1, %s5803_s20  ;;  %s39_s26 = sadd.s32 1, %s5807_s21 }
  0x12   : > { %p37_p0 = scmp.ge.s32.totalorder %s36_s25, 2  ;;  %s46_s27 = sadd.s32 1, %s5791_s17 }
  0x13   : > { %p53_p1 = scmp.ne.s32.totalorder %s5791_s17, %s5787_s16  ;;  %p54_p2 = scmp.eq.s32.totalorder %s5811_s22, 0 }
  0x14   : > { %s7824_s25 = smov (%p37_p0, %s36_s25), 0  ;;  %s7826_s26 = smov (!%p37_p0, %s39_s26), %s5807_s21 }
  0x15   : > { %7716 = sst [smem:[#allocation6_spill]] %s7824_s25  ;;  %s43_s28 = ssub.s32 %s5803_s20, %s7824_s25 }
  0x16   : > { %p5958_p3 = por %p54_p2, %p53_p1  ;;  %p41_p4 = scmp.ge.s32.totalorder %s7826_s26, 2 }
  0x17   : > { %p44_p5 = scmp.eq.s32.totalorder %s43_s28, 0  ;;  %s362_s13 = sadd.s32 1, %s5783_s15 }
  0x18   : > { %p372_p6 = scmp.ne.s32.totalorder %s5783_s15, %s5779_s30  ;;  %s7828_s26 = smov (%p41_p4, %s7826_s26), 0 }
  0x19   : > { %s5968_s12 = scalar_select %p44_p5, %s5791_s17, %s46_s27  }
  0x1a   : > { %s357_s11 = ssub.s32 %s5807_s21, %s7828_s26  ;;  %p373_p7 = scmp.eq.s32.totalorder %s4453_s23, 3 }
  0x1b   : > { %s359_s9 = sor.u32 %s357_s11, %s43_s28  ;;  %p378_p8 = scmp.ne.s32.totalorder %s5779_s30, %s5775_s29 }
  0x1c   : > { %p360_p9 = scmp.eq.s32.totalorder %s359_s9, 0  ;;  %p5974_p10 = por %p373_p7, %p372_p6 }
  0x1d   : > { %p379_p11 = scmp.eq.s32.totalorder %s4454_s24, 3  ;;  %p4456_p13 = scmp.ge.s32.totalorder %s5811_s22, 4 }
  0x1e   : > { %s5979_s7 = scalar_select %p360_p9, %s5783_s15, %s362_s13  }
  0x1f   : > { %p5981_p12 = por %p379_p11, %p378_p8  ;;  %425 = sbr.rel (%p4456_p13) target bundleno = 64 (0x40), region = 56 }
  0x26   : > { %428 = sbr.rel (!%p5958_p3) target bundleno = 64 (0x40), region = 60  ;;  %s430_s9 = sand.u32 (%p5958_p3), 1, %s5791_s17  }
  0x27   : > { %s4609_s11 = sshll.u32 (%p5958_p3), %s5803_s20, 6  ;;  %s4457_s23 = sshll.u32 (%p5958_p3), %s430_s9, 8 }
  0x28   : > { %s7720_s0 = sld [smem:[#allocation31_spill]] (%p5958_p3)  ;;  %s5998_s14 = scalar_lea.vmem (%p5958_p3), [#allocation2], %s4457_s23 }
  0x2e   : > { %s5993_s13 = scalar_lea.vmem %s7720_s0, %s4609_s11 }
  0x2f   : > { %v451_v0 = vld [vmem:[%s5993_s13] sm:$0xff]   ;;  %v455_v1 = vld [vmem:[%s5993_s13 + $0x8] sm:$0xff]   ;;  %v459_v2 = vld [vmem:[%s5993_s13 + $0x10] sm:$0xff]  }
  0x30   : > { %452 = vst [vmem:[%s5998_s14] sm:$0xff] %v451_v0   ;;  %456 = vst [vmem:[%s5998_s14 + $0x8] sm:$0xff] %v455_v1   ;;  %v463_v3 = vld [vmem:[%s5993_s13 + $0x18] sm:$0xff]   ;;  %v467_v4 = vld [vmem:[%s5993_s13 + $0x20] sm:$0xff]  }
  0x31   : > { %460 = vst [vmem:[%s5998_s14 + $0x10] sm:$0xff] %v459_v2   ;;  %v471_v5 = vld [vmem:[%s5993_s13 + $0x28] sm:$0xff]   ;;  %464 = vst [vmem:[%s5998_s14 + $0x18] sm:$0xff] %v463_v3   ;;  %v475_v6 = vld [vmem:[%s5993_s13 + $0x30] sm:$0xff]  }
  0x32   : > { %468 = vst [vmem:[%s5998_s14 + $0x20] sm:$0xff] %v467_v4   ;;  %472 = vst [vmem:[%s5998_s14 + $0x28] sm:$0xff] %v471_v5   ;;  %v479_v7 = vld [vmem:[%s5993_s13 + $0x38] sm:$0xff]   ;;  %v483_v8 = vld [vmem:[%s5993_s13 + $0x80] sm:$0xff]  }
  0x33   : > { %476 = vst [vmem:[%s5998_s14 + $0x30] sm:$0xff] %v475_v6   ;;  %480 = vst [vmem:[%s5998_s14 + $0x38] sm:$0xff] %v479_v7   ;;  %v487_v9 = vld [vmem:[%s5993_s13 + $0x88] sm:$0xff]   ;;  %v491_v10 = vld [vmem:[%s5993_s13 + $0x90] sm:$0xff]  }
  0x34   : > { %484 = vst [vmem:[%s5998_s14 + $0x40] sm:$0xff] %v483_v8   ;;  %v495_v11 = vld [vmem:[%s5993_s13 + $0x98] sm:$0xff]   ;;  %488 = vst [vmem:[%s5998_s14 + $0x48] sm:$0xff] %v487_v9   ;;  %v499_v12 = vld [vmem:[%s5993_s13 + $0xa0] sm:$0xff]  }
  0x35   : > { %492 = vst [vmem:[%s5998_s14 + $0x50] sm:$0xff] %v491_v10   ;;  %496 = vst [vmem:[%s5998_s14 + $0x58] sm:$0xff] %v495_v11   ;;  %v503_v13 = vld [vmem:[%s5993_s13 + $0xa8] sm:$0xff]   ;;  %v507_v14 = vld [vmem:[%s5993_s13 + $0xb0] sm:$0xff]  }
  0x36   : > { %500 = vst [vmem:[%s5998_s14 + $0x60] sm:$0xff] %v499_v12   ;;  %504 = vst [vmem:[%s5998_s14 + $0x68] sm:$0xff] %v503_v13   ;;  %v511_v15 = vld [vmem:[%s5993_s13 + $0xb8] sm:$0xff]   ;;  %v515_v16 = vld [vmem:[%s5993_s13 + $0x100] sm:$0xff]  }
  0x37   : > { %508 = vst [vmem:[%s5998_s14 + $0x70] sm:$0xff] %v507_v14   ;;  %v519_v17 = vld [vmem:[%s5993_s13 + $0x108] sm:$0xff]   ;;  %512 = vst [vmem:[%s5998_s14 + $0x78] sm:$0xff] %v511_v15   ;;  %v523_v18 = vld [vmem:[%s5993_s13 + $0x110] sm:$0xff]  }
  0x38   : > { %516 = vst [vmem:[%s5998_s14 + $0x80] sm:$0xff] %v515_v16   ;;  %520 = vst [vmem:[%s5998_s14 + $0x88] sm:$0xff] %v519_v17   ;;  %v527_v19 = vld [vmem:[%s5993_s13 + $0x118] sm:$0xff]   ;;  %v531_v20 = vld [vmem:[%s5993_s13 + $0x120] sm:$0xff]  }
  0x39   : > { %524 = vst [vmem:[%s5998_s14 + $0x90] sm:$0xff] %v523_v18   ;;  %528 = vst [vmem:[%s5998_s14 + $0x98] sm:$0xff] %v527_v19   ;;  %v535_v21 = vld [vmem:[%s5993_s13 + $0x128] sm:$0xff]   ;;  %v539_v22 = vld [vmem:[%s5993_s13 + $0x130] sm:$0xff]  }
  0x3a   : > { %532 = vst [vmem:[%s5998_s14 + $0xa0] sm:$0xff] %v531_v20   ;;  %v543_v23 = vld [vmem:[%s5993_s13 + $0x138] sm:$0xff]   ;;  %536 = vst [vmem:[%s5998_s14 + $0xa8] sm:$0xff] %v535_v21   ;;  %v547_v24 = vld [vmem:[%s5993_s13 + $0x180] sm:$0xff]  }
  0x3b   : > { %540 = vst [vmem:[%s5998_s14 + $0xb0] sm:$0xff] %v539_v22   ;;  %544 = vst [vmem:[%s5998_s14 + $0xb8] sm:$0xff] %v543_v23   ;;  %v551_v25 = vld [vmem:[%s5993_s13 + $0x188] sm:$0xff]   ;;  %v555_v26 = vld [vmem:[%s5993_s13 + $0x190] sm:$0xff]  }
  0x3c   : > { %548 = vst [vmem:[%s5998_s14 + $0xc0] sm:$0xff] %v547_v24   ;;  %552 = vst [vmem:[%s5998_s14 + $0xc8] sm:$0xff] %v551_v25   ;;  %v559_v27 = vld [vmem:[%s5993_s13 + $0x198] sm:$0xff]   ;;  %v563_v28 = vld [vmem:[%s5993_s13 + $0x1a0] sm:$0xff]  }
  0x3d   : > { %556 = vst [vmem:[%s5998_s14 + $0xd0] sm:$0xff] %v555_v26   ;;  %v567_v29 = vld [vmem:[%s5993_s13 + $0x1a8] sm:$0xff]   ;;  %560 = vst [vmem:[%s5998_s14 + $0xd8] sm:$0xff] %v559_v27   ;;  %v571_v30 = vld [vmem:[%s5993_s13 + $0x1b0] sm:$0xff]  }
  0x3e   : > { %564 = vst [vmem:[%s5998_s14 + $0xe0] sm:$0xff] %v563_v28   ;;  %568 = vst [vmem:[%s5998_s14 + $0xe8] sm:$0xff] %v567_v29   ;;  %v575_v31 = vld [vmem:[%s5993_s13 + $0x1b8] sm:$0xff]  }
  0x3f   : > { %572 = vst [vmem:[%s5998_s14 + $0xf0] sm:$0xff] %v571_v30   ;;  %576 = vst [vmem:[%s5998_s14 + $0xf8] sm:$0xff] %v575_v31  }
  0x40 PF: > { %p4460_p0 = scmp.ge.s32.totalorder %s5811_s22, 1  ;;  %p753_p1 = scmp.lt.s32.totalorder %s5811_s22, 5 }
  0x42   : > { %p754_p2 = pnand %p4460_p0, %p753_p1 }
  0x44   : > { %757 = sbr.rel (%p754_p2) target bundleno = 2560 (0xa00), region = 113 }
  0x4b   : > { %p827_p3 = scmp.lt.s32.totalorder %s5799_s19, 1  ;;  %s760_s24 = sand.u32 1, %s5787_s16   ;;  %vm970_vm0 = vcmask 261120   ;;  %v1611_v8 = vlaneseq  ;;  %vm3202_vm2 = vcmask 523264   ;;  %vm3219_vm3 = vcmask 785408  }
  0x4c   : > { %s4461_s9 = sshll.u32 %s760_s24, 8  ;;  %s7704_s13 = smov 64  }
  0x4d   : > { %s6066_s11 = scalar_select %p827_p3, %s5799_s19, 1  ;;  %v6154_v9 = vand.u32 127, %v1611_v8 }
  0x4e   : > { %s6069_s27 = scalar_lea.vmem [#allocation2], %s4461_s9  ;;  %s5815_s28 = smov 96  }
  0x4f   : > { %s4610_s23 = sshll.u32 %s6066_s11, 6  ;;  %v5287_v32 = vld [vmem:[%s6069_s27] sm:$0xff]   ;;  %v5289_v36 = vld [vmem:[%s6069_s27 + $0x8] sm:$0xff]   ;;  %v5291_v38 = vld [vmem:[%s6069_s27 + $0x10] sm:$0xff]   ;;  %s4611_s16 = sshll.u32 %s6066_s11, 8  ;;  %vm1613_vm1 = vcmp.lt.s32.totalorder %v6154_v9, 16 }
  0x50   : > { %s6074_s14 = scalar_lea.vmem %s7648_s2, %s4610_s23  ;;  %4768 = vmatprep.mubr.msk.bf16.mxu0 %vm970_vm0, %v5287_v32  ;;  %v5288_v35 = vld [vmem:[%s6069_s27 + $0x20] sm:$0xff]   ;;  %v5290_v37 = vld [vmem:[%s6069_s27 + $0x28] sm:$0xff]   ;;  %v5294_v40 = vld [vmem:[%s6069_s27 + $0x30] sm:$0xff]   ;;  %s6126_s23 = scalar_lea.vmem %s7649_s3, %s4611_s16 }
  0x51   : > { %v5285_v33 = vld [vmem:[%s6074_s14] sm:$0xff]   ;;  %v5286_v34 = vld [vmem:[%s6074_s14 + $0x8] sm:$0xff]   ;;  %4776 = vmatprep.mubr.msk.bf16.mxu1 %vm970_vm0, %v5288_v35  ;;  %v5293_v39 = vld [vmem:[%s6074_s14 + $0x10] sm:$0xff]   ;;  %s5813_s11 = smov 32   ;;  %s7804_s1 = sld [smem:[#allocation32_spill]] }
  0x52   : > { %4764 = vmatprep.subr.bf16.mxu0 %v5285_v33  ;;  %5068 = vmatprep.subr.bf16.mxu1 %v5285_v33  ;;  %v5296_v41 = vld [vmem:[%s6074_s14 + $0x20] sm:$0xff]   ;;  %v5297_v42 = vld [vmem:[%s6074_s14 + $0x18] sm:$0xff]   ;;  %v5298_v44 = vld [vmem:[%s6074_s14 + $0x28] sm:$0xff]   ;;  %s7807_s16 = sld [smem:[#allocation35_spill]]  ;;  %s7808_s9 = sld [smem:[#allocation36_spill]] }
  0x53   : > { %4765 = vmatpush3.bf16.msra.mxu0 %v5285_v33  ;;  %5070 = vmatpush3.bf16.msra.mxu1 %v5285_v33  ;;  %v5292_v43 = vld [vmem:[%s6069_s27 + $0x18] sm:$0xff]   ;;  %v5299_v46 = vld [vmem:[%s6069_s27 + $0x40] sm:$0xff]   ;;  %v5300_v48 = vld [vmem:[%s6069_s27 + $0x48] sm:$0xff]  }
  0x54   : > { %4766 = vmatprep.subr.bf16.mxu0 %v5286_v34  ;;  %5069 = vmatprep.subr.bf16.mxu1 %v5286_v34  ;;  %v5295_v45 = vld [vmem:[%s6069_s27 + $0x38] sm:$0xff]   ;;  %v5301_v47 = vld [vmem:[%s6069_s27 + $0x80] sm:$0xff]   ;;  %v5302_v49 = vld [vmem:[%s6069_s27 + $0x88] sm:$0xff]  }
  0x55   : > { %v5303_v50 = vld [vmem:[%s6069_s27 + $0x50] sm:$0xff]   ;;  %v5304_v53 = vld [vmem:[%s6069_s27 + $0x58] sm:$0xff]   ;;  %v5307_v56 = vld [vmem:[%s6069_s27 + $0x60] sm:$0xff]  }
  0x56   : > { %v5305_v51 = vld [vmem:[%s6069_s27 + $0x90] sm:$0xff]   ;;  %v5314_v54 = vld [vmem:[%s6074_s14 + $0x38] sm:$0xff]   ;;  %v5310_v57 = vld [vmem:[%s6069_s27 + $0xa0] sm:$0xff]  }
  0x57   : > { %4767 = vmatpush3.bf16.msra.mxu0 %v5286_v34  ;;  %5071 = vmatpush3.bf16.msra.mxu1 %v5286_v34  ;;  %v5309_v52 = vld [vmem:[%s6074_s14 + $0x30] sm:$0xff]   ;;  %v5306_v55 = vld [vmem:[%s6069_s27 + $0x98] sm:$0xff]   ;;  %v5308_v58 = vld [vmem:[%s6069_s27 + $0x68] sm:$0xff]  }
  0x58   : > { %4784 = vmatprep.subr.bf16.mxu1 %v5293_v39  ;;  %4804 = vmatprep.subr.bf16.mxu0 %v5296_v41  ;;  %v5311_v59 = vld [vmem:[%s6069_s27 + $0xa8] sm:$0xff]   ;;  %v5312_v60 = vld [vmem:[%s6069_s27 + $0x70] sm:$0xff]   ;;  %v5313_v62 = vld [vmem:[%s6069_s27 + $0x78] sm:$0xff]  }
  0x59   : > { %v5315_v61 = vld [vmem:[%s6069_s27 + $0xb0] sm:$0xff]   ;;  %v5316_v63 = vld [vmem:[%s6069_s27 + $0xb8] sm:$0xff]   ;;  %v5317_v0 = vld [vmem:[%s6069_s27 + $0xc0] sm:$0xff]  }
  0x5a   : > { %4769 = vmatmul.mubr.msk.bf16.vlgmr.msra.gmra.mrb[0].mxu0 %vm970_vm0, %v5289_v36  ;;  %4777 = vmatmul.mubr.msk.bf16.vlgmr.msra.gmra.mrb[0].mxu1 %vm970_vm0, %v5290_v37  ;;  %v5318_v1 = vld [vmem:[%s6069_s27 + $0xc8] sm:$0xff]   ;;  %v5319_v2 = vld [vmem:[%s6069_s27 + $0xd0] sm:$0xff]   ;;  %v5320_v3 = vld [vmem:[%s6069_s27 + $0xd8] sm:$0xff]  }
  0x5b   : > { %4772 = vmatprep.mubr.msk.bf16.mxu0 %vm970_vm0, %v5291_v38  ;;  %4780 = vmatprep.mubr.msk.bf16.mxu1 %vm970_vm0, %v5294_v40  ;;  %v5321_v4 = vld [vmem:[%s6069_s27 + $0xe0] sm:$0xff]   ;;  %v5322_v5 = vld [vmem:[%s6069_s27 + $0xe8] sm:$0xff]   ;;  %v5323_v6 = vld [vmem:[%s6069_s27 + $0xf0] sm:$0xff]  }
  0x5c   : > { %4785 = vmatpush3.bf16.msra.mxu1 %v5293_v39  ;;  %4805 = vmatpush3.bf16.msra.mxu0 %v5296_v41  ;;  %v5324_v7 = vld [vmem:[%s6069_s27 + $0xf8] sm:$0xff]  }
  0x5d   : > { %4786 = vmatprep.subr.bf16.mxu1 %v5297_v42  ;;  %4806 = vmatprep.subr.bf16.mxu0 %v5298_v44 }
  0x60   : > { %4787 = vmatpush3.bf16.msra.mxu1 %v5297_v42  ;;  %4807 = vmatpush3.bf16.msra.mxu0 %v5298_v44 }
  0x61   : > { %4824 = vmatprep.subr.bf16.mxu1 %v5309_v52 }
  0x62   : > { %4773 = vmatmul.mubr.msk.bf16.gmra.mrb[4].mxu0 %vm970_vm0, %v5292_v43  ;;  %4781 = vmatmul.mubr.msk.bf16.gmra.mrb[4].mxu1 %vm970_vm0, %v5295_v45 }
  0x63   : > { %4788 = vmatprep.mubr.msk.bf16.mxu1 %vm970_vm0, %v5299_v46  ;;  %4808 = vmatprep.mubr.msk.bf16.mxu0 %vm970_vm0, %v5301_v47 }
  0x6a   : > { %4789 = vmatmul.mubr.msk.bf16.vlgmr.msra.gmra.mrb[8].mxu1 %vm970_vm0, %v5300_v48  ;;  %4809 = vmatmul.mubr.msk.bf16.vlgmr.msra.gmra.mrb[8].mxu0 %vm970_vm0, %v5302_v49 }
  0x6b   : > { %4792 = vmatprep.mubr.msk.bf16.mxu1 %vm970_vm0, %v5303_v50  ;;  %4812 = vmatprep.mubr.msk.bf16.mxu0 %vm970_vm0, %v5305_v51 }
  0x6c   : > { %4825 = vmatpush3.bf16.msra.mxu1 %v5309_v52 }
  0x6d   : > { %4826 = vmatprep.subr.bf16.mxu1 %v5314_v54 }
  0x70   : > { %4827 = vmatpush3.bf16.msra.mxu1 %v5314_v54 }
  0x72   : > { %4793 = vmatmul.mubr.msk.bf16.gmra.mrb[12].mxu1 %vm970_vm0, %v5304_v53  ;;  %4813 = vmatmul.mubr.msk.bf16.gmra.mrb[12].mxu0 %vm970_vm0, %v5306_v55 }
  0x73   : > { %4796 = vmatprep.mubr.msk.bf16.mxu1 %vm970_vm0, %v5307_v56  ;;  %4816 = vmatprep.mubr.msk.bf16.mxu0 %vm970_vm0, %v5310_v57 }
  0x7a   : > { %4797 = vmatmul.mubr.msk.bf16.gmra.mrb[16].mxu1 %vm970_vm0, %v5308_v58  ;;  %4817 = vmatmul.mubr.msk.bf16.gmra.mrb[16].mxu0 %vm970_vm0, %v5311_v59 }
  0x7b   : > { %4800 = vmatprep.mubr.msk.bf16.mxu1 %vm970_vm0, %v5312_v60  ;;  %4820 = vmatprep.mubr.msk.bf16.mxu0 %vm970_vm0, %v5315_v61 }
  0x82   : > { %4801 = vmatmul.mubr.msk.bf16.gmra.mrb[20].mxu1 %vm970_vm0, %v5313_v62  ;;  %4821 = vmatmul.mubr.msk.bf16.gmra.mrb[20].mxu0 %vm970_vm0, %v5316_v63 }
  0x83   : > { %4828 = vmatprep.mubr.msk.bf16.mxu1 %vm970_vm0, %v5317_v0 }
  0x8a   : > { %4829 = vmatmul.mubr.msk.bf16.vlgmr.msra.gmra.mrb[24].mxu1 %vm970_vm0, %v5318_v1 }
  0x8b   : > { %4832 = vmatprep.mubr.msk.bf16.mxu1 %vm970_vm0, %v5319_v2 }
  0x92   : > { %4833 = vmatmul.mubr.msk.bf16.gmra.mrb[28].mxu1 %vm970_vm0, %v5320_v3 }
  0x93   : > { %4836 = vmatprep.mubr.msk.bf16.mxu1 %vm970_vm0, %v5321_v4 }
  0x9a   : > { %4837 = vmatmul.mubr.msk.bf16.gmra.mrb[32].mxu1 %vm970_vm0, %v5322_v5 }
  0x9b   : > { %4840 = vmatprep.mubr.msk.bf16.mxu1 %vm970_vm0, %v5323_v6 }
  0xa2   : > { %4841 = vmatmul.mubr.msk.bf16.gmra.mrb[36].mxu1 %vm970_vm0, %v5324_v7 }
 0x12d   : > { %v4770_v10 = vpop.f32.mrb[0].mxu0  ;;  %v4778_v11 = vpop.f32.mrb[0].mxu1 }
 0x12e   : > { %v1029_v12 = vpop.f32.mrb[1].mxu0  ;;  %v1061_v13 = vpop.f32.mrb[1].mxu1  ;;  %v6159_v14 = vsel %vm1613_vm1, %v4778_v11, -1e+30  ;;  %v6163_v15 = vsel %vm1613_vm1, %v4770_v10, -1e+30 }
 0x12f   : > { %1698 = vmax.xlane.f32.xlu0 %v6159_v14  ;;  %v4779_v16 = vpop.f32.mrb[2].mxu1  ;;  %1682 = vmax.xlane.f32.xlu1 %v6163_v15  ;;  %v4771_v17 = vpop.f32.mrb[2].mxu0  ;;  %v6169_v20 = vsel %vm1613_vm1, %v1029_v12, -1e+30  ;;  %v6179_v24 = vsel %vm1613_vm1, %v1061_v13, -1e+30 }
 0x130   : > { %v1032_v18 = vpop.f32.mrb[3].mxu0  ;;  %v1064_v19 = vpop.f32.mrb[3].mxu1  ;;  %v6173_v21 = vsel %vm1613_vm1, %v4771_v17, -1e+30  ;;  %v6183_v25 = vsel %vm1613_vm1, %v4779_v16, -1e+30 }
 0x131   : > { %v6189_v32 = vsel %vm1613_vm1, %v1064_v19, -1e+30  ;;  %v6193_v33 = vsel %vm1613_vm1, %v1032_v18, -1e+30 }
 0x133   : > { %1678 = vmax.xlane.f32.xlu0 %v6169_v20  ;;  %1684 = vmax.xlane.f32.xlu1 %v6173_v21 }
 0x135   : > { %v4774_v22 = vpop.f32.mrb[4].mxu0  ;;  %v4782_v23 = vpop.f32.mrb[4].mxu1 }
 0x136   : > { %v1045_v26 = vpop.f32.mrb[5].mxu0  ;;  %v1077_v27 = vpop.f32.mrb[5].mxu1  ;;  %v6199_v36 = vsel %vm1613_vm1, %v4774_v22, -1e+30  ;;  %v6209_v44 = vsel %vm1613_vm1, %v4782_v23, -1e+30 }
 0x137   : > { %1694 = vmax.xlane.f32.xlu0 %v6179_v24  ;;  %1700 = vmax.xlane.f32.xlu1 %v6183_v25  ;;  %v4775_v28 = vpop.f32.mrb[6].mxu0  ;;  %v4783_v29 = vpop.f32.mrb[6].mxu1  ;;  %v6219_v48 = vsel %vm1613_vm1, %v1045_v26, -1e+30  ;;  %v6231_v56 = vsel %vm1613_vm1, %v1077_v27, -1e+30 }
 0x138   : > { %v1048_v30 = vpop.f32.mrb[7].mxu0  ;;  %v1080_v31 = vpop.f32.mrb[7].mxu1  ;;  %v6203_v37 = vsel %vm1613_vm1, %v4775_v28, -1e+30  ;;  %v6213_v45 = vsel %vm1613_vm1, %v4783_v29, -1e+30 }
 0x139   : > { %v6223_v49 = vsel %vm1613_vm1, %v1048_v30, -1e+30  ;;  %v6235_v57 = vsel %vm1613_vm1, %v1080_v31, -1e+30 }
 0x13b   : > { %1696 = vmax.xlane.f32.xlu1 %v6189_v32  ;;  %1680 = vmax.xlane.f32.xlu0 %v6193_v33 }
 0x13d   : > { %v4790_v34 = vpop.f32.mrb[8].mxu1  ;;  %v4810_v35 = vpop.f32.mrb[8].mxu0 }
 0x13e   : > { %v1202_v38 = vpop.f32.mrb[9].mxu1  ;;  %v1375_v39 = vpop.f32.mrb[9].mxu0  ;;  %v6243_v60 = vsel %vm1613_vm1, %v4790_v34, -1e+30  ;;  %v6259_v4 = vsel %vm1613_vm1, %v4810_v35, -1e+30 }
 0x13f   : > { %1690 = vmax.xlane.f32.xlu0 %v6199_v36  ;;  %1692 = vmax.xlane.f32.xlu1 %v6203_v37  ;;  %v4791_v40 = vpop.f32.mrb[10].mxu1  ;;  %v4811_v41 = vpop.f32.mrb[10].mxu0  ;;  %v6273_v8 = vsel %vm1613_vm1, %v1202_v38, -1e+30  ;;  %v6291_v19 = vsel %vm1613_vm1, %v1375_v39, -1e+30 }
 0x140   : > { %v1205_v42 = vpop.f32.mrb[11].mxu1  ;;  %v1378_v43 = vpop.f32.mrb[11].mxu0  ;;  %v6247_v61 = vsel %vm1613_vm1, %v4791_v40, -1e+30  ;;  %v6263_v5 = vsel %vm1613_vm1, %v4811_v41, -1e+30 }
 0x141   : > { %v6277_v10 = vsel %vm1613_vm1, %v1205_v42, -1e+30  ;;  %v6295_v22 = vsel %vm1613_vm1, %v1378_v43, -1e+30 }
 0x143   : > { %1706 = vmax.xlane.f32.xlu0 %v6209_v44  ;;  %1708 = vmax.xlane.f32.xlu1 %v6213_v45 }
 0x145   : > { %v4794_v46 = vpop.f32.mrb[12].mxu1  ;;  %v4814_v47 = vpop.f32.mrb[12].mxu0 }
 0x146   : > { %v1218_v50 = vpop.f32.mrb[13].mxu1  ;;  %v6225_v51 = vpop.f32.mrb[13].mxu0  ;;  %v6303_v26 = vsel %vm1613_vm1, %v4794_v46, -1e+30  ;;  %v6315_v31 = vsel %vm1613_vm1, %v4814_v47, -1e+30 }
 0x147   : > { %1686 = vmax.xlane.f32.xlu0 %v6219_v48  ;;  %1688 = vmax.xlane.f32.xlu1 %v6223_v49  ;;  %v4795_v52 = vpop.f32.mrb[14].mxu1  ;;  %v4815_v53 = vpop.f32.mrb[14].mxu0  ;;  %v6325_v38 = vsel %vm1613_vm1, %v1218_v50, -1e+30  ;;  %v6336_v43 = vsel %vm1613_vm1, %v6225_v51, -1e+30 }
 0x148   : > { %v1221_v54 = vpop.f32.mrb[15].mxu1  ;;  %v1394_v55 = vpop.f32.mrb[15].mxu0  ;;  %v6307_v27 = vsel %vm1613_vm1, %v4795_v52, -1e+30  ;;  %v6319_v34 = vsel %vm1613_vm1, %v4815_v53, -1e+30 }
 0x149   : > { %v6329_v39 = vsel %vm1613_vm1, %v1221_v54, -1e+30  ;;  %v6340_v46 = vsel %vm1613_vm1, %v1394_v55, -1e+30 }
 0x14a   : > { %7721 = vst [vmem:[#allocation7_spill] sm:$0xff] %v6340_v46 }
 0x14b   : > { %1702 = vmax.xlane.f32.xlu0 %v6231_v56  ;;  %1704 = vmax.xlane.f32.xlu1 %v6235_v57 }
 0x14d   : > { %v4798_v58 = vpop.f32.mrb[16].mxu1  ;;  %v6239_v59 = vpop.f32.mrb[16].mxu0 }
 0x14e   : > { %v6249_v62 = vpop.f32.mrb[17].mxu1  ;;  %v6251_v63 = vpop.f32.mrb[17].mxu0  ;;  %v6346_v50 = vsel %vm1613_vm1, %v4798_v58, -1e+30  ;;  %v6357_v55 = vsel %vm1613_vm1, %v6239_v59, -1e+30 }
 0x14f   : > { %1714 = vmax.xlane.f32.xlu0 %v6243_v60  ;;  %1716 = vmax.xlane.f32.xlu1 %v6247_v61  ;;  %v4799_v0 = vpop.f32.mrb[18].mxu1  ;;  %v4819_v1 = vpop.f32.mrb[18].mxu0  ;;  %7722 = vst [vmem:[#allocation8_spill] sm:$0xff] %v6346_v50 }
 0x150   : > { %v1237_v2 = vpop.f32.mrb[19].mxu1  ;;  %v6255_v3 = vpop.f32.mrb[19].mxu0  ;;  %v6350_v52 = vsel %vm1613_vm1, %v4799_v0, -1e+30  ;;  %v6361_v58 = vsel %vm1613_vm1, %v4819_v1, -1e+30 }
 0x151   : > { %7723 = vst [vmem:[#allocation9_spill] sm:$0xff] %v6350_v52  ;;  %7724 = vst [vmem:[#allocation10_spill] sm:$0xff] %v6361_v58 }
 0x153   : > { %1746 = vmax.xlane.f32.xlu0 %v6259_v4  ;;  %1748 = vmax.xlane.f32.xlu1 %v6263_v5 }
 0x155   : > { %v6267_v6 = vpop.f32.mrb[20].mxu1  ;;  %v6269_v7 = vpop.f32.mrb[20].mxu0 }
 0x156   : > { %v6279_v11 = vpop.f32.mrb[21].mxu1  ;;  %v6281_v12 = vpop.f32.mrb[21].mxu0 }
 0x157   : > { %1710 = vmax.xlane.f32.xlu0 %v6273_v8  ;;  %1712 = vmax.xlane.f32.xlu1 %v6277_v10  ;;  %v4803_v13 = vpop.f32.mrb[22].mxu1  ;;  %v4823_v16 = vpop.f32.mrb[22].mxu0 }
 0x158   : > { %v6285_v17 = vpop.f32.mrb[23].mxu1  ;;  %v6287_v18 = vpop.f32.mrb[23].mxu0 }
 0x15b   : > { %1742 = vmax.xlane.f32.xlu0 %v6291_v19  ;;  %1744 = vmax.xlane.f32.xlu1 %v6295_v22 }
 0x15d   : > { %v6299_v23 = vpop.f32.mrb[24].mxu1 }
 0x15e   : > { %v6309_v28 = vpop.f32.mrb[25].mxu1 }
 0x15f   : > { %1722 = vmax.xlane.f32.xlu0 %v6303_v26  ;;  %1724 = vmax.xlane.f32.xlu1 %v6307_v27  ;;  %v4831_v29 = vpop.f32.mrb[26].mxu1 }
 0x160   : > { %v1551_v30 = vpop.f32.mrb[27].mxu1 }
 0x163   : > { %1754 = vmax.xlane.f32.xlu0 %v6315_v31  ;;  %1756 = vmax.xlane.f32.xlu1 %v6319_v34 }
 0x165   : > { %v4834_v35 = vpop.f32.mrb[28].mxu1 }
 0x166   : > { %v1564_v40 = vpop.f32.mrb[29].mxu1 }
 0x167   : > { %1718 = vmax.xlane.f32.xlu0 %v6325_v38  ;;  %1720 = vmax.xlane.f32.xlu1 %v6329_v39  ;;  %v4835_v41 = vpop.f32.mrb[30].mxu1 }
 0x168   : > { %v1567_v42 = vpop.f32.mrb[31].mxu1 }
 0x16b   : > { %1750 = vmax.xlane.f32.xlu0 %v6336_v43  ;;  %1752 = vmax.xlane.f32.xlu1 %v6340_v46 }
 0x16d   : > { %v4838_v47 = vpop.f32.mrb[32].mxu1 }
 0x16e   : > { %v1580_v53 = vpop.f32.mrb[33].mxu1 }
 0x16f   : > { %1730 = vmax.xlane.f32.xlu0 %v6346_v50  ;;  %1732 = vmax.xlane.f32.xlu1 %v6350_v52  ;;  %v4839_v51 = vpop.f32.mrb[34].mxu1  ;;  %v6368_v52 = vsel %vm1613_vm1, %v6249_v62, -1e+30  ;;  %v6372_v50 = vsel %vm1613_vm1, %v1237_v2, -1e+30 }
 0x170   : > { %v1583_v54 = vpop.f32.mrb[35].mxu1  ;;  %7725 = vst [vmem:[#allocation11_spill] sm:$0xff] %v6372_v50  ;;  %v6384_v62 = vsel %vm1613_vm1, %v6255_v3, -1e+30  ;;  %v6391_v2 = vsel %vm1613_vm1, %v6267_v6, -1e+30 }
 0x171   : > { %v6406_v3 = vsel %vm1613_vm1, %v4823_v16, -1e+30  ;;  %v6413_v6 = vsel %vm1613_vm1, %v6279_v11, -1e+30  ;;  %v6430_v16 = vsel %vm1613_vm1, %v6287_v18, -1e+30 }
 0x172   : > { %7727 = vst [vmem:[#allocation13_spill] sm:$0xff] %v6406_v3  ;;  %v6437_v11 = vsel %vm1613_vm1, %v6299_v23, -1e+30  ;;  %v6452_v18 = vsel %vm1613_vm1, %v1551_v30, -1e+30 }
 0x173   : > { %1762 = vmax.xlane.f32.xlu0 %v6357_v55  ;;  %1764 = vmax.xlane.f32.xlu1 %v6361_v58  ;;  %v6379_v58 = vsel %vm1613_vm1, %v6251_v63, -1e+30  ;;  %v6402_v63 = vsel %vm1613_vm1, %v6269_v7, -1e+30  ;;  %v6425_v7 = vsel %vm1613_vm1, %v6281_v12, -1e+30 }
 0x174   : > { %7726 = vst [vmem:[#allocation12_spill] sm:$0xff] %v6402_v63  ;;  %v6448_v12 = vsel %vm1613_vm1, %v6309_v28, -1e+30  ;;  %v6458_v23 = vsel %vm1613_vm1, %v4834_v35, -1e+30 }
 0x175   : > { %v4842_v0 = vpop.f32.mrb[36].mxu1  ;;  %v6468_v28 = vsel %vm1613_vm1, %v1564_v40, -1e+30  ;;  %v6472_v30 = vsel %vm1613_vm1, %v1567_v42, -1e+30 }
 0x176   : > { %v1596_v59 = vpop.f32.mrb[37].mxu1  ;;  %7728 = vst [vmem:[#allocation14_spill] sm:$0xff] %v6468_v28  ;;  %7729 = vst [vmem:[#allocation15_spill] sm:$0xff] %v6472_v30  ;;  %v6478_v35 = vsel %vm1613_vm1, %v4838_v47, -1e+30 }
 0x177   : > { %1726 = vmax.xlane.f32.xlu0 %v6368_v52  ;;  %1728 = vmax.xlane.f32.xlu1 %v6372_v50  ;;  %v4843_v1 = vpop.f32.mrb[38].mxu1  ;;  %v6395_v50 = vsel %vm1613_vm1, %v4803_v13, -1e+30  ;;  %v6418_v13 = vsel %vm1613_vm1, %v6285_v17, -1e+30  ;;  %7730 = vst [vmem:[#allocation16_spill] sm:$0xff] %v6478_v35 }
 0x178   : > { %v1599_v46 = vpop.f32.mrb[39].mxu1  ;;  %v6441_v17 = vsel %vm1613_vm1, %v4831_v29, -1e+30  ;;  %v6462_v29 = vsel %vm1613_vm1, %v4835_v41, -1e+30 }
 0x179   : > { %v6482_v41 = vsel %vm1613_vm1, %v4839_v51, -1e+30  ;;  %v6488_v40 = vsel %vm1613_vm1, %v1580_v53, -1e+30  ;;  %v6492_v42 = vsel %vm1613_vm1, %v1583_v54, -1e+30 }
 0x17a   : > { %7731 = vst [vmem:[#allocation17_spill] sm:$0xff] %v6482_v41  ;;  %7732 = vst [vmem:[#allocation18_spill] sm:$0xff] %v6488_v40  ;;  %v6498_v47 = vsel %vm1613_vm1, %v4842_v0, -1e+30  ;;  %v6502_v51 = vsel %vm1613_vm1, %v4843_v1, -1e+30 }
 0x17b   : > { %1758 = vmax.xlane.f32.xlu0 %v6379_v58  ;;  %1760 = vmax.xlane.f32.xlu1 %v6384_v62  ;;  %7733 = vst [vmem:[#allocation19_spill] sm:$0xff] %v6492_v42  ;;  %7734 = vst [vmem:[#allocation20_spill] sm:$0xff] %v6498_v47  ;;  %v6508_v53 = vsel %vm1613_vm1, %v1596_v59, -1e+30  ;;  %v6512_v54 = vsel %vm1613_vm1, %v1599_v46, -1e+30 }
 0x17c   : > { %7735 = vst [vmem:[#allocation21_spill] sm:$0xff] %v6502_v51  ;;  %7736 = vst [vmem:[#allocation22_spill] sm:$0xff] %v6508_v53 }
 0x17d   : > { %7737 = vst [vmem:[#allocation23_spill] sm:$0xff] %v6512_v54 }
 0x17f   : > { %1738 = vmax.xlane.f32.xlu0 %v6391_v2  ;;  %1740 = vmax.xlane.f32.xlu1 %v6395_v50 }
 0x183   : > { %1770 = vmax.xlane.f32.xlu0 %v6402_v63  ;;  %1772 = vmax.xlane.f32.xlu1 %v6406_v3 }
 0x187   : > { %1734 = vmax.xlane.f32.xlu0 %v6413_v6  ;;  %1736 = vmax.xlane.f32.xlu1 %v6418_v13 }
 0x18b   : > { %1766 = vmax.xlane.f32.xlu0 %v6425_v7  ;;  %1768 = vmax.xlane.f32.xlu1 %v6430_v16 }
 0x18f   : > { %1778 = vmax.xlane.f32.xlu0 %v6437_v11  ;;  %1780 = vmax.xlane.f32.xlu1 %v6441_v17 }
 0x193   : > { %1774 = vmax.xlane.f32.xlu0 %v6448_v12  ;;  %1776 = vmax.xlane.f32.xlu1 %v6452_v18 }
 0x197   : > { %1786 = vmax.xlane.f32.xlu0 %v6458_v23  ;;  %1788 = vmax.xlane.f32.xlu1 %v6462_v29 }
 0x19b   : > { %1782 = vmax.xlane.f32.xlu0 %v6468_v28  ;;  %1784 = vmax.xlane.f32.xlu1 %v6472_v30 }
 0x19f   : > { %1794 = vmax.xlane.f32.xlu0 %v6478_v35  ;;  %1796 = vmax.xlane.f32.xlu1 %v6482_v41 }
 0x1a3   : > { %1790 = vmax.xlane.f32.xlu0 %v6488_v40  ;;  %1792 = vmax.xlane.f32.xlu1 %v6492_v42 }
 0x1a7   : > { %1802 = vmax.xlane.f32.xlu0 %v6498_v47  ;;  %1804 = vmax.xlane.f32.xlu1 %v6502_v51 }
 0x1ab   : > { %1798 = vmax.xlane.f32.xlu0 %v6508_v53  ;;  %1800 = vmax.xlane.f32.xlu1 %v6512_v54 }
 0x1bc   : > { %v1699_v0 = vpop.xlane.xlu0 %1698  ;;  %v1683_v42 = vpop.xlane.xlu1 %1682 }
 0x1bd   : > { %v1816_v1 = vsub.f32 %v6159_v14, %v1699_v0  ;;  %v1808_v47 = vsub.f32 %v6163_v15, %v1683_v42 }
 0x1bf   : > { %v1880_v40 = vmul.f32 0.17677669, %v1816_v1  ;;  %v1872_v51 = vmul.f32 0.17677669, %v1808_v47 }
 0x1c0   : > { %v1679_v3 = vpop.xlane.xlu0 %1678  ;;  %v1685_v63 = vpop.xlane.xlu1 %1684 }
 0x1c1   : > { %v1938_v59 = vmul.f32 1.442695, %v1872_v51  ;;  %v1806_v41 = vsub.f32 %v6169_v20, %v1679_v3  ;;  %v1809_v9 = vsub.f32 %v6173_v21, %v1685_v63  ;;  %v1954_v46 = vmul.f32 1.442695, %v1880_v40 }
 0x1c3   : > { %v1870_v35 = vmul.f32 0.17677669, %v1806_v41  ;;  %v1873_v53 = vmul.f32 0.17677669, %v1809_v9  ;;  %5381 = vpow2.f32 %v1938_v59 }
 0x1c4   : > { %v1695_v54 = vpop.xlane.xlu0 %1694  ;;  %v1701_v30 = vpop.xlane.xlu1 %1700  ;;  %5383 = vpow2.f32 %v1954_v46 }
 0x1c5   : > { %v1940_v28 = vmul.f32 1.442695, %v1873_v53  ;;  %v1814_v14 = vsub.f32 %v6179_v24, %v1695_v54  ;;  %v1817_v15 = vsub.f32 %v6183_v25, %v1701_v30  ;;  %v1934_v42 = vmul.f32 1.442695, %v1870_v35 }
 0x1c7   : > { %v1878_v47 = vmul.f32 0.17677669, %v1814_v14  ;;  %v1881_v0 = vmul.f32 0.17677669, %v1817_v15  ;;  %5385 = vpow2.f32 %v1940_v28 }
 0x1c8   : > { %v1697_v51 = vpop.xlane.xlu1 %1696  ;;  %v1681_v20 = vpop.xlane.xlu0 %1680  ;;  %5387 = vpow2.f32 %v1934_v42 }
 0x1c9   : > { %v1956_v3 = vmul.f32 1.442695, %v1881_v0  ;;  %v1815_v21 = vsub.f32 %v6189_v32, %v1697_v51  ;;  %v1807_v63 = vsub.f32 %v6193_v33, %v1681_v20  ;;  %v1950_v41 = vmul.f32 1.442695, %v1878_v47  ;;  %v5325_v32 = vld [vmem:[%s6126_s23] sm:$0xff]  }
 0x1ca   : > { %4844 = vmatprep.subr.bf16.mxu0 %v5325_v32 }
 0x1cb   : > { %v1871_v40 = vmul.f32 0.17677669, %v1807_v63  ;;  %5389 = vpow2.f32 %v1956_v3  ;;  %v1879_v24 = vmul.f32 0.17677669, %v1815_v21  ;;  %4845 = vmatpush3.bf16.msra.mxu0 %v5325_v32 }
 0x1cc   : > { %v1691_v53 = vpop.xlane.xlu0 %1690  ;;  %v1693_v25 = vpop.xlane.xlu1 %1692  ;;  %5391 = vpow2.f32 %v1950_v41 }
 0x1cd   : > { %v1936_v30 = vmul.f32 1.442695, %v1871_v40  ;;  %v1812_v35 = vsub.f32 %v6199_v36, %v1691_v53  ;;  %v1813_v28 = vsub.f32 %v6203_v37, %v1693_v25  ;;  %v6526_v54 = vpop.eup %5381  ;;  %v1952_v33 = vmul.f32 1.442695, %v1879_v24 }
 0x1ce   : > { %2066 = vadd.xlane.f32.xlu0 %v6526_v54  ;;  %v6530_v14 = vpop.eup %5383 }
 0x1cf   : > { %v1876_v1 = vmul.f32 0.17677669, %v1812_v35  ;;  %5393 = vpow2.f32 %v1936_v30  ;;  %v1877_v59 = vmul.f32 0.17677669, %v1813_v28 }
 0x1d0   : > { %v1707_v9 = vpop.xlane.xlu0 %1706  ;;  %v1709_v46 = vpop.xlane.xlu1 %1708 }
 0x1d1   : > { %v1946_v15 = vmul.f32 1.442695, %v1876_v1  ;;  %v1820_v42 = vsub.f32 %v6209_v44, %v1707_v9  ;;  %v1821_v36 = vsub.f32 %v6213_v45, %v1709_v46  ;;  %v6534_v37 = vpop.eup %5385  ;;  %v1948_v0 = vmul.f32 1.442695, %v1877_v59 }
 0x1d2   : > { %2082 = vadd.xlane.f32.xlu0 %v6530_v14  ;;  %2068 = vadd.xlane.f32.xlu1 %v6534_v37  ;;  %v6538_v21 = vpop.eup %5387 }
 0x1d3   : > { %5395 = vpow2.f32 %v1946_v15  ;;  %v1884_v47 = vmul.f32 0.17677669, %v1820_v42  ;;  %v1885_v51 = vmul.f32 0.17677669, %v1821_v36 }
 0x1d4   : > { %5397 = vpow2.f32 %v1952_v33  ;;  %v1687_v20 = vpop.xlane.xlu0 %1686  ;;  %v1689_v3 = vpop.xlane.xlu1 %1688  ;;  %v5326_v33 = vld [vmem:[%s6126_s23 + $0x8] sm:$0xff]  }
 0x1d5   : > { %v1962_v44 = vmul.f32 1.442695, %v1884_v47  ;;  %v1810_v45 = vsub.f32 %v6219_v48, %v1687_v20  ;;  %v1811_v63 = vsub.f32 %v6223_v49, %v1689_v3  ;;  %v6542_v41 = vpop.eup %5389  ;;  %v1964_v24 = vmul.f32 1.442695, %v1885_v51  ;;  %4846 = vmatprep.subr.bf16.mxu0 %v5326_v33 }
 0x1d6   : > { %2062 = vadd.xlane.f32.xlu0 %v6538_v21  ;;  %2084 = vadd.xlane.f32.xlu1 %v6542_v41  ;;  %v6546_v35 = vpop.eup %5391 }
 0x1d7   : > { %5399 = vpow2.f32 %v1962_v44  ;;  %v1874_v40 = vmul.f32 0.17677669, %v1810_v45  ;;  %v1875_v53 = vmul.f32 0.17677669, %v1811_v63  ;;  %4847 = vmatpush3.bf16.msra.mxu0 %v5326_v33  ;;  %v5327_v45 = vld [vmem:[%s6126_s23 + $0x10] sm:$0xff]  }
 0x1d8   : > { %5401 = vpow2.f32 %v1948_v0  ;;  %v1703_v25 = vpop.xlane.xlu0 %1702  ;;  %v1705_v30 = vpop.xlane.xlu1 %1704  ;;  %4848 = vmatprep.subr.bf16.mxu0 %v5327_v45 }
 0x1d9   : > { %v1942_v28 = vmul.f32 1.442695, %v1874_v40  ;;  %v1818_v48 = vsub.f32 %v6231_v56, %v1703_v25  ;;  %v1819_v49 = vsub.f32 %v6235_v57, %v1705_v30  ;;  %v6550_v1 = vpop.eup %5393  ;;  %v1944_v59 = vmul.f32 1.442695, %v1875_v53 }
 0x1da   : > { %2078 = vadd.xlane.f32.xlu0 %v6546_v35  ;;  %2064 = vadd.xlane.f32.xlu1 %v6550_v1 }
 0x1db   : > { %5403 = vpow2.f32 %v1942_v28  ;;  %v1882_v32 = vmul.f32 0.17677669, %v1818_v48  ;;  %v1883_v9 = vmul.f32 0.17677669, %v1819_v49  ;;  %4849 = vmatpush3.bf16.msra.mxu0 %v5327_v45  ;;  %v5328_v49 = vld [vmem:[%s6126_s23 + $0x18] sm:$0xff]  }
 0x1dc   : > { %5405 = vpow2.f32 %v1964_v24  ;;  %v1715_v46 = vpop.xlane.xlu0 %1714  ;;  %v1717_v15 = vpop.xlane.xlu1 %1716  ;;  %4850 = vmatprep.subr.bf16.mxu0 %v5328_v49 }
 0x1dd   : > { %v6555_v42 = vpop.eup %5395  ;;  %v1958_v56 = vmul.f32 1.442695, %v1882_v32  ;;  %v1824_v57 = vsub.f32 %v6243_v60, %v1715_v46  ;;  %v1825_v36 = vsub.f32 %v6247_v61, %v1717_v15  ;;  %v1960_v51 = vmul.f32 1.442695, %v1883_v9 }
 0x1de   : > { %v6559_v47 = vpop.eup %5397  ;;  %2074 = vadd.xlane.f32.xlu0 %v6555_v42 }
 0x1df   : > { %5407 = vpow2.f32 %v1958_v56  ;;  %v1888_v0 = vmul.f32 0.17677669, %v1824_v57  ;;  %2080 = vadd.xlane.f32.xlu1 %v6559_v47  ;;  %v1889_v20 = vmul.f32 0.17677669, %v1825_v36  ;;  %4851 = vmatpush3.bf16.msra.mxu0 %v5328_v49  ;;  %v5329_v36 = vld [vmem:[%s6126_s23 + $0x20] sm:$0xff]  }
 0x1e0   : > { %5409 = vpow2.f32 %v1944_v59  ;;  %v1747_v3 = vpop.xlane.xlu0 %1746  ;;  %v1749_v44 = vpop.xlane.xlu1 %1748  ;;  %4852 = vmatprep.subr.bf16.mxu0 %v5329_v36 }
 0x1e1   : > { %v6564_v63 = vpop.eup %5399  ;;  %v1970_v60 = vmul.f32 1.442695, %v1888_v0  ;;  %v1840_v61 = vsub.f32 %v6259_v4, %v1747_v3  ;;  %v1841_v40 = vsub.f32 %v6263_v5, %v1749_v44  ;;  %v1972_v25 = vmul.f32 1.442695, %v1889_v20 }
 0x1e2   : > { %v6568_v24 = vpop.eup %5401  ;;  %2090 = vadd.xlane.f32.xlu0 %v6564_v63 }
 0x1e3   : > { %5411 = vpow2.f32 %v1970_v60  ;;  %v1904_v53 = vmul.f32 0.17677669, %v1840_v61  ;;  %2076 = vadd.xlane.f32.xlu1 %v6568_v24  ;;  %v1905_v30 = vmul.f32 0.17677669, %v1841_v40  ;;  %4853 = vmatpush3.bf16.msra.mxu0 %v5329_v36  ;;  %v5330_v40 = vld [vmem:[%s6126_s23 + $0x28] sm:$0xff]  }
 0x1e4   : > { %5413 = vpow2.f32 %v1960_v51  ;;  %v1711_v28 = vpop.xlane.xlu0 %1710  ;;  %v1713_v48 = vpop.xlane.xlu1 %1712  ;;  %4854 = vmatprep.subr.bf16.mxu0 %v5330_v40 }
 0x1e5   : > { %v6573_v32 = vpop.eup %5403  ;;  %v2002_v4 = vmul.f32 1.442695, %v1904_v53  ;;  %v1822_v5 = vsub.f32 %v6273_v8, %v1711_v28  ;;  %v1823_v33 = vsub.f32 %v6277_v10, %v1713_v48  ;;  %v2004_v46 = vmul.f32 1.442695, %v1905_v30 }
 0x1e6   : > { %v6577_v59 = vpop.eup %5405  ;;  %2070 = vadd.xlane.f32.xlu0 %v6573_v32 }
 0x1e7   : > { %5415 = vpow2.f32 %v2002_v4  ;;  %v1886_v9 = vmul.f32 0.17677669, %v1822_v5  ;;  %2092 = vadd.xlane.f32.xlu1 %v6577_v59  ;;  %v1887_v15 = vmul.f32 0.17677669, %v1823_v33  ;;  %4855 = vmatpush3.bf16.msra.mxu0 %v5330_v40  ;;  %v5331_v33 = vld [vmem:[%s6126_s23 + $0x30] sm:$0xff]  }
 0x1e8   : > { %5417 = vpow2.f32 %v1972_v25  ;;  %v1743_v56 = vpop.xlane.xlu0 %1742  ;;  %v1745_v57 = vpop.xlane.xlu1 %1744  ;;  %4856 = vmatprep.subr.bf16.mxu0 %v5331_v33 }
 0x1e9   : > { %v6582_v0 = vpop.eup %5407  ;;  %v1966_v8 = vmul.f32 1.442695, %v1886_v9  ;;  %v1838_v10 = vsub.f32 %v6291_v19, %v1743_v56  ;;  %v1839_v51 = vsub.f32 %v6295_v22, %v1745_v57  ;;  %v1968_v44 = vmul.f32 1.442695, %v1887_v15 }
 0x1ea   : > { %v6586_v20 = vpop.eup %5409  ;;  %2086 = vadd.xlane.f32.xlu0 %v6582_v0 }
 0x1eb   : > { %5419 = vpow2.f32 %v1966_v8  ;;  %v1902_v3 = vmul.f32 0.17677669, %v1838_v10  ;;  %2072 = vadd.xlane.f32.xlu1 %v6586_v20  ;;  %v1903_v45 = vmul.f32 0.17677669, %v1839_v51  ;;  %4857 = vmatpush3.bf16.msra.mxu0 %v5331_v33  ;;  %v5332_v51 = vld [vmem:[%s6126_s23 + $0x38] sm:$0xff]  }
 0x1ec   : > { %5421 = vpow2.f32 %v2004_v46  ;;  %v1723_v60 = vpop.xlane.xlu0 %1722  ;;  %v1725_v61 = vpop.xlane.xlu1 %1724  ;;  %4858 = vmatprep.subr.bf16.mxu0 %v5332_v51 }
 0x1ed   : > { %v6591_v53 = vpop.eup %5411  ;;  %v1998_v19 = vmul.f32 1.442695, %v1902_v3  ;;  %v1828_v22 = vsub.f32 %v6303_v26, %v1723_v60  ;;  %v1829_v25 = vsub.f32 %v6307_v27, %v1725_v61  ;;  %v2000_v48 = vmul.f32 1.442695, %v1903_v45 }
 0x1ee   : > { %v6595_v30 = vpop.eup %5413  ;;  %2098 = vadd.xlane.f32.xlu0 %v6591_v53 }
 0x1ef   : > { %5423 = vpow2.f32 %v1998_v19  ;;  %v1892_v28 = vmul.f32 0.17677669, %v1828_v22  ;;  %2088 = vadd.xlane.f32.xlu1 %v6595_v30  ;;  %v1893_v49 = vmul.f32 0.17677669, %v1829_v25  ;;  %4859 = vmatpush3.bf16.msra.mxu0 %v5332_v51  ;;  %v5333_v25 = vld [vmem:[%s6126_s23 + $0x40] sm:$0xff]  }
 0x1f0   : > { %5425 = vpow2.f32 %v1968_v44  ;;  %v1755_v4 = vpop.xlane.xlu0 %1754  ;;  %v1757_v5 = vpop.xlane.xlu1 %1756  ;;  %4876 = vmatprep.subr.bf16.mxu1 %v5333_v25 }
 0x1f1   : > { %v6600_v9 = vpop.eup %5415  ;;  %v1978_v26 = vmul.f32 1.442695, %v1892_v28  ;;  %v1844_v27 = vsub.f32 %v6315_v31, %v1755_v4  ;;  %v1845_v46 = vsub.f32 %v6319_v34, %v1757_v5  ;;  %v1980_v57 = vmul.f32 1.442695, %v1893_v49  ;;  %4877 = vmatpush3.bf16.msra.mxu1 %v5333_v25 }
 0x1f2   : > { %v6604_v15 = vpop.eup %5417  ;;  %2130 = vadd.xlane.f32.xlu0 %v6600_v9 }
 0x1f3   : > { %5427 = vpow2.f32 %v1978_v26  ;;  %v1908_v56 = vmul.f32 0.17677669, %v1844_v27  ;;  %2100 = vadd.xlane.f32.xlu1 %v6604_v15  ;;  %v1909_v36 = vmul.f32 0.17677669, %v1845_v46 }
 0x1f4   : > { %5429 = vpow2.f32 %v2000_v48  ;;  %v1719_v8 = vpop.xlane.xlu0 %1718  ;;  %v1721_v10 = vpop.xlane.xlu1 %1720  ;;  %v7738_v48 = vld [vmem:[#allocation7_spill] sm:$0xff] }
 0x1f5   : > { %v6609_v3 = vpop.eup %5419  ;;  %v2010_v31 = vmul.f32 1.442695, %v1908_v56  ;;  %v1826_v34 = vsub.f32 %v6325_v38, %v1719_v8  ;;  %v1827_v44 = vsub.f32 %v6329_v39, %v1721_v10  ;;  %v2012_v61 = vmul.f32 1.442695, %v1909_v36  ;;  %v5334_v56 = vld [vmem:[%s6126_s23 + $0x48] sm:$0xff]   ;;  %v7740_v10 = vld [vmem:[#allocation9_spill] sm:$0xff] }
 0x1f6   : > { %v6613_v45 = vpop.eup %5421  ;;  %2094 = vadd.xlane.f32.xlu0 %v6609_v3  ;;  %v7739_v36 = vld [vmem:[#allocation8_spill] sm:$0xff]  ;;  %4878 = vmatprep.subr.bf16.mxu1 %v5334_v56 }
 0x1f7   : > { %5431 = vpow2.f32 %v2010_v31  ;;  %v1890_v60 = vmul.f32 0.17677669, %v1826_v34  ;;  %2132 = vadd.xlane.f32.xlu1 %v6613_v45  ;;  %v1891_v40 = vmul.f32 0.17677669, %v1827_v44  ;;  %4879 = vmatpush3.bf16.msra.mxu1 %v5334_v56 }
 0x1f8   : > { %5433 = vpow2.f32 %v1980_v57  ;;  %v1751_v19 = vpop.xlane.xlu0 %1750  ;;  %v1753_v22 = vpop.xlane.xlu1 %1752 }
 0x1f9   : > { %v6618_v28 = vpop.eup %5423  ;;  %v1974_v38 = vmul.f32 1.442695, %v1890_v60  ;;  %v1842_v39 = vsub.f32 %v6336_v43, %v1751_v19  ;;  %v1843_v49 = vsub.f32 %v7738_v48, %v1753_v22  ;;  %v1976_v33 = vmul.f32 1.442695, %v1891_v40  ;;  %v5335_v19 = vld [vmem:[%s6126_s23 + $0x50] sm:$0xff]   ;;  %v6637_v22 = vld [vmem:[%s6126_s23 + $0x80] sm:$0xff]  }
 0x1fa   : > { %v6622_v4 = vpop.eup %5425  ;;  %2126 = vadd.xlane.f32.xlu0 %v6618_v28  ;;  %v7741_v48 = vld [vmem:[#allocation10_spill] sm:$0xff]  ;;  %4880 = vmatprep.subr.bf16.mxu1 %v5335_v19 }
 0x1fb   : > { %5435 = vpow2.f32 %v1974_v38  ;;  %v1906_v5 = vmul.f32 0.17677669, %v1842_v39  ;;  %2096 = vadd.xlane.f32.xlu1 %v6622_v4  ;;  %v1907_v26 = vmul.f32 0.17677669, %v1843_v49  ;;  %4908 = vmatprep.subr.bf16.mxu0 %v6637_v22 }
 0x1fc   : > { %5437 = vpow2.f32 %v2012_v61  ;;  %v1731_v27 = vpop.xlane.xlu0 %1730  ;;  %v1733_v46 = vpop.xlane.xlu1 %1732  ;;  %4881 = vmatpush3.bf16.msra.mxu1 %v5335_v19 }
 0x1fd   : > { %v6627_v57 = vpop.eup %5427  ;;  %v2006_v43 = vmul.f32 1.442695, %v1906_v5  ;;  %v1832_v8 = vsub.f32 %v7739_v36, %v1731_v27  ;;  %v1833_v51 = vsub.f32 %v7740_v10, %v1733_v46  ;;  %v2008_v44 = vmul.f32 1.442695, %v1907_v26  ;;  %v7742_v10 = vld [vmem:[#allocation11_spill] sm:$0xff] }
 0x1fe   : > { %v6631_v31 = vpop.eup %5429  ;;  %2106 = vadd.xlane.f32.xlu0 %v6627_v57 }
 0x1ff   : > { %5439 = vpow2.f32 %v2006_v43  ;;  %v1896_v34 = vmul.f32 0.17677669, %v1832_v8  ;;  %2128 = vadd.xlane.f32.xlu1 %v6631_v31  ;;  %v1897_v60 = vmul.f32 0.17677669, %v1833_v51 }
 0x200   : > { %5441 = vpow2.f32 %v1976_v33  ;;  %v1763_v61 = vpop.xlane.xlu0 %1762  ;;  %v1765_v40 = vpop.xlane.xlu1 %1764 }
 0x201   : > { %v6639_v25 = vpop.eup %5431  ;;  %v1986_v38 = vmul.f32 1.442695, %v1896_v34  ;;  %v1848_v39 = vsub.f32 %v6357_v55, %v1763_v61  ;;  %v1849_v49 = vsub.f32 %v7741_v48, %v1765_v40  ;;  %v1988_v26 = vmul.f32 1.442695, %v1897_v60  ;;  %v5337_v55 = vld [vmem:[%s6126_s23 + $0x58] sm:$0xff]  }
 0x202   : > { %v6643_v5 = vpop.eup %5433  ;;  %2138 = vadd.xlane.f32.xlu0 %v6639_v25  ;;  %4882 = vmatprep.subr.bf16.mxu1 %v5337_v55 }
 0x203   : > { %5443 = vpow2.f32 %v1986_v38  ;;  %v1912_v33 = vmul.f32 0.17677669, %v1848_v39  ;;  %2108 = vadd.xlane.f32.xlu1 %v6643_v5  ;;  %v1913_v27 = vmul.f32 0.17677669, %v1849_v49  ;;  %4883 = vmatpush3.bf16.msra.mxu1 %v5337_v55  ;;  %v5339_v38 = vld [vmem:[%s6126_s23 + $0x60] sm:$0xff]  }
 0x204   : > { %5445 = vpow2.f32 %v2008_v44  ;;  %v1727_v46 = vpop.xlane.xlu0 %1726  ;;  %v1729_v56 = vpop.xlane.xlu1 %1728  ;;  %4884 = vmatprep.subr.bf16.mxu1 %v5339_v38 }
 0x205   : > { %v6649_v43 = vpop.eup %5435  ;;  %v2018_v36 = vmul.f32 1.442695, %v1912_v33  ;;  %v1830_v8 = vsub.f32 %v6368_v52, %v1727_v46  ;;  %v1831_v51 = vsub.f32 %v7742_v10, %v1729_v56  ;;  %v2020_v44 = vmul.f32 1.442695, %v1913_v27 }
 0x206   : > { %v6653_v34 = vpop.eup %5437  ;;  %2102 = vadd.xlane.f32.xlu0 %v6649_v43 }
 0x207   : > { %5447 = vpow2.f32 %v2018_v36  ;;  %v1894_v61 = vmul.f32 0.17677669, %v1830_v8  ;;  %2140 = vadd.xlane.f32.xlu1 %v6653_v34  ;;  %v1895_v60 = vmul.f32 0.17677669, %v1831_v51  ;;  %4885 = vmatpush3.bf16.msra.mxu1 %v5339_v38  ;;  %v5341_v36 = vld [vmem:[%s6126_s23 + $0x68] sm:$0xff]  }
 0x208   : > { %5449 = vpow2.f32 %v1988_v26  ;;  %v1759_v40 = vpop.xlane.xlu0 %1758  ;;  %v1761_v19 = vpop.xlane.xlu1 %1760  ;;  %4886 = vmatprep.subr.bf16.mxu1 %v5341_v36 }
 0x209   : > { %v6658_v39 = vpop.eup %5439  ;;  %v1982_v52 = vmul.f32 1.442695, %v1894_v61  ;;  %v1846_v48 = vsub.f32 %v6379_v58, %v1759_v40  ;;  %v1847_v49 = vsub.f32 %v6384_v62, %v1761_v19  ;;  %v1984_v26 = vmul.f32 1.442695, %v1895_v60 }
 0x20a   : > { %v6662_v33 = vpop.eup %5441  ;;  %2134 = vadd.xlane.f32.xlu0 %v6658_v39 }
 0x20b   : > { %5451 = vpow2.f32 %v1982_v52  ;;  %v1910_v46 = vmul.f32 0.17677669, %v1846_v48  ;;  %2104 = vadd.xlane.f32.xlu1 %v6662_v33  ;;  %v1911_v27 = vmul.f32 0.17677669, %v1847_v49  ;;  %4887 = vmatpush3.bf16.msra.mxu1 %v5341_v36 }
 0x20c   : > { %5453 = vpow2.f32 %v2020_v44  ;;  %v1739_v56 = vpop.xlane.xlu0 %1738  ;;  %v1741_v55 = vpop.xlane.xlu1 %1740 }
 0x20d   : > { %v6667_v8 = vpop.eup %5443  ;;  %v2014_v58 = vmul.f32 1.442695, %v1910_v46  ;;  %v1836_v62 = vsub.f32 %v6391_v2, %v1739_v56  ;;  %v1837_v10 = vsub.f32 %v6395_v50, %v1741_v55  ;;  %v2016_v44 = vmul.f32 1.442695, %v1911_v27  ;;  %v5343_v2 = vld [vmem:[%s6126_s23 + $0x70] sm:$0xff]  }
 0x20e   : > { %v6671_v51 = vpop.eup %5445  ;;  %2114 = vadd.xlane.f32.xlu0 %v6667_v8  ;;  %4888 = vmatprep.subr.bf16.mxu1 %v5343_v2 }
 0x20f   : > { %5455 = vpow2.f32 %v2014_v58  ;;  %v1900_v61 = vmul.f32 0.17677669, %v1836_v62  ;;  %2136 = vadd.xlane.f32.xlu1 %v6671_v51  ;;  %v1901_v60 = vmul.f32 0.17677669, %v1837_v10  ;;  %4889 = vmatpush3.bf16.msra.mxu1 %v5343_v2 }
 0x210   : > { %5457 = vpow2.f32 %v1984_v26  ;;  %v6675_v40 = vpop.xlane.xlu0 %1770  ;;  %v6677_v19 = vpop.xlane.xlu1 %1772  ;;  %v5345_v26 = vld [vmem:[%s6126_s23 + $0x78] sm:$0xff]  }
 0x211   : > { %v6680_v50 = vpop.eup %5447  ;;  %v1994_v38 = vmul.f32 1.442695, %v1900_v61  ;;  %v1996_v48 = vmul.f32 1.442695, %v1901_v60  ;;  %4890 = vmatprep.subr.bf16.mxu1 %v5345_v26 }
 0x212   : > { %v6682_v52 = vpop.eup %5449  ;;  %2146 = vadd.xlane.f32.xlu0 %v6680_v50 }
 0x213   : > { %5459 = vpow2.f32 %v1994_v38  ;;  %2116 = vadd.xlane.f32.xlu1 %v6682_v52  ;;  %4891 = vmatpush3.bf16.msra.mxu1 %v5345_v26 }
 0x214   : > { %5461 = vpow2.f32 %v2016_v44  ;;  %v1735_v49 = vpop.xlane.xlu0 %1734  ;;  %v1737_v46 = vpop.xlane.xlu1 %1736 }
 0x215   : > { %v6687_v27 = vpop.eup %5451  ;;  %v1834_v56 = vsub.f32 %v6413_v6, %v1735_v49  ;;  %v1835_v55 = vsub.f32 %v6418_v13, %v1737_v46  ;;  %5463 = vpow2.f32 %v1996_v48 }
 0x216   : > { %v6691_v36 = vpop.eup %5453  ;;  %2110 = vadd.xlane.f32.xlu0 %v6687_v27 }
 0x217   : > { %v1898_v58 = vmul.f32 0.17677669, %v1834_v56  ;;  %v1899_v62 = vmul.f32 0.17677669, %v1835_v55  ;;  %2148 = vadd.xlane.f32.xlu1 %v6691_v36 }
 0x218   : > { %v1767_v10 = vpop.xlane.xlu0 %1766  ;;  %v1769_v61 = vpop.xlane.xlu1 %1768 }
 0x219   : > { %v6695_v44 = vpop.eup %5455  ;;  %v1990_v60 = vmul.f32 1.442695, %v1898_v58  ;;  %v1992_v2 = vmul.f32 1.442695, %v1899_v62  ;;  %v1850_v6 = vsub.f32 %v6425_v7, %v1767_v10  ;;  %v1851_v13 = vsub.f32 %v6430_v16, %v1769_v61 }
 0x21a   : > { %v6699_v38 = vpop.eup %5457  ;;  %2142 = vadd.xlane.f32.xlu0 %v6695_v44 }
 0x21b   : > { %5465 = vpow2.f32 %v1990_v60  ;;  %v1914_v49 = vmul.f32 0.17677669, %v1850_v6  ;;  %v1915_v46 = vmul.f32 0.17677669, %v1851_v13  ;;  %2112 = vadd.xlane.f32.xlu1 %v6699_v38 }
 0x21c   : > { %5467 = vpow2.f32 %v1992_v2  ;;  %v1779_v48 = vpop.xlane.xlu0 %1778  ;;  %v1781_v26 = vpop.xlane.xlu1 %1780 }
 0x21d   : > { %v6703_v56 = vpop.eup %5459  ;;  %v2022_v55 = vmul.f32 1.442695, %v1914_v49  ;;  %v2024_v58 = vmul.f32 1.442695, %v1915_v46  ;;  %v1856_v7 = vsub.f32 %v6437_v11, %v1779_v48  ;;  %v1857_v16 = vsub.f32 %v6441_v17, %v1781_v26 }
 0x21e   : > { %7743 = vst [vmem:[#allocation7_spill] sm:$0xff] %v6703_v56  ;;  %v6707_v62 = vpop.eup %5461  ;;  %2122 = vadd.xlane.f32.xlu0 %v6703_v56 }
 0x21f   : > { %5469 = vpow2.f32 %v2022_v55  ;;  %v1920_v10 = vmul.f32 0.17677669, %v1856_v7  ;;  %v1921_v61 = vmul.f32 0.17677669, %v1857_v16  ;;  %2144 = vadd.xlane.f32.xlu1 %v6707_v62  ;;  %v6713_v46 = vpop.eup %5463 }
 0x220   : > { %5471 = vpow2.f32 %v2024_v58  ;;  %v1775_v60 = vpop.xlane.xlu0 %1774  ;;  %v1777_v2 = vpop.xlane.xlu1 %1776  ;;  %7744 = vst [vmem:[#allocation8_spill] sm:$0xff] %v6713_v46 }
 0x221   : > { %v2034_v6 = vmul.f32 1.442695, %v1920_v10  ;;  %v2036_v13 = vmul.f32 1.442695, %v1921_v61  ;;  %v1854_v49 = vsub.f32 %v6448_v12, %v1775_v60  ;;  %v1855_v11 = vsub.f32 %v6452_v18, %v1777_v2 }
 0x223   : > { %5473 = vpow2.f32 %v2034_v6  ;;  %v1918_v17 = vmul.f32 0.17677669, %v1854_v49  ;;  %v1919_v48 = vmul.f32 0.17677669, %v1855_v11  ;;  %2124 = vadd.xlane.f32.xlu1 %v6713_v46 }
 0x224   : > { %5475 = vpow2.f32 %v2036_v13  ;;  %v1787_v26 = vpop.xlane.xlu0 %1786  ;;  %v1789_v55 = vpop.xlane.xlu1 %1788 }
 0x225   : > { %v6716_v7 = vpop.eup %5465  ;;  %v2030_v58 = vmul.f32 1.442695, %v1918_v17  ;;  %v2032_v16 = vmul.f32 1.442695, %v1919_v48  ;;  %v1860_v10 = vsub.f32 %v6458_v23, %v1787_v26  ;;  %v1861_v12 = vsub.f32 %v6462_v29, %v1789_v55  ;;  %v7748_v17 = vld [vmem:[#allocation14_spill] sm:$0xff]  ;;  %v7749_v48 = vld [vmem:[#allocation15_spill] sm:$0xff] }
 0x226   : > { %7745 = vst [vmem:[#allocation9_spill] sm:$0xff] %v6716_v7  ;;  %v6720_v61 = vpop.eup %5467  ;;  %2118 = vadd.xlane.f32.xlu0 %v6716_v7 }
 0x227   : > { %7746 = vst [vmem:[#allocation10_spill] sm:$0xff] %v6720_v61  ;;  %5477 = vpow2.f32 %v2030_v58  ;;  %v1924_v18 = vmul.f32 0.17677669, %v1860_v10  ;;  %v1925_v60 = vmul.f32 0.17677669, %v1861_v12  ;;  %2120 = vadd.xlane.f32.xlu1 %v6720_v61 }
 0x228   : > { %5479 = vpow2.f32 %v2032_v16  ;;  %v1783_v2 = vpop.xlane.xlu0 %1782  ;;  %v1785_v6 = vpop.xlane.xlu1 %1784 }
 0x229   : > { %v6724_v13 = vpop.eup %5469  ;;  %v2042_v49 = vmul.f32 1.442695, %v1924_v18  ;;  %v2044_v11 = vmul.f32 1.442695, %v1925_v60  ;;  %v1858_v23 = vsub.f32 %v7748_v17, %v1783_v2  ;;  %v1859_v29 = vsub.f32 %v7749_v48, %v1785_v6  ;;  %v7752_v2 = vld [vmem:[#allocation16_spill] sm:$0xff]  ;;  %v7753_v6 = vld [vmem:[#allocation17_spill] sm:$0xff] }
 0x22a   : > { %7747 = vst [vmem:[#allocation11_spill] sm:$0xff] %v6724_v13  ;;  %v6728_v26 = vpop.eup %5471  ;;  %2150 = vadd.xlane.f32.xlu0 %v6724_v13  ;;  %v7758_v13 = vld [vmem:[#allocation18_spill] sm:$0xff] }
 0x22b   : > { %7750 = vst [vmem:[#allocation14_spill] sm:$0xff] %v6728_v26  ;;  %5481 = vpow2.f32 %v2042_v49  ;;  %v1922_v55 = vmul.f32 0.17677669, %v1858_v23  ;;  %v1923_v58 = vmul.f32 0.17677669, %v1859_v29  ;;  %2152 = vadd.xlane.f32.xlu1 %v6728_v26  ;;  %v6740_v49 = vld [vmem:[%s6126_s23 + $0xc0] sm:$0xff]  }
 0x22c   : > { %5483 = vpow2.f32 %v2044_v11  ;;  %v1795_v16 = vpop.xlane.xlu0 %1794  ;;  %v1797_v10 = vpop.xlane.xlu1 %1796  ;;  %v7755_v23 = vld [vmem:[#allocation12_spill] sm:$0xff]  ;;  %4940 = vmatprep.subr.bf16.mxu1 %v6740_v49 }
 0x22d   : > { %v6732_v12 = vpop.eup %5473  ;;  %v2038_v18 = vmul.f32 1.442695, %v1922_v55  ;;  %v2040_v60 = vmul.f32 1.442695, %v1923_v58  ;;  %v1864_v17 = vsub.f32 %v7752_v2, %v1795_v16  ;;  %v1865_v48 = vsub.f32 %v7753_v6, %v1797_v10  ;;  %v7756_v55 = vld [vmem:[#allocation13_spill] sm:$0xff] }
 0x22e   : > { %7751 = vst [vmem:[#allocation15_spill] sm:$0xff] %v6732_v12  ;;  %v6736_v56 = vpop.eup %5475  ;;  %2162 = vadd.xlane.f32.xlu0 %v6732_v12  ;;  %v1852_v29 = vsub.f32 %v7755_v23, %v6675_v40  ;;  %v1853_v58 = vsub.f32 %v7756_v55, %v6677_v19  ;;  %v7759_v40 = vld [vmem:[#allocation19_spill] sm:$0xff] }
 0x22f   : > { %7754 = vst [vmem:[#allocation16_spill] sm:$0xff] %v6736_v56  ;;  %5485 = vpow2.f32 %v2038_v18  ;;  %v1928_v11 = vmul.f32 0.17677669, %v1864_v17  ;;  %v1929_v26 = vmul.f32 0.17677669, %v1865_v48  ;;  %2164 = vadd.xlane.f32.xlu1 %v6736_v56 }
 0x230   : > { %5487 = vpow2.f32 %v2040_v60  ;;  %v1791_v16 = vpop.xlane.xlu0 %1790  ;;  %v1793_v10 = vpop.xlane.xlu1 %1792  ;;  %v1916_v48 = vmul.f32 0.17677669, %v1852_v29  ;;  %v1917_v23 = vmul.f32 0.17677669, %v1853_v58  ;;  %v7763_v29 = vld [vmem:[#allocation20_spill] sm:$0xff]  ;;  %v7764_v58 = vld [vmem:[#allocation21_spill] sm:$0xff] }
 0x231   : > { %v6748_v2 = vpop.eup %5477  ;;  %v2050_v6 = vmul.f32 1.442695, %v1928_v11  ;;  %v2052_v12 = vmul.f32 1.442695, %v1929_v26  ;;  %v1862_v61 = vsub.f32 %v7758_v13, %v1791_v16  ;;  %v1863_v18 = vsub.f32 %v7759_v40, %v1793_v10 }
 0x232   : > { %7757 = vst [vmem:[#allocation17_spill] sm:$0xff] %v6748_v2  ;;  %v6752_v17 = vpop.eup %5479  ;;  %2158 = vadd.xlane.f32.xlu0 %v6748_v2  ;;  %v2026_v10 = vmul.f32 1.442695, %v1916_v48  ;;  %v7767_v2 = vld [vmem:[#allocation23_spill] sm:$0xff] }
 0x233   : > { %7760 = vst [vmem:[#allocation12_spill] sm:$0xff] %v6752_v17  ;;  %5489 = vpow2.f32 %v2050_v6  ;;  %v1926_v19 = vmul.f32 0.17677669, %v1862_v61  ;;  %v1927_v60 = vmul.f32 0.17677669, %v1863_v18  ;;  %2160 = vadd.xlane.f32.xlu1 %v6752_v17 }
 0x234   : > { %5491 = vpow2.f32 %v2052_v12  ;;  %v1803_v55 = vpop.xlane.xlu0 %1802  ;;  %v1805_v56 = vpop.xlane.xlu1 %1804  ;;  %v2028_v61 = vmul.f32 1.442695, %v1917_v23 }
 0x235   : > { %v6756_v11 = vpop.eup %5481  ;;  %v2046_v26 = vmul.f32 1.442695, %v1926_v19  ;;  %v2048_v13 = vmul.f32 1.442695, %v1927_v60  ;;  %v1868_v6 = vsub.f32 %v7763_v29, %v1803_v55  ;;  %v1869_v12 = vsub.f32 %v7764_v58, %v1805_v56  ;;  %v7766_v19 = vld [vmem:[#allocation22_spill] sm:$0xff] }
 0x236   : > { %7761 = vst [vmem:[#allocation13_spill] sm:$0xff] %v6756_v11  ;;  %v6758_v16 = vpop.eup %5483  ;;  %2170 = vadd.xlane.f32.xlu0 %v6756_v11 }
 0x237   : > { %7762 = vst [vmem:[#allocation18_spill] sm:$0xff] %v6758_v16  ;;  %5493 = vpow2.f32 %v2046_v26  ;;  %2172 = vadd.xlane.f32.xlu1 %v6758_v16  ;;  %v1932_v48 = vmul.f32 0.17677669, %v1868_v6  ;;  %v1933_v56 = vmul.f32 0.17677669, %v1869_v12 }
 0x238   : > { %5495 = vpow2.f32 %v2048_v13  ;;  %v1799_v40 = vpop.xlane.xlu0 %1798  ;;  %v1801_v18 = vpop.xlane.xlu1 %1800 }
 0x239   : > { %v6764_v17 = vpop.eup %5485  ;;  %v1866_v60 = vsub.f32 %v7766_v19, %v1799_v40  ;;  %v1867_v46 = vsub.f32 %v7767_v2, %v1801_v18  ;;  %5497 = vpow2.f32 %v2026_v10  ;;  %v2058_v2 = vmul.f32 1.442695, %v1932_v48 }
 0x23a   : > { %7765 = vst [vmem:[#allocation19_spill] sm:$0xff] %v6764_v17  ;;  %v6768_v7 = vpop.eup %5487  ;;  %2166 = vadd.xlane.f32.xlu0 %v6764_v17  ;;  %5499 = vpow2.f32 %v2028_v61  ;;  %v2060_v10 = vmul.f32 1.442695, %v1933_v56  ;;  %v5338_v17 = vld [vmem:[%s6126_s23 + $0x88] sm:$0xff]  }
 0x23b   : > { %7768 = vst [vmem:[#allocation20_spill] sm:$0xff] %v6768_v7  ;;  %v1930_v55 = vmul.f32 0.17677669, %v1866_v60  ;;  %v1931_v26 = vmul.f32 0.17677669, %v1867_v46  ;;  %2168 = vadd.xlane.f32.xlu1 %v6768_v7 }
 0x23d   : > { %v6772_v23 = vpop.eup %5489  ;;  %v2054_v13 = vmul.f32 1.442695, %v1930_v55  ;;  %v2056_v29 = vmul.f32 1.442695, %v1931_v26 }
 0x23e   : > { %7769 = vst [vmem:[#allocation21_spill] sm:$0xff] %v6772_v23  ;;  %v6774_v58 = vpop.eup %5491  ;;  %2178 = vadd.xlane.f32.xlu0 %v6772_v23 }
 0x23f   : > { %7770 = vst [vmem:[#allocation22_spill] sm:$0xff] %v6774_v58  ;;  %5501 = vpow2.f32 %v2054_v13  ;;  %2180 = vadd.xlane.f32.xlu1 %v6774_v58 }
 0x240   : > { %5503 = vpow2.f32 %v2056_v29 }
 0x241   : > { %v6778_v6 = vpop.eup %5493  ;;  %5505 = vpow2.f32 %v2058_v2 }
 0x242   : > { %7771 = vst [vmem:[#allocation23_spill] sm:$0xff] %v6778_v6  ;;  %v6780_v46 = vpop.eup %5495  ;;  %2174 = vadd.xlane.f32.xlu0 %v6778_v6  ;;  %5507 = vpow2.f32 %v2060_v10 }
 0x243   : > { %7772 = vst [vmem:[#allocation24_spill] sm:$0xff] %v6780_v46  ;;  %2176 = vadd.xlane.f32.xlu1 %v6780_v46  ;;  %v6784_v61 = vpop.eup %5497 }
 0x244   : > { %7773 = vst [vmem:[#allocation25_spill] sm:$0xff] %v6784_v61  ;;  %v6786_v12 = vpop.eup %5499 }
 0x245   : > { %7774 = vst [vmem:[#allocation26_spill] sm:$0xff] %v6786_v12 }
 0x246   : > { %2154 = vadd.xlane.f32.xlu0 %v6784_v61 }
 0x247   : > { %2156 = vadd.xlane.f32.xlu1 %v6786_v12 }
 0x249   : > { %v6790_v40 = vpop.eup %5501 }
 0x24a   : > { %7775 = vst [vmem:[#allocation27_spill] sm:$0xff] %v6790_v40  ;;  %v6792_v18 = vpop.eup %5503  ;;  %2182 = vadd.xlane.f32.xlu0 %v6790_v40 }
 0x24b   : > { %7776 = vst [vmem:[#allocation28_spill] sm:$0xff] %v6792_v18  ;;  %2184 = vadd.xlane.f32.xlu1 %v6792_v18  ;;  %v6796_v19 = vpop.eup %5505 }
 0x24c   : > { %7777 = vst [vmem:[#allocation29_spill] sm:$0xff] %v6796_v19  ;;  %v6798_v60 = vpop.eup %5507 }
 0x24d   : > { %7778 = vst [vmem:[#allocation30_spill] sm:$0xff] %v6798_v60 }
 0x24e   : > { %2186 = vadd.xlane.f32.xlu0 %v6796_v19 }
 0x24f   : > { %2188 = vadd.xlane.f32.xlu1 %v6798_v60 }
 0x25b   : > { %v2067_v48 = vpop.xlane.xlu0 %2066 }
 0x25f   : > { %v2083_v55 = vpop.xlane.xlu0 %2082  ;;  %v2069_v26 = vpop.xlane.xlu1 %2068 }
 0x260   : > { %5509 = vrcp.f32 %v2069_v26 }
 0x263   : > { %v2063_v56 = vpop.xlane.xlu0 %2062  ;;  %v2085_v13 = vpop.xlane.xlu1 %2084 }
 0x264   : > { %5511 = vrcp.f32 %v2063_v56 }
 0x265   : > { %5513 = vrcp.f32 %v2067_v48 }
 0x267   : > { %v2079_v29 = vpop.xlane.xlu0 %2078  ;;  %v2065_v2 = vpop.xlane.xlu1 %2064 }
 0x268   : > { %5515 = vrcp.f32 %v2065_v2 }
 0x269   : > { %5517 = vrcp.f32 %v2079_v29 }
 0x26a   : > { %v5510_v61 = vpop.eup %5509 }
 0x26b   : > { %v2075_v10 = vpop.xlane.xlu0 %2074  ;;  %v2257_v58 = vmul.f32 %v5510_v61, %v6534_v37  ;;  %v5342_v61 = vld [vmem:[%s6126_s23 + $0x98] sm:$0xff]  }
 0x26c   : > { %v2081_v18 = vpop.xlane.xlu1 %2080 }
 0x26d   : > { %5519 = vrcp.f32 %v2081_v18 }
 0x26e   : > { %v5512_v46 = vpop.eup %5511 }
 0x26f   : > { %v2091_v40 = vpop.xlane.xlu0 %2090  ;;  %v5514_v19 = vpop.eup %5513  ;;  %v2254_v26 = vmul.f32 %v5512_v46, %v6538_v21 }
 0x270   : > { %v2077_v12 = vpop.xlane.xlu1 %2076  ;;  %v2256_v48 = vmul.f32 %v5514_v19, %v6526_v54  ;;  %v5340_v54 = vld [vmem:[%s6126_s23 + $0x90] sm:$0xff]  }
 0x271   : > { %5521 = vrcp.f32 %v2077_v12 }
 0x272   : > { %v5516_v60 = vpop.eup %5515  ;;  %v2319_v11 = vpack.c.bf16 %v2257_v58, %v2256_v48 }
 0x273   : > { %v2071_v23 = vpop.xlane.xlu0 %2070  ;;  %v2255_v56 = vmul.f32 %v5516_v60, %v6550_v1  ;;  %v5518_v1 = vpop.eup %5517 }
 0x274   : > { %v2093_v6 = vpop.xlane.xlu1 %2092  ;;  %5523 = vrcp.f32 %v2071_v23 }
 0x275   : > { %v2318_v2 = vpack.c.bf16 %v2255_v56, %v2254_v26  ;;  %5525 = vrcp.f32 %v2075_v10  ;;  %v2262_v26 = vmul.f32 %v5518_v1, %v6546_v35 }
 0x277   : > { %v2087_v7 = vpop.xlane.xlu0 %2086  ;;  %4860 = vmatprep.mubr.bf16.mxu0 %v2318_v2  ;;  %v5520_v46 = vpop.eup %5519 }
 0x278   : > { %v2073_v16 = vpop.xlane.xlu1 %2072  ;;  %4861 = vmatmul.mubr.bf16.vlgmr.msra.gmra.mrb[24].mxu0 %v2319_v11  ;;  %v2263_v10 = vmul.f32 %v5520_v46, %v6559_v47 }
 0x279   : > { %5527 = vrcp.f32 %v2073_v16  ;;  %4909 = vmatpush3.bf16.msra.mxu0 %v6637_v22 }
 0x27a   : > { %4910 = vmatprep.subr.bf16.mxu0 %v5338_v17  ;;  %5529 = vrcp.f32 %v2085_v13 }
 0x27b   : > { %v2099_v37 = vpop.xlane.xlu0 %2098  ;;  %v5522_v12 = vpop.eup %5521 }
 0x27c   : > { %v2089_v21 = vpop.xlane.xlu1 %2088  ;;  %v2261_v60 = vmul.f32 %v5522_v12, %v6568_v24 }
 0x27d   : > { %4911 = vmatpush3.bf16.msra.mxu0 %v5338_v17  ;;  %5531 = vrcp.f32 %v2089_v21  ;;  %v5344_v17 = vld [vmem:[%s6126_s23 + $0xa0] sm:$0xff]  }
 0x27e   : > { %4912 = vmatprep.subr.bf16.mxu0 %v5340_v54  ;;  %5533 = vrcp.f32 %v2083_v55  ;;  %v5524_v16 = vpop.eup %5523 }
 0x27f   : > { %v2131_v23 = vpop.xlane.xlu0 %2130  ;;  %5535 = vrcp.f32 %v2087_v7  ;;  %v5526_v11 = vpop.eup %5525  ;;  %v2258_v13 = vmul.f32 %v5524_v16, %v6573_v32  ;;  %v2322_v32 = vpack.c.bf16 %v2263_v10, %v2262_v26 }
 0x280   : > { %v2101_v58 = vpop.xlane.xlu1 %2100  ;;  %5537 = vrcp.f32 %v2091_v40  ;;  %v2260_v7 = vmul.f32 %v5526_v11, %v6555_v42  ;;  %v5346_v40 = vld [vmem:[%s6126_s23 + $0xa8] sm:$0xff]  }
 0x281   : > { %4913 = vmatpush3.bf16.msra.mxu0 %v5340_v54  ;;  %5539 = vrcp.f32 %v2093_v6  ;;  %v5347_v54 = vld [vmem:[%s6126_s23 + $0xb0] sm:$0xff]  }
 0x282   : > { %4914 = vmatprep.subr.bf16.mxu0 %v5342_v61  ;;  %5541 = vrcp.f32 %v2101_v58  ;;  %v2321_v48 = vpack.c.bf16 %v2261_v60, %v2260_v7 }
 0x283   : > { %v5528_v22 = vpop.eup %5527  ;;  %v2095_v18 = vpop.xlane.xlu0 %2094 }
 0x284   : > { %v2133_v19 = vpop.xlane.xlu1 %2132  ;;  %v2259_v29 = vmul.f32 %v5528_v22, %v6586_v20  ;;  %5543 = vrcp.f32 %v2095_v18  ;;  %v5530_v2 = vpop.eup %5529  ;;  %v5348_v22 = vld [vmem:[%s6126_s23 + $0xb8] sm:$0xff]  }
 0x285   : > { %4915 = vmatpush3.bf16.msra.mxu0 %v5342_v61  ;;  %5545 = vrcp.f32 %v2099_v37  ;;  %v2265_v21 = vmul.f32 %v5530_v2, %v6542_v41 }
 0x286   : > { %v2320_v55 = vpack.c.bf16 %v2259_v29, %v2258_v13  ;;  %4916 = vmatprep.subr.bf16.mxu0 %v5344_v17 }
 0x287   : > { %v2127_v24 = vpop.xlane.xlu0 %2126  ;;  %v5532_v47 = vpop.eup %5531 }
 0x288   : > { %v2097_v56 = vpop.xlane.xlu1 %2096  ;;  %4864 = vmatprep.mubr.bf16.mxu0 %v2320_v55  ;;  %v5534_v42 = vpop.eup %5533  ;;  %v2267_v1 = vmul.f32 %v5532_v47, %v6595_v30 }
 0x289   : > { %5547 = vrcp.f32 %v2097_v56  ;;  %4865 = vmatmul.mubr.bf16.gmra.mrb[28].mxu0 %v2321_v48  ;;  %v5536_v20 = vpop.eup %5535  ;;  %v2264_v37 = vmul.f32 %v5534_v42, %v6530_v14 }
 0x28a   : > { %4868 = vmatprep.mubr.bf16.mxu0 %v2322_v32  ;;  %4917 = vmatpush3.bf16.msra.mxu0 %v5344_v17  ;;  %5549 = vrcp.f32 %v2127_v24  ;;  %v5538_v46 = vpop.eup %5537  ;;  %v2266_v58 = vmul.f32 %v5536_v20, %v6582_v0  ;;  %v5351_v20 = vld [vmem:[%s6126_s23 + $0xd0] sm:$0xff]  }
 0x28b   : > { %v2107_v35 = vpop.xlane.xlu0 %2106  ;;  %4918 = vmatprep.subr.bf16.mxu0 %v5346_v40  ;;  %v5540_v61 = vpop.eup %5539  ;;  %v2323_v11 = vpack.c.bf16 %v2265_v21, %v2264_v37  ;;  %v2268_v55 = vmul.f32 %v5538_v46, %v6564_v63 }
 0x28c   : > { %v2129_v6 = vpop.xlane.xlu1 %2128  ;;  %v5542_v18 = vpop.eup %5541  ;;  %v2324_v41 = vpack.c.bf16 %v2267_v1, %v2266_v58  ;;  %v2269_v13 = vmul.f32 %v5540_v61, %v6577_v59 }
 0x28d   : > { %5551 = vrcp.f32 %v2129_v6 }
 0x28e   : > { %5553 = vrcp.f32 %v2133_v19  ;;  %4919 = vmatpush3.bf16.msra.mxu0 %v5346_v40  ;;  %v5544_v60 = vpop.eup %5543  ;;  %v2273_v19 = vmul.f32 %v5542_v18, %v6604_v15  ;;  %v2325_v48 = vpack.c.bf16 %v2269_v13, %v2268_v55  ;;  %v5350_v40 = vld [vmem:[%s6126_s23 + $0xc8] sm:$0xff]  }
 0x28f   : > { %v2139_v12 = vpop.xlane.xlu0 %2138  ;;  %4920 = vmatprep.subr.bf16.mxu0 %v5347_v54  ;;  %5555 = vrcp.f32 %v2131_v23  ;;  %v5546_v30 = vpop.eup %5545  ;;  %v2270_v29 = vmul.f32 %v5544_v60, %v6609_v3 }
 0x290   : > { %v2109_v16 = vpop.xlane.xlu1 %2108  ;;  %v2272_v7 = vmul.f32 %v5546_v30, %v6591_v53 }
 0x291   : > { %4869 = vmatmul.mubr.bf16.gmra.mrb[32].mxu0 %v2323_v11  ;;  %5557 = vrcp.f32 %v2109_v16 }
 0x292   : > { %4872 = vmatprep.mubr.bf16.mxu0 %v2324_v41  ;;  %4921 = vmatpush3.bf16.msra.mxu0 %v5347_v54  ;;  %v2327_v59 = vpack.c.bf16 %v2273_v19, %v2272_v7  ;;  %v5354_v19 = vld [vmem:[%s6126_s23 + $0xe8] sm:$0xff]  }
 0x293   : > { %v5548_v14 = vpop.eup %5547  ;;  %v2103_v17 = vpop.xlane.xlu0 %2102  ;;  %4922 = vmatprep.subr.bf16.mxu0 %v5348_v22 }
 0x294   : > { %v2141_v0 = vpop.xlane.xlu1 %2140  ;;  %v2271_v10 = vmul.f32 %v5548_v14, %v6622_v4  ;;  %v5550_v23 = vpop.eup %5549  ;;  %5559 = vrcp.f32 %v2103_v17 }
 0x295   : > { %5561 = vrcp.f32 %v2107_v35  ;;  %v2286_v3 = vmul.f32 %v5550_v23, %v6618_v28 }
 0x296   : > { %v2326_v26 = vpack.c.bf16 %v2271_v10, %v2270_v29  ;;  %4923 = vmatpush3.bf16.msra.mxu0 %v5348_v22  ;;  %v5355_v29 = vld [vmem:[%s6126_s23 + $0xf0] sm:$0xff]   ;;  %v5356_v10 = vld [vmem:[%s6126_s23 + $0xf8] sm:$0xff]  }
 0x297   : > { %v5552_v24 = vpop.eup %5551  ;;  %v2135_v15 = vpop.xlane.xlu0 %2134 }
 0x298   : > { %v2105_v56 = vpop.xlane.xlu1 %2104  ;;  %v5554_v2 = vpop.eup %5553  ;;  %4892 = vmatprep.mubr.bf16.mxu1 %v2326_v26  ;;  %v2287_v53 = vmul.f32 %v5552_v24, %v6631_v31 }
 0x299   : > { %5563 = vrcp.f32 %v2105_v56  ;;  %4873 = vmatmul.mubr.bf16.gmra.mrb[36].mxu0 %v2325_v48  ;;  %4893 = vmatmul.mubr.bf16.vlgmr.msra.gmra.mrb[40].mxu1 %v2327_v59  ;;  %v5556_v63 = vpop.eup %5555  ;;  %v2289_v32 = vmul.f32 %v5554_v2, %v6613_v45 }
 0x29a   : > { %5565 = vrcp.f32 %v2141_v0  ;;  %v2334_v4 = vpack.c.bf16 %v2287_v53, %v2286_v3  ;;  %4941 = vmatpush3.bf16.msra.mxu1 %v6740_v49  ;;  %v2288_v28 = vmul.f32 %v5556_v63, %v6600_v9  ;;  %v5352_v49 = vld [vmem:[%s6126_s23 + $0xd8] sm:$0xff]   ;;  %v5353_v9 = vld [vmem:[%s6126_s23 + $0xe0] sm:$0xff]   ;;  %s4605_s23 = sshll.u32 %s5799_s19, 5  ;;  %s7812_s19 = sand.u32 1, %s5779_s30  }
 0x29b   : > { %5567 = vrcp.f32 %v2135_v15  ;;  %v2115_v47 = vpop.xlane.xlu0 %2114  ;;  %4942 = vmatprep.subr.bf16.mxu1 %v5350_v40  ;;  %v5558_v21 = vpop.eup %5557  ;;  %s4333_s27 = sadd.s32 %s5795_s18, %s4605_s23 }
 0x29c   : > { %v2137_v42 = vpop.xlane.xlu1 %2136  ;;  %5569 = vrcp.f32 %v2139_v12  ;;  %4924 = vmatprep.mubr.bf16.mxu0 %v2334_v4  ;;  %v2335_v6 = vpack.c.bf16 %v2289_v32, %v2288_v28  ;;  %v2277_v58 = vmul.f32 %v5558_v21, %v6643_v5 }
 0x29d   : > { %5571 = vrcp.f32 %v2137_v42 }
 0x29e   : > { %4943 = vmatpush3.bf16.msra.mxu1 %v5350_v40  ;;  %v5560_v54 = vpop.eup %5559 }
 0x29f   : > { %v2147_v31 = vpop.xlane.xlu0 %2146  ;;  %4944 = vmatprep.subr.bf16.mxu1 %v5351_v20  ;;  %v5562_v45 = vpop.eup %5561  ;;  %v2274_v12 = vmul.f32 %v5560_v54, %v6649_v43  ;;  %v7779_v54 = vld [vmem:[#allocation9_spill] sm:$0xff] }
 0x2a0   : > { %v2117_v35 = vpop.xlane.xlu1 %2116  ;;  %v2276_v22 = vmul.f32 %v5562_v45, %v6627_v57  ;;  %v7780_v45 = vld [vmem:[#allocation8_spill] sm:$0xff] }
 0x2a1   : > { %4925 = vmatmul.mubr.bf16.vlgmr.msra.gmra.mrb[40].mxu0 %v2335_v6  ;;  %5573 = vrcp.f32 %v2117_v35 }
 0x2a2   : > { %4945 = vmatpush3.bf16.msra.mxu1 %v5351_v20  ;;  %v2329_v14 = vpack.c.bf16 %v2277_v58, %v2276_v22  ;;  %v7783_v22 = vld [vmem:[#allocation11_spill] sm:$0xff] }
 0x2a3   : > { %v5564_v1 = vpop.eup %5563  ;;  %v2111_v37 = vpop.xlane.xlu0 %2110  ;;  %4946 = vmatprep.subr.bf16.mxu1 %v5352_v49 }
 0x2a4   : > { %v2149_v46 = vpop.xlane.xlu1 %2148  ;;  %v5566_v61 = vpop.eup %5565  ;;  %v2275_v16 = vmul.f32 %v5564_v1, %v6662_v33  ;;  %5575 = vrcp.f32 %v2111_v37 }
 0x2a5   : > { %v5568_v11 = vpop.eup %5567  ;;  %v2293_v5 = vmul.f32 %v5566_v61, %v6653_v34  ;;  %5577 = vrcp.f32 %v2115_v47 }
 0x2a6   : > { %v5570_v18 = vpop.eup %5569  ;;  %v2328_v41 = vpack.c.bf16 %v2275_v16, %v2274_v12  ;;  %4947 = vmatpush3.bf16.msra.mxu1 %v5352_v49  ;;  %v2290_v33 = vmul.f32 %v5568_v11, %v6658_v39 }
 0x2a7   : > { %v5572_v60 = vpop.eup %5571  ;;  %4948 = vmatprep.subr.bf16.mxu1 %v5353_v9  ;;  %v2143_v43 = vpop.xlane.xlu0 %2142  ;;  %v2292_v17 = vmul.f32 %v5570_v18, %v6639_v25 }
 0x2a8   : > { %v2113_v30 = vpop.xlane.xlu1 %2112  ;;  %4896 = vmatprep.mubr.bf16.mxu1 %v2328_v41  ;;  %v2291_v57 = vmul.f32 %v5572_v60, %v6671_v51  ;;  %v7784_v60 = vld [vmem:[#allocation14_spill] sm:$0xff] }
 0x2a9   : > { %5579 = vrcp.f32 %v2113_v30  ;;  %4897 = vmatmul.mubr.bf16.gmra.mrb[44].mxu1 %v2329_v14  ;;  %v2337_v13 = vpack.c.bf16 %v2293_v5, %v2292_v17 }
 0x2aa   : > { %5581 = vrcp.f32 %v2149_v46  ;;  %v2336_v0 = vpack.c.bf16 %v2291_v57, %v2290_v33  ;;  %4949 = vmatpush3.bf16.msra.mxu1 %v5353_v9  ;;  %v7782_v46 = vld [vmem:[#allocation7_spill] sm:$0xff] }
 0x2ab   : > { %5583 = vrcp.f32 %v2143_v43  ;;  %4950 = vmatprep.subr.bf16.mxu1 %v5354_v19  ;;  %v2123_v39 = vpop.xlane.xlu0 %2122  ;;  %v5574_v23 = vpop.eup %5573 }
 0x2ac   : > { %v2145_v34 = vpop.xlane.xlu1 %2144  ;;  %5585 = vrcp.f32 %v2147_v31  ;;  %4928 = vmatprep.mubr.bf16.mxu0 %v2336_v0  ;;  %v2281_v15 = vmul.f32 %v5574_v23, %v6682_v52  ;;  %v7785_v0 = vld [vmem:[#allocation15_spill] sm:$0xff] }
 0x2ad   : > { %5587 = vrcp.f32 %v2145_v34  ;;  %4929 = vmatmul.mubr.bf16.gmra.mrb[44].mxu0 %v2337_v13  ;;  %v7786_v13 = vld [vmem:[#allocation16_spill] sm:$0xff] }
 0x2ae   : > { %4951 = vmatpush3.bf16.msra.mxu1 %v5354_v19  ;;  %v5576_v25 = vpop.eup %5575 }
 0x2af   : > { %4952 = vmatprep.subr.bf16.mxu1 %v5355_v29  ;;  %v5578_v7 = vpop.eup %5577  ;;  %v2278_v48 = vmul.f32 %v5576_v25, %v6687_v27  ;;  %v7788_v25 = vld [vmem:[#allocation12_spill] sm:$0xff] }
 0x2b0   : > { %v2125_v51 = vpop.xlane.xlu1 %2124  ;;  %v2280_v2 = vmul.f32 %v5578_v7, %v6667_v8 }
 0x2b1   : > { %5589 = vrcp.f32 %v2125_v51  ;;  %v7787_v51 = vld [vmem:[#allocation17_spill] sm:$0xff] }
 0x2b2   : > { %5591 = vrcp.f32 %v2123_v39  ;;  %4953 = vmatpush3.bf16.msra.mxu1 %v5355_v29  ;;  %v2331_v47 = vpack.c.bf16 %v2281_v15, %v2280_v2 }
 0x2b3   : > { %v2119_v55 = vpop.xlane.xlu0 %2118  ;;  %v5580_v26 = vpop.eup %5579  ;;  %4954 = vmatprep.subr.bf16.mxu1 %v5356_v10 }
 0x2b4   : > { %5593 = vrcp.f32 %v2119_v55  ;;  %v2121_v24 = vpop.xlane.xlu1 %2120  ;;  %v5582_v56 = vpop.eup %5581  ;;  %v2279_v59 = vmul.f32 %v5580_v26, %v6699_v38 }
 0x2b5   : > { %5595 = vrcp.f32 %v2121_v24  ;;  %v5584_v40 = vpop.eup %5583  ;;  %v2297_v52 = vmul.f32 %v5582_v56, %v6691_v36 }
 0x2b6   : > { %v5586_v3 = vpop.eup %5585  ;;  %v2330_v63 = vpack.c.bf16 %v2279_v59, %v2278_v48  ;;  %4955 = vmatpush3.bf16.msra.mxu1 %v5356_v10  ;;  %v2294_v42 = vmul.f32 %v5584_v40, %v6695_v44 }
 0x2b7   : > { %v2151_v53 = vpop.xlane.xlu0 %2150  ;;  %v5588_v4 = vpop.eup %5587  ;;  %v2296_v38 = vmul.f32 %v5586_v3, %v6680_v50  ;;  %v7781_v50 = vld [vmem:[#allocation10_spill] sm:$0xff]  ;;  %v7789_v3 = vld [vmem:[#allocation19_spill] sm:$0xff] }
 0x2b8   : > { %5597 = vrcp.f32 %v2151_v53  ;;  %v2153_v32 = vpop.xlane.xlu1 %2152  ;;  %4900 = vmatprep.mubr.bf16.mxu1 %v2330_v63  ;;  %v2295_v27 = vmul.f32 %v5588_v4, %v6707_v62  ;;  %v7790_v63 = vld [vmem:[#allocation13_spill] sm:$0xff] }
 0x2b9   : > { %5599 = vrcp.f32 %v2153_v32  ;;  %4901 = vmatmul.mubr.bf16.gmra.mrb[48].mxu1 %v2331_v47  ;;  %v2339_v35 = vpack.c.bf16 %v2297_v52, %v2296_v38  ;;  %v7791_v32 = vld [vmem:[#allocation18_spill] sm:$0xff] }
 0x2ba   : > { %v2338_v20 = vpack.c.bf16 %v2295_v27, %v2294_v42  ;;  %v7792_v42 = vld [vmem:[#allocation20_spill] sm:$0xff] }
 0x2bb   : > { %v2163_v8 = vpop.xlane.xlu0 %2162  ;;  %v5590_v28 = vpop.eup %5589 }
 0x2bc   : > { %v2165_v31 = vpop.xlane.xlu1 %2164  ;;  %v5592_v6 = vpop.eup %5591  ;;  %5601 = vrcp.f32 %v2163_v8  ;;  %4932 = vmatprep.mubr.bf16.mxu0 %v2338_v20  ;;  %v2285_v62 = vmul.f32 %v5590_v28, %v7780_v45 }
 0x2bd   : > { %5603 = vrcp.f32 %v2165_v31  ;;  %4933 = vmatmul.mubr.bf16.gmra.mrb[48].mxu0 %v2339_v35  ;;  %v2284_v58 = vmul.f32 %v5592_v6, %v7782_v46 }
 0x2be   : > { %v5594_v49 = vpop.eup %5593 }
 0x2bf   : > { %v5596_v36 = vpop.eup %5595  ;;  %v2159_v21 = vpop.xlane.xlu0 %2158  ;;  %v2282_v44 = vmul.f32 %v5594_v49, %v7779_v54  ;;  %v2333_v11 = vpack.c.bf16 %v2285_v62, %v2284_v58  ;;  %v7795_v62 = vld [vmem:[#allocation22_spill] sm:$0xff] }
 0x2c0   : > { %5605 = vrcp.f32 %v2159_v21  ;;  %v2161_v1 = vpop.xlane.xlu1 %2160  ;;  %v2283_v37 = vmul.f32 %v5596_v36, %v7781_v50  ;;  %v7793_v21 = vld [vmem:[#allocation23_spill] sm:$0xff] }
 0x2c1   : > { %5607 = vrcp.f32 %v2161_v1 }
 0x2c2   : > { %v5598_v9 = vpop.eup %5597  ;;  %v2332_v61 = vpack.c.bf16 %v2283_v37, %v2282_v44  ;;  %v7794_v44 = vld [vmem:[#allocation21_spill] sm:$0xff]  ;;  %v7796_v37 = vld [vmem:[#allocation24_spill] sm:$0xff] }
 0x2c3   : > { %v5600_v12 = vpop.eup %5599  ;;  %v2171_v16 = vpop.xlane.xlu0 %2170  ;;  %v2298_v18 = vmul.f32 %v5598_v9, %v7783_v22  ;;  %v7798_v22 = vld [vmem:[#allocation26_spill] sm:$0xff] }
 0x2c4   : > { %4904 = vmatprep.mubr.bf16.mxu1 %v2332_v61  ;;  %v2173_v41 = vpop.xlane.xlu1 %2172  ;;  %v2299_v30 = vmul.f32 %v5600_v12, %v7784_v60  ;;  %5609 = vrcp.f32 %v2171_v16  ;;  %v7797_v16 = vld [vmem:[#allocation25_spill] sm:$0xff] }
 0x2c5   : > { %4905 = vmatmul.mubr.bf16.gmra.mrb[52].mxu1 %v2333_v11  ;;  %5611 = vrcp.f32 %v2173_v41 }
 0x2c6   : > { %v2340_v14 = vpack.c.bf16 %v2299_v30, %v2298_v18  ;;  %v5602_v5 = vpop.eup %5601 }
 0x2c7   : > { %v2167_v19 = vpop.xlane.xlu0 %2166  ;;  %v5604_v43 = vpop.eup %5603  ;;  %v2304_v34 = vmul.f32 %v5602_v5, %v7785_v0  ;;  %v7801_v0 = vld [vmem:[#allocation29_spill] sm:$0xff] }
 0x2c8   : > { %5613 = vrcp.f32 %v2167_v19  ;;  %4936 = vmatprep.mubr.bf16.mxu0 %v2340_v14  ;;  %v2169_v33 = vpop.xlane.xlu1 %2168  ;;  %v2305_v29 = vmul.f32 %v5604_v43, %v7786_v13  ;;  %v7799_v14 = vld [vmem:[#allocation27_spill] sm:$0xff]  ;;  %v7800_v19 = vld [vmem:[#allocation28_spill] sm:$0xff]  ;;  %v7802_v13 = vld [vmem:[#allocation30_spill] sm:$0xff] }
 0x2c9   : > { %5615 = vrcp.f32 %v2169_v33 }
 0x2ca   : > { %v5606_v57 = vpop.eup %5605  ;;  %v2343_v15 = vpack.c.bf16 %v2305_v29, %v2304_v34 }
 0x2cb   : > { %v5608_v17 = vpop.eup %5607  ;;  %v2179_v39 = vpop.xlane.xlu0 %2178  ;;  %v2302_v10 = vmul.f32 %v5606_v57, %v7787_v51 }
 0x2cc   : > { %v2181_v23 = vpop.xlane.xlu1 %2180  ;;  %v2303_v7 = vmul.f32 %v5608_v17, %v7788_v25  ;;  %5617 = vrcp.f32 %v2179_v39 }
 0x2cd   : > { %5619 = vrcp.f32 %v2181_v23 }
 0x2ce   : > { %v2342_v55 = vpack.c.bf16 %v2303_v7, %v2302_v10  ;;  %v5610_v26 = vpop.eup %5609 }
 0x2cf   : > { %v2175_v24 = vpop.xlane.xlu0 %2174  ;;  %v5612_v56 = vpop.eup %5611  ;;  %v2308_v4 = vmul.f32 %v5610_v26, %v7790_v63 }
 0x2d0   : > { %5621 = vrcp.f32 %v2175_v24  ;;  %4956 = vmatprep.mubr.bf16.mxu1 %v2342_v55  ;;  %v2177_v48 = vpop.xlane.xlu1 %2176  ;;  %v2309_v47 = vmul.f32 %v5612_v56, %v7791_v32 }
 0x2d1   : > { %5623 = vrcp.f32 %v2177_v48  ;;  %4957 = vmatmul.mubr.bf16.vlgmr.msra.gmra.mrb[56].mxu1 %v2343_v15 }
 0x2d2   : > { %v5614_v59 = vpop.eup %5613  ;;  %v2345_v28 = vpack.c.bf16 %v2309_v47, %v2308_v4 }
 0x2d3   : > { %v5616_v40 = vpop.eup %5615  ;;  %v2155_v2 = vpop.xlane.xlu0 %2154  ;;  %v2306_v53 = vmul.f32 %v5614_v59, %v7789_v3 }
 0x2d4   : > { %5625 = vrcp.f32 %v2155_v2  ;;  %v2157_v52 = vpop.xlane.xlu1 %2156  ;;  %v2307_v27 = vmul.f32 %v5616_v40, %v7792_v42 }
 0x2d5   : > { %5627 = vrcp.f32 %v2157_v52 }
 0x2d6   : > { %v2344_v38 = vpack.c.bf16 %v2307_v27, %v2306_v53  ;;  %v5618_v8 = vpop.eup %5617 }
 0x2d7   : > { %v2183_v20 = vpop.xlane.xlu0 %2182  ;;  %v5620_v31 = vpop.eup %5619  ;;  %v2312_v45 = vmul.f32 %v5618_v8, %v7794_v44 }
 0x2d8   : > { %5629 = vrcp.f32 %v2183_v20  ;;  %4960 = vmatprep.mubr.bf16.mxu1 %v2344_v38  ;;  %v2185_v35 = vpop.xlane.xlu1 %2184  ;;  %v2313_v1 = vmul.f32 %v5620_v31, %v7795_v62 }
 0x2d9   : > { %5631 = vrcp.f32 %v2185_v35  ;;  %4961 = vmatmul.mubr.bf16.gmra.mrb[60].mxu1 %v2345_v28  ;;  %v5357_v35 = vld [vmem:[%s7650_s4] sm:$0xff]  }
 0x2da   : > { %v5622_v6 = vpop.eup %5621  ;;  %v2347_v12 = vpack.c.bf16 %v2313_v1, %v2312_v45  ;;  %4972 = vmatprep.subr.bf16.mxu0 %v5357_v35 }
 0x2db   : > { %v5624_v49 = vpop.eup %5623  ;;  %v2187_v36 = vpop.xlane.xlu0 %2186  ;;  %v2310_v54 = vmul.f32 %v5622_v6, %v7793_v21  ;;  %4973 = vmatpush3.bf16.msra.mxu0 %v5357_v35 }
 0x2dc   : > { %5633 = vrcp.f32 %v2187_v36  ;;  %v2189_v50 = vpop.xlane.xlu1 %2188  ;;  %v2311_v46 = vmul.f32 %v5624_v49, %v7796_v37 }
 0x2dd   : > { %5635 = vrcp.f32 %v2189_v50 }
 0x2de   : > { %v5626_v58 = vpop.eup %5625  ;;  %v2346_v9 = vpack.c.bf16 %v2311_v46, %v2310_v54 }
 0x2df   : > { %v5628_v61 = vpop.eup %5627  ;;  %v2300_v11 = vmul.f32 %v5626_v58, %v7797_v16  ;;  %v5358_v58 = vld [vmem:[%s7650_s4 + $0x8] sm:$0xff]   ;;  %v5360_v16 = vld [vmem:[%s7650_s4 + $0x18] sm:$0xff]  }
 0x2e0   : > { %4964 = vmatprep.mubr.bf16.mxu1 %v2346_v9  ;;  %v2301_v18 = vmul.f32 %v5628_v61, %v7798_v22  ;;  %4974 = vmatprep.subr.bf16.mxu0 %v5358_v58  ;;  %v5359_v9 = vld [vmem:[%s7650_s4 + $0x10] sm:$0xff]   ;;  %v5361_v22 = vld [vmem:[%s7650_s4 + $0x20] sm:$0xff]  }
 0x2e1   : > { %4965 = vmatmul.mubr.bf16.gmra.mrb[64].mxu1 %v2347_v12  ;;  %4975 = vmatpush3.bf16.msra.mxu0 %v5358_v58 }
 0x2e2   : > { %v5630_v41 = vpop.eup %5629  ;;  %v2341_v60 = vpack.c.bf16 %v2301_v18, %v2300_v11  ;;  %4976 = vmatprep.subr.bf16.mxu0 %v5359_v9 }
 0x2e3   : > { %v5632_v30 = vpop.eup %5631  ;;  %v2314_v5 = vmul.f32 %v5630_v41, %v7799_v14 }
 0x2e4   : > { %4937 = vmatmul.mubr.bf16.gmra.mrb[52].mxu0 %v2341_v60  ;;  %v2315_v43 = vmul.f32 %v5632_v30, %v7800_v19 }
 0x2e5   : > { %4977 = vmatpush3.bf16.msra.mxu0 %v5359_v9 }
 0x2e6   : > { %v5634_v33 = vpop.eup %5633  ;;  %v2348_v57 = vpack.c.bf16 %v2315_v43, %v2314_v5  ;;  %4978 = vmatprep.subr.bf16.mxu0 %v5360_v16  ;;  %v5362_v5 = vld [vmem:[%s7650_s4 + $0x28] sm:$0xff]  }
 0x2e7   : > { %v5636_v17 = vpop.eup %5635  ;;  %v2316_v34 = vmul.f32 %v5634_v33, %v7801_v0 }
 0x2e8   : > { %4968 = vmatprep.mubr.bf16.mxu1 %v2348_v57  ;;  %v2317_v29 = vmul.f32 %v5636_v17, %v7802_v13  ;;  %v5363_v17 = vld [vmem:[%s7650_s4 + $0x30] sm:$0xff]  }
 0x2e9   : > { %4979 = vmatpush3.bf16.msra.mxu0 %v5360_v16 }
 0x2ea   : > { %v2349_v39 = vpack.c.bf16 %v2317_v29, %v2316_v34  ;;  %4980 = vmatprep.subr.bf16.mxu0 %v5361_v22 }
 0x2ec   : > { %4969 = vmatmul.mubr.bf16.gmra.mrb[68].mxu1 %v2349_v39 }
 0x2ed   : > { %4981 = vmatpush3.bf16.msra.mxu0 %v5361_v22 }
 0x2ee   : > { %4982 = vmatprep.subr.bf16.mxu0 %v5362_v5 }
 0x2f1   : > { %4983 = vmatpush3.bf16.msra.mxu0 %v5362_v5 }
 0x2f2   : > { %4984 = vmatprep.subr.bf16.mxu0 %v5363_v17 }
 0x2f5   : > { %4985 = vmatpush3.bf16.msra.mxu0 %v5363_v17 }
 0x34b   : > { %v6882_v51 = vpop.f32.mrb[24].mxu0 }
 0x34c   : > { %v6884_v10 = vpop.f32.mrb[25].mxu0 }
 0x34d   : > { %v6886_v23 = vpop.f32.mrb[26].mxu0 }
 0x34e   : > { %v6888_v25 = vpop.f32.mrb[27].mxu0 }
 0x35c   : > { %v6890_v7 = vpop.f32.mrb[28].mxu0 }
 0x35d   : > { %v6892_v55 = vpop.f32.mrb[29].mxu0 }
 0x35e   : > { %v6894_v26 = vpop.f32.mrb[30].mxu0 }
 0x35f   : > { %v6896_v24 = vpop.f32.mrb[31].mxu0 }
 0x364   : > { %v6898_v15 = vpop.f32.mrb[32].mxu0 }
 0x365   : > { %v6900_v56 = vpop.f32.mrb[33].mxu0 }
 0x366   : > { %v6902_v48 = vpop.f32.mrb[34].mxu0 }
 0x367   : > { %v6904_v59 = vpop.f32.mrb[35].mxu0 }
 0x36c   : > { %v6906_v40 = vpop.f32.mrb[36].mxu0  ;;  %v4894_v2 = vpop.f32.mrb[40].mxu1 }
 0x36d   : > { %v6908_v3 = vpop.f32.mrb[37].mxu0  ;;  %v2641_v53 = vpop.f32.mrb[41].mxu1 }
 0x36e   : > { %v6910_v63 = vpop.f32.mrb[38].mxu0  ;;  %v4895_v4 = vpop.f32.mrb[42].mxu1 }
 0x36f   : > { %v5165_v32 = vpack.i.bf16 %v4895_v4, %v4894_v2  ;;  %v6912_v47 = vpop.f32.mrb[39].mxu0  ;;  %v2644_v52 = vpop.f32.mrb[43].mxu1 }
 0x370   : > { %v5170_v42 = vpack.i.bf16 %v2644_v52, %v2641_v53  ;;  %v5364_v53 = vld [vmem:[%s7650_s4 + $0x38] sm:$0xff]  }
 0x371   : > { %5166 = vrot.lane.b32.xlu1 %v5165_v32, %s5813_s11  ;;  %4986 = vmatprep.subr.bf16.mxu0 %v5364_v53 }
 0x372   : > { %5171 = vrot.lane.b32.xlu0 %v5170_v42, %s5813_s11  ;;  %4987 = vmatpush3.bf16.msra.mxu0 %v5364_v53 }
 0x374   : > { %v4926_v27 = vpop.f32.mrb[40].mxu0 }
 0x375   : > { %v2786_v38 = vpop.f32.mrb[41].mxu0 }
 0x376   : > { %v4927_v8 = vpop.f32.mrb[42].mxu0 }
 0x377   : > { %v5185_v20 = vpack.i.bf16 %v4927_v8, %v4926_v27  ;;  %v2789_v28 = vpop.f32.mrb[43].mxu0 }
 0x378   : > { %v5195_v31 = vpack.i.bf16 %v2789_v28, %v2786_v38 }
 0x37c   : > { %v4898_v6 = vpop.f32.mrb[44].mxu1 }
 0x37d   : > { %v2657_v49 = vpop.f32.mrb[45].mxu1 }
 0x37e   : > { %v4899_v36 = vpop.f32.mrb[46].mxu1 }
 0x37f   : > { %v5175_v21 = vpack.i.bf16 %v4899_v36, %v4898_v6  ;;  %v2660_v54 = vpop.f32.mrb[47].mxu1 }
 0x380   : > { %v5180_v44 = vpack.i.bf16 %v2660_v54, %v2657_v49  ;;  %v4930_v45 = vpop.f32.mrb[44].mxu0 }
 0x381   : > { %5176 = vrot.lane.b32.xlu1 %v5175_v21, %s5813_s11  ;;  %v2802_v62 = vpop.f32.mrb[45].mxu0 }
 0x382   : > { %5181 = vrot.lane.b32.xlu0 %v5180_v44, %s5813_s11  ;;  %v4931_v1 = vpop.f32.mrb[46].mxu0 }
 0x383   : > { %v5205_v50 = vpack.i.bf16 %v4931_v1, %v4930_v45  ;;  %v2805_v37 = vpop.f32.mrb[47].mxu0 }
 0x384   : > { %v5210_v46 = vpack.i.bf16 %v2805_v37, %v2802_v62 }
 0x385   : > { %5186 = vrot.lane.b32.xlu1 %v5185_v20, %s7704_s13  ;;  %s7803_s13 = smov 64  }
 0x38c   : > { %v4902_v61 = vpop.f32.mrb[48].mxu1 }
 0x38d   : > { %v2673_v12 = vpop.f32.mrb[49].mxu1 }
 0x38e   : > { %v4903_v11 = vpop.f32.mrb[50].mxu1 }
 0x38f   : > { %v5190_v18 = vpack.i.bf16 %v4903_v11, %v4902_v61  ;;  %v2676_v41 = vpop.f32.mrb[51].mxu1 }
 0x390   : > { %v5200_v60 = vpack.i.bf16 %v2676_v41, %v2673_v12  ;;  %v4934_v30 = vpop.f32.mrb[48].mxu0 }
 0x391   : > { %5191 = vrot.lane.b32.xlu1 %v5190_v18, %s5813_s11  ;;  %v2818_v14 = vpop.f32.mrb[49].mxu0 }
 0x392   : > { %5201 = vrot.lane.b32.xlu0 %v5200_v60, %s5813_s11  ;;  %v4935_v19 = vpop.f32.mrb[50].mxu0 }
 0x393   : > { %v5220_v43 = vpack.i.bf16 %v4935_v19, %v4934_v30  ;;  %v2821_v33 = vpop.f32.mrb[51].mxu0 }
 0x394   : > { %v5230_v57 = vpack.i.bf16 %v2821_v33, %v2818_v14 }
 0x395   : > { %5196 = vrot.lane.b32.xlu1 %v5195_v31, %s7803_s13 }
 0x396   : > { %5211 = vrot.lane.b32.xlu0 %v5210_v46, %s7803_s13 }
 0x398   : > { %v4906_v0 = vpop.f32.mrb[52].mxu1 }
 0x399   : > { %v2689_v34 = vpop.f32.mrb[53].mxu1  ;;  %5206 = vrot.lane.b32.xlu1 %v5205_v50, %s7803_s13 }
 0x39a   : > { %v4907_v13 = vpop.f32.mrb[54].mxu1 }
 0x39b   : > { %v5250_v29 = vpack.i.bf16 %v4907_v13, %v4906_v0  ;;  %v2692_v39 = vpop.f32.mrb[55].mxu1 }
 0x39c   : > { %v5245_v2 = vpack.i.bf16 %v2692_v39, %v2689_v34 }
 0x3a4   : > { %v4958_v4 = vpop.f32.mrb[56].mxu1 }
 0x3a5   : > { %v2931_v32 = vpop.f32.mrb[57].mxu1 }
 0x3a6   : > { %v4959_v52 = vpop.f32.mrb[58].mxu1 }
 0x3a7   : > { %v5215_v42 = vpack.i.bf16 %v4959_v52, %v4958_v4  ;;  %v2934_v27 = vpop.f32.mrb[59].mxu1 }
 0x3a8   : > { %v5225_v38 = vpack.i.bf16 %v2934_v27, %v2931_v32 }
 0x3a9   : > { %5216 = vrot.lane.b32.xlu1 %v5215_v42, %s5815_s28 }
 0x3aa   : > { %5226 = vrot.lane.b32.xlu0 %v5225_v38, %s5815_s28 }
 0x3ac   : > { %v4962_v8 = vpop.f32.mrb[60].mxu1 }
 0x3ad   : > { %5221 = vrot.lane.b32.xlu1 %v5220_v43, %s7803_s13  ;;  %v2947_v20 = vpop.f32.mrb[61].mxu1 }
 0x3ae   : > { %5231 = vrot.lane.b32.xlu0 %v5230_v57, %s7803_s13  ;;  %v4963_v28 = vpop.f32.mrb[62].mxu1 }
 0x3af   : > { %v5235_v31 = vpack.i.bf16 %v4963_v28, %v4962_v8  ;;  %v2950_v35 = vpop.f32.mrb[63].mxu1 }
 0x3b0   : > { %v5240_v6 = vpack.i.bf16 %v2950_v35, %v2947_v20 }
 0x3b1   : > { %5236 = vrot.lane.b32.xlu1 %v5235_v31, %s5815_s28 }
 0x3b2   : > { %5241 = vrot.lane.b32.xlu0 %v5240_v6, %s5815_s28 }
 0x3b4   : > { %v4966_v49 = vpop.f32.mrb[64].mxu1 }
 0x3b5   : > { %5251 = vrot.lane.b32.xlu1 %v5250_v29, %s5813_s11  ;;  %v2963_v36 = vpop.f32.mrb[65].mxu1 }
 0x3b6   : > { %5246 = vrot.lane.b32.xlu0 %v5245_v2, %s5813_s11  ;;  %v4967_v21 = vpop.f32.mrb[66].mxu1  ;;  %s4463_s11 = sshll.u32 %s5795_s18, 4  ;;  %s7588_s18 = scalar_lea.sflag [#allocation4], %s7812_s19 }
 0x3b7   : > { %v5255_v54 = vpack.i.bf16 %v4967_v21, %v4966_v49  ;;  %v4938_v44 = vpop.f32.mrb[52].mxu0  ;;  %v2966_v45 = vpop.f32.mrb[67].mxu1  ;;  %p822_p4 = scmp.lt.s32.totalorder %s4463_s11, 31 }
 0x3b8   : > { %v5260_v62 = vpack.i.bf16 %v2966_v45, %v2963_v36  ;;  %v2834_v1 = vpop.f32.mrb[53].mxu0 }
 0x3b9   : > { %5256 = vrot.lane.b32.xlu1 %v5255_v54, %s5815_s28  ;;  %v4939_v50 = vpop.f32.mrb[54].mxu0  ;;  %s7830_s11 = smov (!%p822_p4, %s4463_s11), 31 }
 0x3ba   : > { %v5270_v37 = vpack.i.bf16 %v4939_v50, %v4938_v44  ;;  %5261 = vrot.lane.b32.xlu0 %v5260_v62, %s5815_s28  ;;  %v2837_v46 = vpop.f32.mrb[55].mxu0  ;;  %s4464_s14 = sshll.u32 %s7830_s11, 3 }
 0x3bb   : > { %v5265_v58 = vpack.i.bf16 %v2837_v46, %v2834_v1  ;;  %s7038_s24 = scalar_lea.vmem %s7804_s1, %s4464_s14  ;;  %s7805_s14 = sld [smem:[#allocation33_spill]] }
 0x3bd   : > { %5271 = vrot.lane.b32.xlu1 %v5270_v37, %s7803_s13 }
 0x3be   : > { %5266 = vrot.lane.b32.xlu0 %v5265_v58, %s7803_s13  ;;  %s7706_s13 = sand.u32 1, %s5779_s30  }
 0x3bf   : > { %v4970_v9 = vpop.f32.mrb[68].mxu1 }
 0x3c0   : > { %v2979_v61 = vpop.f32.mrb[69].mxu1 }
 0x3c1   : > { %v4971_v12 = vpop.f32.mrb[70].mxu1 }
 0x3c2   : > { %v5280_v16 = vpack.i.bf16 %v4971_v12, %v4970_v9  ;;  %v2982_v11 = vpop.f32.mrb[71].mxu1 }
 0x3c3   : > { %v5275_v22 = vpack.i.bf16 %v2982_v11, %v2979_v61 }
 0x3c4   : > { %5281 = vrot.lane.b32.xlu1 %v5280_v16, %s5815_s28 }
 0x3c5   : > { %5276 = vrot.lane.b32.xlu0 %v5275_v22, %s5815_s28  ;;  %s7809_s28 = sld [smem:[#allocation37_spill]] }
 0x3e3   : > { %v5167_v18 = vpop.permute.xlu1 %5166 }
 0x3e4   : > { %v5172_v30 = vpop.permute.xlu0 %5171  ;;  %v5169_v33 = vunpack.i.h.bf16 %v5167_v18  ;;  %v5168_v57 = vunpack.i.l.bf16 %v5167_v18 }
 0x3e5   : > { %v5174_v17 = vunpack.i.h.bf16 %v5172_v30  ;;  %v5173_v0 = vunpack.i.l.bf16 %v5172_v30 }
 0x3e6   : > { %v3189_v4 = vsel %vm970_vm0, %v6886_v23, %v5169_v33  ;;  %v3188_v32 = vsel %vm970_vm0, %v6882_v51, %v5168_v57 }
 0x3e7   : > { %v3187_v52 = vsel %vm970_vm0, %v6888_v25, %v5174_v17  ;;  %v3186_v42 = vsel %vm970_vm0, %v6884_v10, %v5173_v0 }
 0x3f3   : > { %v5177_v41 = vpop.permute.xlu1 %5176 }
 0x3f4   : > { %v5182_v5 = vpop.permute.xlu0 %5181  ;;  %v5179_v38 = vunpack.i.h.bf16 %v5177_v41  ;;  %v5178_v8 = vunpack.i.l.bf16 %v5177_v41 }
 0x3f5   : > { %v5184_v21 = vunpack.i.h.bf16 %v5182_v5  ;;  %v5183_v1 = vunpack.i.l.bf16 %v5182_v5 }
 0x3f6   : > { %v3193_v12 = vsel %vm970_vm0, %v6894_v26, %v5179_v38  ;;  %v3192_v16 = vsel %vm970_vm0, %v6890_v7, %v5178_v8 }
 0x3f7   : > { %v5187_v60 = vpop.permute.xlu1 %5186  ;;  %v3191_v11 = vsel %vm970_vm0, %v6896_v24, %v5184_v21  ;;  %v3190_v18 = vsel %vm970_vm0, %v6892_v55, %v5183_v1 }
 0x3f8   : > { %v5189_v29 = vunpack.i.h.bf16 %v5187_v60  ;;  %v5188_v39 = vunpack.i.l.bf16 %v5187_v60 }
 0x3fa   : > { %v3205_v35 = vsel %vm3202_vm2, %v3188_v32, %v5188_v39  ;;  %v3206_v6 = vsel %vm3202_vm2, %v3189_v4, %v5189_v29 }
 0x403   : > { %v6962_v14 = vpop.permute.xlu1 %5191 }
 0x404   : > { %v6964_v43 = vpop.permute.xlu0 %5201  ;;  %v5194_v41 = vunpack.i.h.bf16 %v6962_v14  ;;  %v5193_v55 = vunpack.i.l.bf16 %v6962_v14 }
 0x406   : > { %v3197_v14 = vsel %vm970_vm0, %v6902_v48, %v5194_v41  ;;  %v3196_v8 = vsel %vm970_vm0, %v6898_v15, %v5193_v55 }
 0x407   : > { %v5197_v19 = vpop.permute.xlu1 %5196 }
 0x408   : > { %v5212_v13 = vpop.permute.xlu0 %5211  ;;  %v5199_v2 = vunpack.i.h.bf16 %v5197_v19  ;;  %v5198_v53 = vunpack.i.l.bf16 %v5197_v19 }
 0x409   : > { %v5214_v9 = vunpack.i.h.bf16 %v5212_v13  ;;  %v5213_v61 = vunpack.i.l.bf16 %v5212_v13 }
 0x40a   : > { %v3204_v51 = vsel %vm3202_vm2, %v3187_v52, %v5199_v2  ;;  %v3203_v36 = vsel %vm3202_vm2, %v3186_v42, %v5198_v53  ;;  %v5204_v2 = vunpack.i.h.bf16 %v6964_v43  ;;  %v5203_v53 = vunpack.i.l.bf16 %v6964_v43 }
 0x40b   : > { %v5207_v34 = vpop.permute.xlu1 %5206  ;;  %v3208_v7 = vsel %vm3202_vm2, %v3191_v11, %v5214_v9  ;;  %v3207_v24 = vsel %vm3202_vm2, %v3190_v18, %v5213_v61 }
 0x40c   : > { %v5209_v46 = vunpack.i.h.bf16 %v5207_v34  ;;  %v5208_v58 = vunpack.i.l.bf16 %v5207_v34  ;;  %v3194_v43 = vsel %vm970_vm0, %v6900_v56, %v5203_v53  ;;  %v3413_v53 = vld [vmem:[%s7038_s24 + $0x8] sm:$0xff] }
 0x40e   : > { %v3209_v19 = vsel %vm3202_vm2, %v3192_v16, %v5208_v58  ;;  %v3210_v26 = vsel %vm3202_vm2, %v3193_v12, %v5209_v46 }
 0x41b   : > { %v5217_v27 = vpop.permute.xlu1 %5216 }
 0x41c   : > { %v5219_v20 = vunpack.i.h.bf16 %v5217_v27  ;;  %v5218_v28 = vunpack.i.l.bf16 %v5217_v27  ;;  %v5227_v31 = vpop.permute.xlu0 %5226 }
 0x41d   : > { %v5229_v23 = vunpack.i.h.bf16 %v5227_v31  ;;  %v5228_v49 = vunpack.i.l.bf16 %v5227_v31 }
 0x41e   : > { %v3222_v25 = vsel %vm3219_vm3, %v3205_v35, %v5218_v28  ;;  %v3223_v10 = vsel %vm3219_vm3, %v3206_v6, %v5219_v20  ;;  %v3195_v28 = vsel %vm970_vm0, %v6904_v59, %v5204_v2 }
 0x41f   : > { %v3237_v54 = vpack.c.bf16 %v3223_v10, %v3222_v25  ;;  %v5222_v44 = vpop.permute.xlu1 %5221  ;;  %v3220_v45 = vsel %vm3219_vm3, %v3203_v36, %v5228_v49  ;;  %v3221_v62 = vsel %vm3219_vm3, %v3204_v51, %v5229_v23 }
 0x420   : > { %v5232_v50 = vpop.permute.xlu0 %5231  ;;  %v3236_v37 = vpack.c.bf16 %v3221_v62, %v3220_v45  ;;  %v5224_v52 = vunpack.i.h.bf16 %v5222_v44  ;;  %v5223_v42 = vunpack.i.l.bf16 %v5222_v44 }
 0x421   : > { %v5234_v27 = vunpack.i.h.bf16 %v5232_v50  ;;  %v5233_v38 = vunpack.i.l.bf16 %v5232_v50 }
 0x422   : > { %4988 = vmatprep.mubr.bf16.mxu0 %v3236_v37  ;;  %v3213_v23 = vsel %vm3202_vm2, %v3196_v8, %v5223_v42  ;;  %v3214_v49 = vsel %vm3202_vm2, %v3197_v14, %v5224_v52  ;;  %v3414_v42 = vld [vmem:[%s7038_s24 + $0x10] sm:$0xff] }
 0x423   : > { %v5237_v22 = vpop.permute.xlu1 %5236  ;;  %4989 = vmatmul.mubr.bf16.vlgmr.msra.gmra.mrb[56].mxu0 %v3237_v54  ;;  %v3212_v36 = vsel %vm3202_vm2, %v3195_v28, %v5234_v27  ;;  %v3211_v15 = vsel %vm3202_vm2, %v3194_v43, %v5233_v38 }
 0x424   : > { %v5239_v60 = vunpack.i.h.bf16 %v5237_v22  ;;  %v5238_v30 = vunpack.i.l.bf16 %v5237_v22  ;;  %v5242_v5 = vpop.permute.xlu0 %5241 }
 0x425   : > { %v5244_v33 = vunpack.i.h.bf16 %v5242_v5  ;;  %v5243_v57 = vunpack.i.l.bf16 %v5242_v5 }
 0x426   : > { %v3226_v17 = vsel %vm3219_vm3, %v3209_v19, %v5238_v30  ;;  %v3227_v0 = vsel %vm3219_vm3, %v3210_v26, %v5239_v60 }
 0x427   : > { %v5252_v34 = vpop.permute.xlu1 %5251  ;;  %v3224_v13 = vsel %vm3219_vm3, %v3207_v24, %v5243_v57  ;;  %v3225_v29 = vsel %vm3219_vm3, %v3208_v7, %v5244_v33  ;;  %v3239_v39 = vpack.c.bf16 %v3227_v0, %v3226_v17  ;;  %v7043_v0 = vld [vmem:[%s7651_s5] ss:$0 sm:$0xff] }
 0x428   : > { %v5247_v4 = vpop.permute.xlu0 %5246  ;;  %v3238_v32 = vpack.c.bf16 %v3225_v29, %v3224_v13  ;;  %v5254_v45 = vunpack.i.h.bf16 %v5252_v34  ;;  %v5253_v62 = vunpack.i.l.bf16 %v5252_v34  ;;  %v3412_v13 = vld [vmem:[%s7038_s24] sm:$0xff] }
 0x429   : > { %v5249_v50 = vunpack.i.h.bf16 %v5247_v4  ;;  %v5248_v37 = vunpack.i.l.bf16 %v5247_v4 }
 0x42a   : > { %4992 = vmatprep.mubr.bf16.mxu0 %v3238_v32  ;;  %v3201_v12 = vsel %vm970_vm0, %v6910_v63, %v5254_v45  ;;  %v3200_v16 = vsel %vm970_vm0, %v6906_v40, %v5253_v62  ;;  %v3421_v62 = vld [vmem:[%s7038_s24 + $0x48] sm:$0xff] }
 0x42b   : > { %v5257_v20 = vpop.permute.xlu1 %5256  ;;  %4993 = vmatmul.mubr.bf16.gmra.mrb[60].mxu0 %v3239_v39  ;;  %v3199_v22 = vsel %vm970_vm0, %v6912_v47, %v5249_v50  ;;  %v3198_v18 = vsel %vm970_vm0, %v6908_v3, %v5248_v37 }
 0x42c   : > { %v5259_v31 = vunpack.i.h.bf16 %v5257_v20  ;;  %v5258_v35 = vunpack.i.l.bf16 %v5257_v20  ;;  %v5262_v6 = vpop.permute.xlu0 %5261  ;;  %v3415_v20 = vld [vmem:[%s7038_s24 + $0x18] sm:$0xff] }
 0x42d   : > { %v5264_v51 = vunpack.i.h.bf16 %v5262_v6  ;;  %v5263_v48 = vunpack.i.l.bf16 %v5262_v6 }
 0x42e   : > { %v3230_v25 = vsel %vm3219_vm3, %v3213_v23, %v5258_v35  ;;  %v3231_v59 = vsel %vm3219_vm3, %v3214_v49, %v5259_v31  ;;  %v3417_v35 = vld [vmem:[%s7038_s24 + $0x28] sm:$0xff] }
 0x42f   : > { %v3228_v10 = vsel %vm3219_vm3, %v3211_v15, %v5263_v48  ;;  %v3229_v56 = vsel %vm3219_vm3, %v3212_v36, %v5264_v51  ;;  %v3241_v21 = vpack.c.bf16 %v3231_v59, %v3230_v25  ;;  %v5272_v44 = vpop.permute.xlu1 %5271  ;;  %v3416_v51 = vld [vmem:[%s7038_s24 + $0x20] sm:$0xff]  ;;  %v3419_v15 = vld [vmem:[%s7038_s24 + $0x38] sm:$0xff] }
 0x430   : > { %v3240_v54 = vpack.c.bf16 %v3229_v56, %v3228_v10  ;;  %v5267_v1 = vpop.permute.xlu0 %5266  ;;  %v5274_v46 = vunpack.i.h.bf16 %v5272_v44  ;;  %v5273_v58 = vunpack.i.l.bf16 %v5272_v44  ;;  %v3418_v56 = vld [vmem:[%s7038_s24 + $0x30] sm:$0xff] }
 0x431   : > { %v5269_v9 = vunpack.i.h.bf16 %v5267_v1  ;;  %v5268_v61 = vunpack.i.l.bf16 %v5267_v1 }
 0x432   : > { %4996 = vmatprep.mubr.bf16.mxu0 %v3240_v54  ;;  %v3217_v5 = vsel %vm3202_vm2, %v3200_v16, %v5273_v58  ;;  %v3218_v19 = vsel %vm3202_vm2, %v3201_v12, %v5274_v46  ;;  %v3420_v46 = vld [vmem:[%s7038_s24 + $0x40] sm:$0xff] }
 0x433   : > { %4997 = vmatmul.mubr.bf16.gmra.mrb[64].mxu0 %v3241_v21  ;;  %v3216_v33 = vsel %vm3202_vm2, %v3199_v22, %v5269_v9  ;;  %v3215_v40 = vsel %vm3202_vm2, %v3198_v18, %v5268_v61  ;;  %v3423_v61 = vld [vmem:[%s7038_s24 + $0x58] sm:$0xff] }
 0x436   : > { %v5282_v11 = vpop.permute.xlu1 %5281 }
 0x437   : > { %v5284_v41 = vunpack.i.h.bf16 %v5282_v11  ;;  %v5283_v60 = vunpack.i.l.bf16 %v5282_v11  ;;  %v5277_v30 = vpop.permute.xlu0 %5276  ;;  %v3422_v11 = vld [vmem:[%s7038_s24 + $0x50] sm:$0xff] }
 0x438   : > { %v5279_v26 = vunpack.i.h.bf16 %v5277_v30  ;;  %v5278_v63 = vunpack.i.l.bf16 %v5277_v30  ;;  %v3424_v30 = vld [vmem:[%s7038_s24 + $0x60] sm:$0xff] }
 0x439   : > { %v3234_v57 = vsel %vm3219_vm3, %v3217_v5, %v5283_v60  ;;  %v3235_v47 = vsel %vm3219_vm3, %v3218_v19, %v5284_v41 }
 0x43a   : > { %v3232_v3 = vsel %vm3219_vm3, %v3215_v40, %v5278_v63  ;;  %v3233_v7 = vsel %vm3219_vm3, %v3216_v33, %v5279_v26  ;;  %v3243_v24 = vpack.c.bf16 %v3235_v47, %v3234_v57  ;;  %v3425_v63 = vld [vmem:[%s7038_s24 + $0x68] sm:$0xff]  ;;  %v3426_v47 = vld [vmem:[%s7038_s24 + $0x70] sm:$0xff] }
 0x43b   : > { %v3242_v17 = vpack.c.bf16 %v3233_v7, %v3232_v3 }
 0x43d   : > { %5000 = vmatprep.mubr.bf16.mxu0 %v3242_v17 }
 0x43e   : > { %5001 = vmatmul.mubr.bf16.gmra.mrb[68].mxu0 %v3243_v24  ;;  %v3427_v24 = vld [vmem:[%s7038_s24 + $0x78] sm:$0xff]  ;;  %s7806_s24 = sld [smem:[#allocation34_spill]] }
 0x4f6   : > { %v4990_v55 = vpop.f32.mrb[56].mxu0 }
 0x4f7   : > { %v3349_v34 = vpop.f32.mrb[57].mxu0  ;;  %v3358_v4 = vadd.f32 %v4990_v55, %v7043_v0 }
 0x4f8   : > { %v3350_v29 = vadd.f32 %v7043_v0, %v3349_v34  ;;  %v4991_v39 = vpop.f32.mrb[58].mxu0  ;;  %v5365_v34 = vld [vmem:[%s7654_s8] sm:$0xff]  }
 0x4f9   : > { %v3352_v2 = vpop.f32.mrb[59].mxu0  ;;  %v7056_v38 = vadd.f32 %v3414_v42, %v3358_v4  ;;  %v3361_v14 = vadd.f32 %v4991_v39, %v7043_v0  ;;  %5004 = vmatprep.subr.bf16.mxu1 %v5365_v34 }
 0x4fa   : > { %v7049_v32 = vadd.f32 %v3412_v13, %v3350_v29  ;;  %v3353_v52 = vadd.f32 %v7043_v0, %v3352_v2  ;;  %5005 = vmatpush3.bf16.msra.mxu1 %v5365_v34 }
 0x4fb   : > { %v7063_v6 = vadd.f32 %v3415_v20, %v3361_v14 }
 0x4fc   : > { %v7053_v27 = vadd.f32 %v3413_v53, %v3353_v52  ;;  %3444 = vadd.xlane.f32.xlu0 %v7049_v32 }
 0x4fe   : > { %v4994_v8 = vpop.f32.mrb[60].mxu0  ;;  %3446 = vadd.xlane.f32.xlu1 %v7053_v27 }
 0x4ff   : > { %v3365_v28 = vpop.f32.mrb[61].mxu0  ;;  %v3374_v25 = vadd.f32 %v4994_v8, %v7043_v0 }
 0x500   : > { %v4995_v43 = vpop.f32.mrb[62].mxu0  ;;  %3448 = vadd.xlane.f32.xlu0 %v7056_v38  ;;  %v3366_v23 = vadd.f32 %v7043_v0, %v3365_v28 }
 0x501   : > { %v3368_v31 = vpop.f32.mrb[63].mxu0  ;;  %v3377_v48 = vadd.f32 %v4995_v43, %v7043_v0  ;;  %v7082_v1 = vadd.f32 %v3418_v56, %v3374_v25 }
 0x502   : > { %v3369_v49 = vadd.f32 %v7043_v0, %v3368_v31  ;;  %v7074_v59 = vadd.f32 %v3416_v51, %v3366_v23 }
 0x503   : > { %v7078_v54 = vadd.f32 %v3419_v15, %v3377_v48 }
 0x504   : > { %v7069_v36 = vadd.f32 %v3417_v35, %v3369_v49  ;;  %3450 = vadd.xlane.f32.xlu0 %v7063_v6 }
 0x506   : > { %v4998_v10 = vpop.f32.mrb[64].mxu0  ;;  %3454 = vadd.xlane.f32.xlu1 %v7069_v36 }
 0x507   : > { %v3381_v21 = vpop.f32.mrb[65].mxu0  ;;  %v3390_v12 = vadd.f32 %v4998_v10, %v7043_v0 }
 0x508   : > { %v4999_v44 = vpop.f32.mrb[66].mxu0  ;;  %3452 = vadd.xlane.f32.xlu0 %v7074_v59  ;;  %v3382_v50 = vadd.f32 %v7043_v0, %v3381_v21 }
 0x509   : > { %v3384_v45 = vpop.f32.mrb[67].mxu0  ;;  %v3393_v58 = vadd.f32 %v4999_v44, %v7043_v0  ;;  %v7101_v41 = vadd.f32 %v3422_v11, %v3390_v12 }
 0x50a   : > { %v3385_v37 = vadd.f32 %v7043_v0, %v3384_v45  ;;  %3458 = vadd.xlane.f32.xlu1 %v7078_v54  ;;  %v7094_v16 = vadd.f32 %v3420_v46, %v3382_v50 }
 0x50b   : > { %v7098_v22 = vadd.f32 %v3423_v61, %v3393_v58  ;;  %v5366_v61 = vld [vmem:[%s7654_s8 + $0x8] sm:$0xff]  }
 0x50c   : > { %v7089_v9 = vadd.f32 %v3421_v62, %v3385_v37  ;;  %3456 = vadd.xlane.f32.xlu0 %v7082_v1  ;;  %5006 = vmatprep.subr.bf16.mxu1 %v5366_v61 }
 0x50d   : > { %5007 = vmatpush3.bf16.msra.mxu1 %v5366_v61  ;;  %v7250_v61 = vld [vmem:[%s7805_s14] ss:$0 sm:$0xff] }
 0x50e   : > { %3462 = vadd.xlane.f32.xlu1 %v7089_v9 }
 0x510   : > { %3460 = vadd.xlane.f32.xlu0 %v7094_v16 }
 0x511   : > { %v5002_v18 = vpop.f32.mrb[68].mxu0 }
 0x512   : > { %v3397_v60 = vpop.f32.mrb[69].mxu0  ;;  %3466 = vadd.xlane.f32.xlu1 %v7098_v22  ;;  %v3406_v57 = vadd.f32 %v5002_v18, %v7043_v0 }
 0x513   : > { %v3398_v5 = vadd.f32 %v7043_v0, %v3397_v60  ;;  %v5003_v19 = vpop.f32.mrb[70].mxu0 }
 0x514   : > { %v3400_v26 = vpop.f32.mrb[71].mxu0  ;;  %3464 = vadd.xlane.f32.xlu0 %v7101_v41  ;;  %v3409_v3 = vadd.f32 %v5003_v19, %v7043_v0  ;;  %v7119_v17 = vadd.f32 %v3426_v47, %v3406_v57  ;;  %v5368_v57 = vld [vmem:[%s7654_s8 + $0x18] sm:$0xff]  }
 0x515   : > { %v7108_v33 = vadd.f32 %v3424_v30, %v3398_v5  ;;  %v3401_v40 = vadd.f32 %v7043_v0, %v3400_v26  ;;  %v5367_v30 = vld [vmem:[%s7654_s8 + $0x10] sm:$0xff]  }
 0x516   : > { %v7121_v55 = vadd.f32 %v3427_v24, %v3409_v3  ;;  %5008 = vmatprep.subr.bf16.mxu1 %v5367_v30 }
 0x517   : > { %v7114_v7 = vadd.f32 %v3425_v63, %v3401_v40  ;;  %5009 = vmatpush3.bf16.msra.mxu1 %v5367_v30 }
 0x518   : > { %3468 = vadd.xlane.f32.xlu0 %v7108_v33  ;;  %5010 = vmatprep.subr.bf16.mxu1 %v5368_v57 }
 0x519   : > { %3470 = vadd.xlane.f32.xlu1 %v7114_v7 }
 0x51b   : > { %5011 = vmatpush3.bf16.msra.mxu1 %v5368_v57 }
 0x51c   : > { %3472 = vadd.xlane.f32.xlu0 %v7119_v17 }
 0x51d   : > { %3474 = vadd.xlane.f32.xlu1 %v7121_v55 }
 0x589   : > { %v3445_v0 = vpop.xlane.xlu0 %3444 }
 0x58a   : > { %v3477_v13 = vmul.f32 0.0078125, %v3445_v0 }
 0x58b   : > { %v3447_v29 = vpop.xlane.xlu1 %3446 }
 0x58c   : > { %v7129_v39 = vsub.f32 %v7049_v32, %v3477_v13  ;;  %v3478_v2 = vmul.f32 0.0078125, %v3447_v29 }
 0x58d   : > { %v3449_v53 = vpop.xlane.xlu0 %3448 }
 0x58e   : > { %v7132_v4 = vsub.f32 %v7053_v27, %v3478_v2  ;;  %v3479_v52 = vmul.f32 0.0078125, %v3449_v53  ;;  %v3509_v42 = vmul.f32 %v7129_v39, %v7129_v39 }
 0x590   : > { %v7137_v14 = vsub.f32 %v7056_v38, %v3479_v52  ;;  %3525 = vadd.xlane.f32.xlu0 %v3509_v42  ;;  %v3510_v8 = vmul.f32 %v7132_v4, %v7132_v4  ;;  %v5372_v42 = vld [vmem:[%s7654_s8 + $0x38] sm:$0xff]  }
 0x591   : > { %v3451_v20 = vpop.xlane.xlu0 %3450 }
 0x592   : > { %v3480_v28 = vmul.f32 0.0078125, %v3451_v20  ;;  %3527 = vadd.xlane.f32.xlu1 %v3510_v8  ;;  %v3511_v32 = vmul.f32 %v7137_v14, %v7137_v14  ;;  %v5373_v8 = vld [vmem:[%s7656_s10] sm:$0xff]   ;;  %v5374_v20 = vld [vmem:[%s7656_s10 + $0x8] sm:$0xff]  }
 0x593   : > { %v3455_v43 = vpop.xlane.xlu1 %3454  ;;  %5036 = vmatprep.subr.bf16.mxu0 %v5373_v8 }
 0x594   : > { %v7144_v27 = vsub.f32 %v7063_v6, %v3480_v28  ;;  %v3482_v31 = vmul.f32 0.0078125, %v3455_v43  ;;  %3529 = vadd.xlane.f32.xlu0 %v3511_v32  ;;  %5037 = vmatpush3.bf16.msra.mxu0 %v5373_v8  ;;  %v5375_v28 = vld [vmem:[%s7656_s10 + $0x10] sm:$0xff]   ;;  %v5376_v32 = vld [vmem:[%s7656_s10 + $0x18] sm:$0xff]   ;;  %v5377_v43 = vld [vmem:[%s7656_s10 + $0x20] sm:$0xff]  }
 0x595   : > { %v3453_v35 = vpop.xlane.xlu0 %3452  ;;  %5038 = vmatprep.subr.bf16.mxu0 %v5374_v20 }
 0x596   : > { %v7147_v38 = vsub.f32 %v7069_v36, %v3482_v31  ;;  %v3481_v23 = vmul.f32 0.0078125, %v3453_v35  ;;  %v3512_v49 = vmul.f32 %v7144_v27, %v7144_v27  ;;  %v5378_v31 = vld [vmem:[%s7656_s10 + $0x28] sm:$0xff]  }
 0x597   : > { %v3459_v51 = vpop.xlane.xlu1 %3458 }
 0x598   : > { %v7152_v48 = vsub.f32 %v7074_v59, %v3481_v23  ;;  %v3484_v15 = vmul.f32 0.0078125, %v3459_v51  ;;  %3531 = vadd.xlane.f32.xlu1 %v3512_v49  ;;  %v3514_v56 = vmul.f32 %v7147_v38, %v7147_v38  ;;  %5039 = vmatpush3.bf16.msra.mxu0 %v5374_v20 }
 0x599   : > { %v3457_v25 = vpop.xlane.xlu0 %3456  ;;  %5040 = vmatprep.subr.bf16.mxu0 %v5375_v28 }
 0x59a   : > { %v7155_v6 = vsub.f32 %v7078_v54, %v3484_v15  ;;  %v3483_v10 = vmul.f32 0.0078125, %v3457_v25  ;;  %v3513_v36 = vmul.f32 %v7152_v48, %v7152_v48 }
 0x59b   : > { %v3463_v21 = vpop.xlane.xlu1 %3462 }
 0x59c   : > { %v7162_v44 = vsub.f32 %v7082_v1, %v3483_v10  ;;  %v3486_v45 = vmul.f32 0.0078125, %v3463_v21  ;;  %3535 = vadd.xlane.f32.xlu1 %v3514_v56  ;;  %3533 = vadd.xlane.f32.xlu0 %v3513_v36  ;;  %v3516_v50 = vmul.f32 %v7155_v6, %v7155_v6 }
 0x59d   : > { %v3461_v59 = vpop.xlane.xlu0 %3460  ;;  %5041 = vmatpush3.bf16.msra.mxu0 %v5375_v28 }
 0x59e   : > { %v7165_v62 = vsub.f32 %v7089_v9, %v3486_v45  ;;  %v3485_v54 = vmul.f32 0.0078125, %v3461_v59  ;;  %v3515_v37 = vmul.f32 %v7162_v44, %v7162_v44  ;;  %5042 = vmatprep.subr.bf16.mxu0 %v5376_v32 }
 0x59f   : > { %v3467_v46 = vpop.xlane.xlu1 %3466 }
 0x5a0   : > { %v7172_v58 = vsub.f32 %v7094_v16, %v3485_v54  ;;  %v3488_v1 = vmul.f32 0.0078125, %v3467_v46  ;;  %3539 = vadd.xlane.f32.xlu1 %v3516_v50  ;;  %3537 = vadd.xlane.f32.xlu0 %v3515_v37  ;;  %v3518_v18 = vmul.f32 %v7165_v62, %v7165_v62 }
 0x5a1   : > { %v3465_v9 = vpop.xlane.xlu0 %3464  ;;  %5043 = vmatpush3.bf16.msra.mxu0 %v5376_v32 }
 0x5a2   : > { %v7178_v12 = vsub.f32 %v7098_v22, %v3488_v1  ;;  %v3487_v11 = vmul.f32 0.0078125, %v3465_v9  ;;  %v3517_v60 = vmul.f32 %v7172_v58, %v7172_v58  ;;  %5044 = vmatprep.subr.bf16.mxu0 %v5377_v43 }
 0x5a4   : > { %v7185_v16 = vsub.f32 %v7101_v41, %v3487_v11  ;;  %3543 = vadd.xlane.f32.xlu1 %v3518_v18  ;;  %3541 = vadd.xlane.f32.xlu0 %v3517_v60  ;;  %v3520_v26 = vmul.f32 %v7178_v12, %v7178_v12 }
 0x5a5   : > { %v3469_v22 = vpop.xlane.xlu0 %3468  ;;  %5045 = vmatpush3.bf16.msra.mxu0 %v5377_v43 }
 0x5a6   : > { %v3489_v5 = vmul.f32 0.0078125, %v3469_v22  ;;  %v3471_v19 = vpop.xlane.xlu1 %3470  ;;  %v3519_v63 = vmul.f32 %v7185_v16, %v7185_v16  ;;  %5046 = vmatprep.subr.bf16.mxu0 %v5378_v31 }
 0x5a7   : > { %v3490_v40 = vmul.f32 0.0078125, %v3471_v19 }
 0x5a8   : > { %v7195_v41 = vsub.f32 %v7108_v33, %v3489_v5  ;;  %3547 = vadd.xlane.f32.xlu1 %v3520_v26  ;;  %3545 = vadd.xlane.f32.xlu0 %v3519_v63 }
 0x5a9   : > { %v7201_v47 = vsub.f32 %v7114_v7, %v3490_v40  ;;  %v3473_v3 = vpop.xlane.xlu0 %3472  ;;  %v5369_v7 = vld [vmem:[%s7654_s8 + $0x20] sm:$0xff]   ;;  %5047 = vmatpush3.bf16.msra.mxu0 %v5378_v31 }
 0x5aa   : > { %v3491_v24 = vmul.f32 0.0078125, %v3473_v3  ;;  %v3475_v34 = vpop.xlane.xlu1 %3474  ;;  %v3521_v0 = vmul.f32 %v7195_v41, %v7195_v41  ;;  %5012 = vmatprep.subr.bf16.mxu1 %v5369_v7 }
 0x5ab   : > { %v3492_v13 = vmul.f32 0.0078125, %v3475_v34  ;;  %v3522_v33 = vmul.f32 %v7201_v47, %v7201_v47  ;;  %5013 = vmatpush3.bf16.msra.mxu1 %v5369_v7 }
 0x5ac   : > { %v7208_v29 = vsub.f32 %v7119_v17, %v3491_v24  ;;  %3549 = vadd.xlane.f32.xlu0 %v3521_v0  ;;  %v5370_v17 = vld [vmem:[%s7654_s8 + $0x28] sm:$0xff]   ;;  %v7258_v24 = vld [vmem:[%s7806_s24] ss:$0 sm:$0xff]  ;;  %s4462_s24 = sshll.u32 %s7706_s13, 7 }
 0x5ad   : > { %v7214_v2 = vsub.f32 %v7121_v55, %v3492_v13  ;;  %3551 = vadd.xlane.f32.xlu1 %v3522_v33  ;;  %5014 = vmatprep.subr.bf16.mxu1 %v5370_v17  ;;  %v5371_v55 = vld [vmem:[%s7654_s8 + $0x30] sm:$0xff]  }
 0x5ae   : > { %v3523_v53 = vmul.f32 %v7208_v29, %v7208_v29 }
 0x5af   : > { %v3524_v52 = vmul.f32 %v7214_v2, %v7214_v2  ;;  %5015 = vmatpush3.bf16.msra.mxu1 %v5370_v17 }
 0x5b0   : > { %3553 = vadd.xlane.f32.xlu0 %v3523_v53  ;;  %5016 = vmatprep.subr.bf16.mxu1 %v5371_v55 }
 0x5b1   : > { %3555 = vadd.xlane.f32.xlu1 %v3524_v52 }
 0x5b3   : > { %5017 = vmatpush3.bf16.msra.mxu1 %v5371_v55 }
 0x5b4   : > { %5018 = vmatprep.subr.bf16.mxu1 %v5372_v42 }
 0x5b7   : > { %5019 = vmatpush3.bf16.msra.mxu1 %v5372_v42 }
 0x61d   : > { %v3526_v35 = vpop.xlane.xlu0 %3525 }
 0x61e   : > { %v3557_v23 = vmul.f32 0.0078125, %v3526_v35 }
 0x61f   : > { %v3528_v49 = vpop.xlane.xlu1 %3527 }
 0x620   : > { %v3573_v51 = vadd.f32 1e-05, %v3557_v23  ;;  %v3558_v15 = vmul.f32 0.0078125, %v3528_v49 }
 0x621   : > { %v3530_v25 = vpop.xlane.xlu0 %3529 }
 0x622   : > { %5637 = vrsqrt.f32 %v3573_v51  ;;  %v3574_v10 = vadd.f32 1e-05, %v3558_v15  ;;  %v3559_v56 = vmul.f32 0.0078125, %v3530_v25 }
 0x624   : > { %5639 = vrsqrt.f32 %v3574_v10  ;;  %v3575_v36 = vadd.f32 1e-05, %v3559_v56 }
 0x625   : > { %v3532_v21 = vpop.xlane.xlu1 %3531 }
 0x626   : > { %5641 = vrsqrt.f32 %v3575_v36  ;;  %v3560_v45 = vmul.f32 0.0078125, %v3532_v21 }
 0x628   : > { %v3576_v59 = vadd.f32 1e-05, %v3560_v45 }
 0x629   : > { %v3536_v54 = vpop.xlane.xlu1 %3535  ;;  %v3534_v50 = vpop.xlane.xlu0 %3533 }
 0x62a   : > { %5643 = vrsqrt.f32 %v3576_v59  ;;  %v3562_v37 = vmul.f32 0.0078125, %v3536_v54  ;;  %v3561_v46 = vmul.f32 0.0078125, %v3534_v50 }
 0x62c   : > { %v5638_v1 = vpop.eup %5637  ;;  %v3578_v9 = vadd.f32 1e-05, %v3562_v37  ;;  %v3577_v11 = vadd.f32 1e-05, %v3561_v46 }
 0x62d   : > { %v3540_v18 = vpop.xlane.xlu1 %3539  ;;  %v3538_v60 = vpop.xlane.xlu0 %3537  ;;  %v3605_v30 = vmul.f32 %v5638_v1, %v7129_v39 }
 0x62e   : > { %v5640_v22 = vpop.eup %5639  ;;  %5645 = vrsqrt.f32 %v3578_v9  ;;  %v3564_v5 = vmul.f32 0.0078125, %v3540_v18  ;;  %v3563_v19 = vmul.f32 0.0078125, %v3538_v60 }
 0x62f   : > { %5647 = vrsqrt.f32 %v3577_v11  ;;  %v3606_v26 = vmul.f32 %v5640_v22, %v7132_v4  ;;  %v3628_v63 = vmul.f32 %v7250_v61, %v3605_v30 }
 0x630   : > { %v5642_v40 = vpop.eup %5641  ;;  %v3580_v57 = vadd.f32 1e-05, %v3564_v5  ;;  %v3579_v3 = vadd.f32 1e-05, %v3563_v19 }
 0x631   : > { %v3607_v34 = vmul.f32 %v5642_v40, %v7137_v14  ;;  %v3544_v39 = vpop.xlane.xlu1 %3543  ;;  %v3542_v0 = vpop.xlane.xlu0 %3541  ;;  %v3629_v13 = vmul.f32 %v7250_v61, %v3606_v26  ;;  %v7263_v4 = vadd.f32 %v7258_v24, %v3628_v63 }
 0x632   : > { %5649 = vrsqrt.f32 %v3580_v57  ;;  %v3566_v33 = vmul.f32 0.0078125, %v3544_v39  ;;  %v3565_v7 = vmul.f32 0.0078125, %v3542_v0 }
 0x633   : > { %5651 = vrsqrt.f32 %v3579_v3  ;;  %v7266_v53 = vadd.f32 %v7258_v24, %v3629_v13  ;;  %v3630_v42 = vmul.f32 %v7250_v61, %v3607_v34 }
 0x634   : > { %v5644_v52 = vpop.eup %5643  ;;  %v3582_v17 = vadd.f32 1e-05, %v3566_v33  ;;  %v3581_v55 = vadd.f32 1e-05, %v3565_v7 }
 0x635   : > { %v3608_v14 = vmul.f32 %v5644_v52, %v7144_v27  ;;  %v3548_v8 = vpop.xlane.xlu1 %3547  ;;  %v3546_v20 = vpop.xlane.xlu0 %3545  ;;  %v3667_v28 = vpack.c.bf16 %v7266_v53, %v7263_v4  ;;  %v7274_v25 = vadd.f32 %v7258_v24, %v3630_v42 }
 0x636   : > { %5653 = vrsqrt.f32 %v3582_v17  ;;  %v3568_v32 = vmul.f32 0.0078125, %v3548_v8  ;;  %v3567_v43 = vmul.f32 0.0078125, %v3546_v20 }
 0x637   : > { %v3631_v31 = vmul.f32 %v7250_v61, %v3608_v14  ;;  %5655 = vrsqrt.f32 %v3581_v55  ;;  %5020 = vmatprep.mubr.bf16.mxu1 %v3667_v28 }
 0x638   : > { %v5646_v35 = vpop.eup %5645  ;;  %v3584_v23 = vadd.f32 1e-05, %v3568_v32  ;;  %v3583_v49 = vadd.f32 1e-05, %v3567_v43 }
 0x639   : > { %v5648_v51 = vpop.eup %5647  ;;  %v3550_v15 = vpop.xlane.xlu0 %3549  ;;  %v7277_v27 = vadd.f32 %v7258_v24, %v3631_v31  ;;  %v3610_v10 = vmul.f32 %v5646_v35, %v7147_v38 }
 0x63a   : > { %5657 = vrsqrt.f32 %v3584_v23  ;;  %v3569_v56 = vmul.f32 0.0078125, %v3550_v15  ;;  %v3552_v36 = vpop.xlane.xlu1 %3551  ;;  %v3609_v21 = vmul.f32 %v5648_v51, %v7152_v48 }
 0x63b   : > { %5659 = vrsqrt.f32 %v3583_v49  ;;  %v3570_v45 = vmul.f32 0.0078125, %v3552_v36  ;;  %v3668_v59 = vpack.c.bf16 %v7277_v27, %v7274_v25  ;;  %v3633_v54 = vmul.f32 %v7250_v61, %v3610_v10 }
 0x63c   : > { %v5650_v50 = vpop.eup %5649  ;;  %v3585_v37 = vadd.f32 1e-05, %v3569_v56  ;;  %v3632_v46 = vmul.f32 %v7250_v61, %v3609_v21 }
 0x63d   : > { %v5652_v1 = vpop.eup %5651  ;;  %v3586_v9 = vadd.f32 1e-05, %v3570_v45  ;;  %5021 = vmatmul.mubr.bf16.vlgmr.msra.gmra.mrb[72].mxu1 %v3668_v59  ;;  %v3554_v38 = vpop.xlane.xlu0 %3553  ;;  %v7286_v11 = vadd.f32 %v7258_v24, %v3633_v54  ;;  %v3612_v48 = vmul.f32 %v5650_v50, %v7155_v6 }
 0x63e   : > { %5661 = vrsqrt.f32 %v3585_v37  ;;  %v3571_v18 = vmul.f32 0.0078125, %v3554_v38  ;;  %v3556_v60 = vpop.xlane.xlu1 %3555  ;;  %v7290_v30 = vadd.f32 %v7258_v24, %v3632_v46  ;;  %v3611_v22 = vmul.f32 %v5652_v1, %v7162_v44 }
 0x63f   : > { %5663 = vrsqrt.f32 %v3586_v9  ;;  %v3572_v5 = vmul.f32 0.0078125, %v3556_v60  ;;  %v3635_v19 = vmul.f32 %v7250_v61, %v3612_v48 }
 0x640   : > { %v5654_v26 = vpop.eup %5653  ;;  %v3587_v63 = vadd.f32 1e-05, %v3571_v18  ;;  %v3669_v40 = vpack.c.bf16 %v7286_v11, %v7290_v30  ;;  %v3634_v57 = vmul.f32 %v7250_v61, %v3611_v22 }
 0x641   : > { %v5656_v6 = vpop.eup %5655  ;;  %v3588_v3 = vadd.f32 1e-05, %v3572_v5  ;;  %v7298_v34 = vadd.f32 %v7258_v24, %v3635_v19  ;;  %v3614_v39 = vmul.f32 %v5654_v26, %v7165_v62 }
 0x642   : > { %5665 = vrsqrt.f32 %v3587_v63  ;;  %5024 = vmatprep.mubr.bf16.mxu1 %v3669_v40  ;;  %v7302_v44 = vadd.f32 %v7258_v24, %v3634_v57  ;;  %v3613_v0 = vmul.f32 %v5656_v6, %v7172_v58 }
 0x643   : > { %5667 = vrsqrt.f32 %v3588_v3  ;;  %v3637_v13 = vmul.f32 %v7250_v61, %v3614_v39 }
 0x644   : > { %v5658_v33 = vpop.eup %5657  ;;  %v3670_v7 = vpack.c.bf16 %v7298_v34, %v7302_v44  ;;  %v3636_v52 = vmul.f32 %v7250_v61, %v3613_v0 }
 0x645   : > { %v5660_v17 = vpop.eup %5659  ;;  %v7310_v55 = vadd.f32 %v7258_v24, %v3637_v13  ;;  %v3616_v62 = vmul.f32 %v5658_v33, %v7178_v12 }
 0x646   : > { %5025 = vmatmul.mubr.bf16.gmra.mrb[76].mxu1 %v3670_v7  ;;  %v7314_v42 = vadd.f32 %v7258_v24, %v3636_v52  ;;  %v3615_v58 = vmul.f32 %v5660_v17, %v7185_v16 }
 0x647   : > { %v3639_v14 = vmul.f32 %v7250_v61, %v3616_v62 }
 0x648   : > { %v5662_v8 = vpop.eup %5661  ;;  %v3671_v20 = vpack.c.bf16 %v7310_v55, %v7314_v42  ;;  %v3638_v28 = vmul.f32 %v7250_v61, %v3615_v58 }
 0x649   : > { %v5664_v32 = vpop.eup %5663  ;;  %v7322_v43 = vadd.f32 %v7258_v24, %v3639_v14  ;;  %v3617_v12 = vmul.f32 %v5662_v8, %v7195_v41 }
 0x64a   : > { %5028 = vmatprep.mubr.bf16.mxu1 %v3671_v20  ;;  %v7326_v31 = vadd.f32 %v7258_v24, %v3638_v28  ;;  %v3618_v16 = vmul.f32 %v5664_v32, %v7201_v47 }
 0x64b   : > { %v3640_v35 = vmul.f32 %v7250_v61, %v3617_v12 }
 0x64c   : > { %v5666_v23 = vpop.eup %5665  ;;  %v3672_v49 = vpack.c.bf16 %v7322_v43, %v7326_v31  ;;  %v3641_v51 = vmul.f32 %v7250_v61, %v3618_v16 }
 0x64d   : > { %v5668_v15 = vpop.eup %5667  ;;  %v7334_v10 = vadd.f32 %v7258_v24, %v3640_v35  ;;  %v3619_v41 = vmul.f32 %v5666_v23, %v7208_v29 }
 0x64e   : > { %5029 = vmatmul.mubr.bf16.gmra.mrb[80].mxu1 %v3672_v49  ;;  %v7338_v56 = vadd.f32 %v7258_v24, %v3641_v51  ;;  %v3620_v47 = vmul.f32 %v5668_v15, %v7214_v2  ;;  %v5379_v2 = vld [vmem:[%s7656_s10 + $0x30] sm:$0xff]  }
 0x64f   : > { %v3642_v36 = vmul.f32 %v7250_v61, %v3619_v41  ;;  %5048 = vmatprep.subr.bf16.mxu0 %v5379_v2 }
 0x650   : > { %v3673_v21 = vpack.c.bf16 %v7338_v56, %v7334_v10  ;;  %v3643_v45 = vmul.f32 %v7250_v61, %v3620_v47  ;;  %5049 = vmatpush3.bf16.msra.mxu0 %v5379_v2  ;;  %v5380_v61 = vld [vmem:[%s7656_s10 + $0x38] sm:$0xff]  }
 0x651   : > { %v7346_v59 = vadd.f32 %v7258_v24, %v3642_v36  ;;  %5050 = vmatprep.subr.bf16.mxu0 %v5380_v61 }
 0x652   : > { %5032 = vmatprep.mubr.bf16.mxu1 %v3673_v21  ;;  %v7349_v54 = vadd.f32 %v7258_v24, %v3643_v45  ;;  %v4584_v24 = vld [vmem:[%s7807_s16] ss:$0 sm:$0xff]  ;;  %s7810_s16 = sld [smem:[#allocation38_spill]] }
 0x654   : > { %v3674_v29 = vpack.c.bf16 %v7349_v54, %v7346_v59  ;;  %5051 = vmatpush3.bf16.msra.mxu0 %v5380_v61 }
 0x656   : > { %5033 = vmatmul.mubr.bf16.gmra.mrb[84].mxu1 %v3674_v29 }
 0x710   : > { %v5022_v50 = vpop.f32.mrb[72].mxu1 }
 0x711   : > { %v3789_v37 = vadd.f32 %v5022_v50, %v4584_v24  ;;  %v3780_v46 = vpop.f32.mrb[73].mxu1 }
 0x712   : > { %v3781_v1 = vadd.f32 %v4584_v24, %v3780_v46  ;;  %v5023_v9 = vpop.f32.mrb[74].mxu1 }
 0x713   : > { %v3792_v38 = vadd.f32 %v5023_v9, %v4584_v24  ;;  %v3783_v48 = vpop.f32.mrb[75].mxu1  ;;  %v3845_v60 = vmax.f32 %v3789_v37, 0.0 }
 0x714   : > { %v3784_v18 = vadd.f32 %v4584_v24, %v3783_v48  ;;  %v3843_v5 = vmax.f32 %v3781_v1, 0.0 }
 0x715   : > { %v3846_v22 = vmax.f32 %v3792_v38, 0.0 }
 0x716   : > { %v3844_v19 = vmax.f32 %v3784_v18, 0.0 }
 0x717   : > { %v3860_v26 = vpack.c.bf16 %v3846_v22, %v3845_v60  ;;  %v4593_v22 = vld [vmem:[%s7808_s9] ss:$0 sm:$0xff]  ;;  %s7558_s9 = scalar_lea.vmem [#allocation3], %s4462_s24  ;;  %s7811_s24 = sld [smem:[#allocation39_spill]] }
 0x718   : > { %v3859_v63 = vpack.c.bf16 %v3844_v19, %v3843_v5  ;;  %s4336_s11 = sshll.u32 %s7558_s9, 4  ;;  %s7583_s11 = int_to_ptr.vmem [resolvable:$true] %s4336_s11 }
 0x719   : > { %v5026_v40 = vpop.f32.mrb[76].mxu1  ;;  %s5701_s23 = scalar_lea.vmem %s7583_s11, 2048 }
 0x71a   : > { %v3805_v57 = vadd.f32 %v5026_v40, %v4584_v24  ;;  %v3796_v6 = vpop.f32.mrb[77].mxu1  ;;  %5052 = vmatprep.mubr.bf16.mxu0 %v3859_v63  ;;  %p5702_p5 = scmp.ne.s32.totalorder %s7583_s11, %s5701_s23 }
 0x71b   : > { %v3797_v3 = vadd.f32 %v4584_v24, %v3796_v6  ;;  %v5027_v39 = vpop.f32.mrb[78].mxu1  ;;  %5053 = vmatmul.mubr.bf16.vlgmr.msra.gmra.mrb[72].mxu0 %v3860_v26 }
 0x71c   : > { %v3808_v0 = vadd.f32 %v5027_v39, %v4584_v24  ;;  %v3799_v13 = vpop.f32.mrb[79].mxu1  ;;  %v3849_v7 = vmax.f32 %v3805_v57, 0.0  ;;  %p5703_p6 = pnand %p5702_p5, %p5974_p10 }
 0x71d   : > { %v3800_v33 = vadd.f32 %v4584_v24, %v3799_v13  ;;  %v3847_v17 = vmax.f32 %v3797_v3, 0.0 }
 0x71e   : > { %v3850_v52 = vmax.f32 %v3808_v0, 0.0  ;;  %p5704_p7 = pneg %p5703_p6 }
 0x71f   : > { %v3848_v62 = vmax.f32 %v3800_v33, 0.0 }
 0x720   : > { %v3862_v58 = vpack.c.bf16 %v3850_v52, %v3849_v7 }
 0x721   : > { %v3861_v14 = vpack.c.bf16 %v3848_v62, %v3847_v17  ;;  %v5030_v8 = vpop.f32.mrb[80].mxu1 }
 0x722   : > { %v3821_v20 = vadd.f32 %v5030_v8, %v4584_v24  ;;  %v3812_v28 = vpop.f32.mrb[81].mxu1 }
 0x723   : > { %v3813_v32 = vadd.f32 %v4584_v24, %v3812_v28  ;;  %v5031_v12 = vpop.f32.mrb[82].mxu1  ;;  %5056 = vmatprep.mubr.bf16.mxu0 %v3861_v14 }
 0x724   : > { %v3824_v16 = vadd.f32 %v5031_v12, %v4584_v24  ;;  %v3815_v35 = vpop.f32.mrb[83].mxu1  ;;  %5057 = vmatmul.mubr.bf16.gmra.mrb[76].mxu0 %v3862_v58  ;;  %v3853_v49 = vmax.f32 %v3821_v20, 0.0 }
 0x725   : > { %v3816_v23 = vadd.f32 %v4584_v24, %v3815_v35  ;;  %v3851_v15 = vmax.f32 %v3813_v32, 0.0 }
 0x726   : > { %v3854_v51 = vmax.f32 %v3824_v16, 0.0 }
 0x727   : > { %v3852_v41 = vmax.f32 %v3816_v23, 0.0 }
 0x728   : > { %v3864_v47 = vpack.c.bf16 %v3854_v51, %v3853_v49 }
 0x729   : > { %v3863_v36 = vpack.c.bf16 %v3852_v41, %v3851_v15  ;;  %v5034_v21 = vpop.f32.mrb[84].mxu1 }
 0x72a   : > { %v3837_v45 = vadd.f32 %v5034_v21, %v4584_v24  ;;  %v3828_v29 = vpop.f32.mrb[85].mxu1 }
 0x72b   : > { %v3829_v2 = vadd.f32 %v4584_v24, %v3828_v29  ;;  %5060 = vmatprep.mubr.bf16.mxu0 %v3863_v36  ;;  %v5035_v61 = vpop.f32.mrb[86].mxu1 }
 0x72c   : > { %v3840_v50 = vadd.f32 %v5035_v61, %v4584_v24  ;;  %5061 = vmatmul.mubr.bf16.gmra.mrb[80].mxu0 %v3864_v47  ;;  %v3831_v37 = vpop.f32.mrb[87].mxu1  ;;  %v3857_v1 = vmax.f32 %v3837_v45, 0.0 }
 0x72d   : > { %v3832_v46 = vadd.f32 %v4584_v24, %v3831_v37  ;;  %v3855_v38 = vmax.f32 %v3829_v2, 0.0 }
 0x72e   : > { %v3858_v9 = vmax.f32 %v3840_v50, 0.0 }
 0x72f   : > { %v3856_v48 = vmax.f32 %v3832_v46, 0.0 }
 0x730   : > { %v3866_v18 = vpack.c.bf16 %v3858_v9, %v3857_v1 }
 0x731   : > { %v3865_v60 = vpack.c.bf16 %v3856_v48, %v3855_v38 }
 0x733   : > { %5064 = vmatprep.mubr.bf16.mxu0 %v3865_v60 }
 0x734   : > { %5065 = vmatmul.mubr.bf16.gmra.mrb[84].mxu0 %v3866_v18 }
 0x7ee   : > { %v5054_v5 = vpop.f32.mrb[72].mxu0 }
 0x7ef   : > { %v3972_v19 = vpop.f32.mrb[73].mxu0  ;;  %v3981_v57 = vadd.f32 %v5054_v5, %v4593_v22 }
 0x7f0   : > { %v3973_v26 = vadd.f32 %v4593_v22, %v3972_v19  ;;  %v5055_v63 = vpop.f32.mrb[74].mxu0 }
 0x7f1   : > { %v3975_v40 = vpop.f32.mrb[75].mxu0  ;;  %v3984_v3 = vadd.f32 %v5055_v63, %v4593_v22  ;;  %v4037_v0 = vadd.f32 %v3981_v57, %v7274_v25 }
 0x7f2   : > { %v7366_v24 = vadd.f32 %v3973_v26, %v7263_v4  ;;  %v3976_v6 = vadd.f32 %v4593_v22, %v3975_v40 }
 0x7f3   : > { %v4038_v33 = vadd.f32 %v3984_v3, %v7277_v27 }
 0x7f4   : > { %v4036_v39 = vadd.f32 %v3976_v6, %v7266_v53  ;;  %4051 = vadd.xlane.f32.xlu0 %v7366_v24 }
 0x7f6   : > { %4053 = vadd.xlane.f32.xlu1 %v4036_v39 }
 0x7f7   : > { %v5058_v13 = vpop.f32.mrb[76].mxu0 }
 0x7f8   : > { %v3988_v7 = vpop.f32.mrb[77].mxu0  ;;  %4055 = vadd.xlane.f32.xlu0 %v4037_v0  ;;  %v3997_v4 = vadd.f32 %v5058_v13, %v4593_v22 }
 0x7f9   : > { %v3989_v52 = vadd.f32 %v4593_v22, %v3988_v7  ;;  %v5059_v17 = vpop.f32.mrb[78].mxu0 }
 0x7fa   : > { %v3991_v62 = vpop.f32.mrb[79].mxu0  ;;  %4057 = vadd.xlane.f32.xlu1 %v4038_v33  ;;  %v4000_v53 = vadd.f32 %v5059_v17, %v4593_v22  ;;  %v7380_v25 = vadd.f32 %v3997_v4, %v7302_v44 }
 0x7fb   : > { %v7373_v58 = vadd.f32 %v3989_v52, %v7290_v30  ;;  %v3992_v14 = vadd.f32 %v4593_v22, %v3991_v62 }
 0x7fc   : > { %v7384_v28 = vadd.f32 %v4000_v53, %v7298_v34 }
 0x7fd   : > { %v7376_v8 = vadd.f32 %v3992_v14, %v7286_v11  ;;  %4059 = vadd.xlane.f32.xlu0 %v7373_v58 }
 0x7ff   : > { %4061 = vadd.xlane.f32.xlu1 %v7376_v8  ;;  %v5062_v27 = vpop.f32.mrb[80].mxu0 }
 0x800   : > { %v4004_v20 = vpop.f32.mrb[81].mxu0  ;;  %v4013_v16 = vadd.f32 %v5062_v27, %v4593_v22 }
 0x801   : > { %v4005_v32 = vadd.f32 %v4593_v22, %v4004_v20  ;;  %4063 = vadd.xlane.f32.xlu0 %v7380_v25  ;;  %v5063_v30 = vpop.f32.mrb[82].mxu0 }
 0x802   : > { %v4007_v12 = vpop.f32.mrb[83].mxu0  ;;  %v4016_v44 = vadd.f32 %v5063_v30, %v4593_v22  ;;  %v7396_v34 = vadd.f32 %v4013_v16, %v7326_v31 }
 0x803   : > { %v7388_v11 = vadd.f32 %v4005_v32, %v7314_v42  ;;  %v4008_v35 = vadd.f32 %v4593_v22, %v4007_v12  ;;  %4065 = vadd.xlane.f32.xlu1 %v7384_v28 }
 0x804   : > { %v7400_v15 = vadd.f32 %v4016_v44, %v7322_v43 }
 0x805   : > { %v7392_v23 = vadd.f32 %v4008_v35, %v7310_v55  ;;  %4067 = vadd.xlane.f32.xlu0 %v7388_v11 }
 0x807   : > { %4069 = vadd.xlane.f32.xlu1 %v7392_v23  ;;  %v5066_v49 = vpop.f32.mrb[84].mxu0 }
 0x808   : > { %v4020_v51 = vpop.f32.mrb[85].mxu0  ;;  %v4029_v36 = vadd.f32 %v5066_v49, %v4593_v22 }
 0x809   : > { %4071 = vadd.xlane.f32.xlu0 %v7396_v34  ;;  %v4021_v42 = vadd.f32 %v4593_v22, %v4020_v51  ;;  %v5067_v41 = vpop.f32.mrb[86].mxu0 }
 0x80a   : > { %v4023_v47 = vpop.f32.mrb[87].mxu0  ;;  %v4032_v21 = vadd.f32 %v5067_v41, %v4593_v22  ;;  %v7412_v43 = vadd.f32 %v4029_v36, %v7346_v59 }
 0x80b   : > { %v7404_v55 = vadd.f32 %v4021_v42, %v7334_v10  ;;  %4073 = vadd.xlane.f32.xlu1 %v7400_v15  ;;  %v4024_v31 = vadd.f32 %v4593_v22, %v4023_v47 }
 0x80c   : > { %v7416_v29 = vadd.f32 %v4032_v21, %v7349_v54 }
 0x80d   : > { %v7408_v45 = vadd.f32 %v4024_v31, %v7338_v56  ;;  %4075 = vadd.xlane.f32.xlu0 %v7404_v55 }
 0x80f   : > { %4077 = vadd.xlane.f32.xlu1 %v7408_v45 }
 0x811   : > { %4079 = vadd.xlane.f32.xlu0 %v7412_v43 }
 0x813   : > { %4081 = vadd.xlane.f32.xlu1 %v7416_v29 }
 0x881   : > { %v4052_v10 = vpop.xlane.xlu0 %4051 }
 0x882   : > { %v4083_v56 = vmul.f32 0.0078125, %v4052_v10 }
 0x883   : > { %v4054_v2 = vpop.xlane.xlu1 %4053 }
 0x884   : > { %v4084_v61 = vmul.f32 0.0078125, %v4054_v2  ;;  %v7427_v38 = vsub.f32 %v7366_v24, %v4083_v56 }
 0x885   : > { %v4056_v50 = vpop.xlane.xlu0 %4055 }
 0x886   : > { %v7420_v37 = vsub.f32 %v4036_v39, %v4084_v61  ;;  %v4085_v46 = vmul.f32 0.0078125, %v4056_v50  ;;  %v4115_v63 = vmul.f32 %v7427_v38, %v7427_v38 }
 0x887   : > { %v4058_v1 = vpop.xlane.xlu1 %4057 }
 0x888   : > { %v7422_v59 = vsub.f32 %v4037_v0, %v4085_v46  ;;  %v4086_v9 = vmul.f32 0.0078125, %v4058_v1  ;;  %v4116_v54 = vmul.f32 %v7420_v37, %v7420_v37 }
 0x88a   : > { %v7429_v48 = vsub.f32 %v4038_v33, %v4086_v9  ;;  %v4060_v18 = vpop.xlane.xlu0 %4059  ;;  %4133 = vadd.xlane.f32.xlu1 %v4116_v54  ;;  %v4117_v60 = vmul.f32 %v7422_v59, %v7422_v59 }
 0x88b   : > { %v4087_v40 = vmul.f32 0.0078125, %v4060_v18 }
 0x88c   : > { %v4062_v22 = vpop.xlane.xlu1 %4061  ;;  %4135 = vadd.xlane.f32.xlu0 %v4117_v60  ;;  %v4118_v5 = vmul.f32 %v7429_v48, %v7429_v48 }
 0x88d   : > { %v4088_v19 = vmul.f32 0.0078125, %v4062_v22  ;;  %v7446_v33 = vsub.f32 %v7373_v58, %v4087_v40 }
 0x88e   : > { %v4064_v26 = vpop.xlane.xlu0 %4063  ;;  %4137 = vadd.xlane.f32.xlu1 %v4118_v5 }
 0x88f   : > { %v7438_v57 = vsub.f32 %v7376_v8, %v4088_v19  ;;  %v4089_v24 = vmul.f32 0.0078125, %v4064_v26 }
 0x890   : > { %v4066_v6 = vpop.xlane.xlu1 %4065  ;;  %4131 = vadd.xlane.f32.xlu0 %v4115_v63 }
 0x891   : > { %v7441_v3 = vsub.f32 %v7380_v25, %v4089_v24  ;;  %v4090_v39 = vmul.f32 0.0078125, %v4066_v6  ;;  %v4120_v0 = vmul.f32 %v7438_v57, %v7438_v57  ;;  %v4119_v25 = vmul.f32 %v7446_v33, %v7446_v33 }
 0x892   : > { %v4068_v13 = vpop.xlane.xlu0 %4067 }
 0x893   : > { %v7449_v7 = vsub.f32 %v7384_v28, %v4090_v39  ;;  %4141 = vadd.xlane.f32.xlu1 %v4120_v0  ;;  %v4121_v52 = vmul.f32 %v7441_v3, %v7441_v3  ;;  %v4091_v53 = vmul.f32 0.0078125, %v4068_v13 }
 0x894   : > { %v4070_v17 = vpop.xlane.xlu1 %4069 }
 0x895   : > { %v4092_v62 = vmul.f32 0.0078125, %v4070_v17  ;;  %4143 = vadd.xlane.f32.xlu0 %v4121_v52  ;;  %v4122_v4 = vmul.f32 %v7449_v7, %v7449_v7  ;;  %v7466_v12 = vsub.f32 %v7388_v11, %v4091_v53  ;;  %v7502_v53 = vld [vmem:[%s7809_s28] ss:$0 sm:$0xff]  ;;  %s4606_s28 = sshll.u32 %s4333_s27, 7  ;;  %s5816_s27 = smov [#allocation3]  }
 0x896   : > { %v4072_v14 = vpop.xlane.xlu0 %4071  ;;  %s7581_s13 = scalar_lea.hbm %s7811_s24, %s4606_s28  ;;  %s5705_s0 = sshll.u32 %s5816_s27, 4  ;;  %s5706_s0 = int_to_ptr.vmem [resolvable:$false] %s5705_s0 }
 0x897   : > { %v7456_v8 = vsub.f32 %v7392_v23, %v4092_v62  ;;  %v4093_v58 = vmul.f32 0.0078125, %v4072_v14  ;;  %4145 = vadd.xlane.f32.xlu1 %v4122_v4  ;;  %s5707_s28 = scalar_lea.vmem %s5706_s0, 4096  ;;  %p5708_p8 = scmp.lt.s32.totalorder %s7583_s11, %s5706_s0 }
 0x898   : > { %v4074_v27 = vpop.xlane.xlu1 %4073  ;;  %p5709_p9 = scmp.lt.s32.totalorder %s5707_s28, %s5701_s23 }
 0x899   : > { %v7461_v20 = vsub.f32 %v7396_v34, %v4093_v58  ;;  %v4094_v28 = vmul.f32 0.0078125, %v4074_v27  ;;  %4139 = vadd.xlane.f32.xlu0 %v4119_v25  ;;  %v4124_v32 = vmul.f32 %v7456_v8, %v7456_v8 }
 0x89a   : > { %v4076_v30 = vpop.xlane.xlu0 %4075  ;;  %p5710_p11 = por %p5709_p9, %p5708_p8 }
 0x89b   : > { %v7469_v16 = vsub.f32 %v7400_v15, %v4094_v28  ;;  %4149 = vadd.xlane.f32.xlu1 %v4124_v32  ;;  %v4125_v35 = vmul.f32 %v7461_v20, %v7461_v20  ;;  %v4095_v51 = vmul.f32 0.0078125, %v4076_v30  ;;  %v4123_v15 = vmul.f32 %v7466_v12, %v7466_v12  ;;  %v7508_v28 = vld [vmem:[%s7810_s16] ss:$0 sm:$0xff] }
 0x89c   : > { %v4078_v44 = vpop.xlane.xlu1 %4077  ;;  %p5711_p13 = pnand %p5710_p11, %p5704_p7 }
 0x89d   : > { %v4096_v23 = vmul.f32 0.0078125, %v4078_v44  ;;  %4151 = vadd.xlane.f32.xlu0 %v4125_v35  ;;  %v4126_v34 = vmul.f32 %v7469_v16, %v7469_v16  ;;  %v7486_v21 = vsub.f32 %v7404_v55, %v4095_v51 }
 0x89e   : > { %v4080_v49 = vpop.xlane.xlu0 %4079 }
 0x89f   : > { %v7476_v42 = vsub.f32 %v7408_v45, %v4096_v23  ;;  %4153 = vadd.xlane.f32.xlu1 %v4126_v34  ;;  %v4097_v11 = vmul.f32 0.0078125, %v4080_v49  ;;  %v4127_v2 = vmul.f32 %v7486_v21, %v7486_v21 }
 0x8a0   : > { %v4082_v41 = vpop.xlane.xlu1 %4081 }
 0x8a1   : > { %v7481_v47 = vsub.f32 %v7412_v43, %v4097_v11  ;;  %v4098_v36 = vmul.f32 0.0078125, %v4082_v41  ;;  %4147 = vadd.xlane.f32.xlu0 %v4123_v15  ;;  %v4128_v31 = vmul.f32 %v7476_v42, %v7476_v42 }
 0x8a3   : > { %v7489_v45 = vsub.f32 %v7416_v29, %v4098_v36  ;;  %4157 = vadd.xlane.f32.xlu1 %v4128_v31  ;;  %v4129_v10 = vmul.f32 %v7481_v47, %v7481_v47 }
 0x8a5   : > { %4159 = vadd.xlane.f32.xlu0 %v4129_v10  ;;  %v4130_v43 = vmul.f32 %v7489_v45, %v7489_v45 }
 0x8a7   : > { %4161 = vadd.xlane.f32.xlu1 %v4130_v43 }
 0x8a9   : > { %4155 = vadd.xlane.f32.xlu0 %v4127_v2 }
 0x917   : > { %v4134_v61 = vpop.xlane.xlu1 %4133 }
 0x918   : > { %v4164_v50 = vmul.f32 0.0078125, %v4134_v61 }
 0x919   : > { %v4136_v55 = vpop.xlane.xlu0 %4135 }
 0x91a   : > { %v4180_v56 = vadd.f32 1e-05, %v4164_v50  ;;  %v4165_v46 = vmul.f32 0.0078125, %v4136_v55 }
 0x91b   : > { %v4138_v29 = vpop.xlane.xlu1 %4137 }
 0x91c   : > { %5669 = vrsqrt.f32 %v4180_v56  ;;  %v4181_v54 = vadd.f32 1e-05, %v4165_v46  ;;  %v4166_v18 = vmul.f32 0.0078125, %v4138_v29 }
 0x91d   : > { %v4132_v1 = vpop.xlane.xlu0 %4131 }
 0x91e   : > { %v4163_v9 = vmul.f32 0.0078125, %v4132_v1  ;;  %v4182_v5 = vadd.f32 1e-05, %v4166_v18 }
 0x920   : > { %v4179_v60 = vadd.f32 1e-05, %v4163_v9  ;;  %v4142_v19 = vpop.xlane.xlu1 %4141 }
 0x921   : > { %v4168_v40 = vmul.f32 0.0078125, %v4142_v19 }
 0x922   : > { %5671 = vrsqrt.f32 %v4179_v60  ;;  %v4144_v22 = vpop.xlane.xlu0 %4143 }
 0x923   : > { %5673 = vrsqrt.f32 %v4181_v54  ;;  %v4184_v13 = vadd.f32 1e-05, %v4168_v40  ;;  %v4169_v52 = vmul.f32 0.0078125, %v4144_v22 }
 0x924   : > { %5675 = vrsqrt.f32 %v4182_v5  ;;  %v4146_v17 = vpop.xlane.xlu1 %4145 }
 0x925   : > { %v4185_v25 = vadd.f32 1e-05, %v4169_v52  ;;  %v4170_v27 = vmul.f32 0.0078125, %v4146_v17 }
 0x926   : > { %v4140_v26 = vpop.xlane.xlu0 %4139  ;;  %v5670_v6 = vpop.eup %5669 }
 0x927   : > { %v4167_v63 = vmul.f32 0.0078125, %v4140_v26  ;;  %v4212_v4 = vmul.f32 %v5670_v6, %v7420_v37  ;;  %v4186_v44 = vadd.f32 1e-05, %v4170_v27 }
 0x928   : > { %v4150_v34 = vpop.xlane.xlu1 %4149 }
 0x929   : > { %v4183_v24 = vadd.f32 1e-05, %v4167_v63  ;;  %v4235_v37 = vmul.f32 %v7502_v53, %v4212_v4  ;;  %v4172_v41 = vmul.f32 0.0078125, %v4150_v34 }
 0x92a   : > { %v4152_v39 = vpop.xlane.xlu0 %4151 }
 0x92b   : > { %5677 = vrsqrt.f32 %v4183_v24  ;;  %v4258_v49 = vadd.f32 %v7508_v28, %v4235_v37  ;;  %v4188_v61 = vadd.f32 1e-05, %v4172_v41  ;;  %v4173_v50 = vmul.f32 0.0078125, %v4152_v39 }
 0x92c   : > { %v5672_v0 = vpop.eup %5671  ;;  %5679 = vrsqrt.f32 %v4184_v13  ;;  %v4154_v55 = vpop.xlane.xlu1 %4153 }
 0x92d   : > { %v4211_v62 = vmul.f32 %v5672_v0, %v7427_v38  ;;  %v5674_v14 = vpop.eup %5673  ;;  %5681 = vrsqrt.f32 %v4185_v25  ;;  %v4189_v1 = vadd.f32 1e-05, %v4173_v50  ;;  %v4174_v9 = vmul.f32 0.0078125, %v4154_v55 }
 0x92e   : > { %v4148_v32 = vpop.xlane.xlu0 %4147  ;;  %v4213_v30 = vmul.f32 %v5674_v14, %v7422_v59  ;;  %v5676_v35 = vpop.eup %5675  ;;  %5683 = vrsqrt.f32 %v4186_v44 }
 0x92f   : > { %v4234_v58 = vmul.f32 %v7502_v53, %v4211_v62  ;;  %v4171_v23 = vmul.f32 0.0078125, %v4148_v32  ;;  %v4214_v11 = vmul.f32 %v5676_v35, %v7429_v48  ;;  %v4190_v5 = vadd.f32 1e-05, %v4174_v9 }
 0x930   : > { %v4236_v51 = vmul.f32 %v7502_v53, %v4213_v30  ;;  %v4158_v26 = vpop.xlane.xlu1 %4157 }
 0x931   : > { %v4257_v38 = vadd.f32 %v7508_v28, %v4234_v58  ;;  %v4187_v36 = vadd.f32 1e-05, %v4171_v23  ;;  %v4237_v59 = vmul.f32 %v7502_v53, %v4214_v11  ;;  %v4176_v6 = vmul.f32 0.0078125, %v4158_v26 }
 0x932   : > { %v4259_v31 = vadd.f32 %v7508_v28, %v4236_v51  ;;  %v4160_v2 = vpop.xlane.xlu0 %4159 }
 0x933   : > { %4273 = vxpose.xlu0.b32.start [1/16] %v4257_v38, 128  ;;  %5685 = vrsqrt.f32 %v4187_v36  ;;  %v4260_v48 = vadd.f32 %v7508_v28, %v4237_v59  ;;  %v4192_v17 = vadd.f32 1e-05, %v4176_v6  ;;  %v4177_v62 = vmul.f32 0.0078125, %v4160_v2 }
 0x934   : > { %5687 = vrsqrt.f32 %v4188_v61  ;;  %v4162_v4 = vpop.xlane.xlu1 %4161 }
 0x935   : > { %v5678_v15 = vpop.eup %5677  ;;  %5689 = vrsqrt.f32 %v4189_v1  ;;  %v4193_v27 = vadd.f32 1e-05, %v4177_v62  ;;  %v4178_v32 = vmul.f32 0.0078125, %v4162_v4 }
 0x936   : > { %v4215_v10 = vmul.f32 %v5678_v15, %v7446_v33  ;;  %v5680_v43 = vpop.eup %5679  ;;  %v4156_v54 = vpop.xlane.xlu0 %4155  ;;  %5691 = vrsqrt.f32 %v4190_v5 }
 0x937   : > { %4274 = vxpose.xlu0.b32.cont [2/16] %v4258_v49, 128  ;;  %v4216_v46 = vmul.f32 %v5680_v43, %v7438_v57  ;;  %v5682_v29 = vpop.eup %5681  ;;  %v4175_v19 = vmul.f32 0.0078125, %v4156_v54  ;;  %v4194_v35 = vadd.f32 1e-05, %v4178_v32 }
 0x938   : > { %v4238_v56 = vmul.f32 %v7502_v53, %v4215_v10  ;;  %v4217_v60 = vmul.f32 %v5682_v29, %v7441_v3  ;;  %v5684_v22 = vpop.eup %5683 }
 0x939   : > { %v4239_v18 = vmul.f32 %v7502_v53, %v4216_v46  ;;  %v4218_v40 = vmul.f32 %v5684_v22, %v7449_v7  ;;  %v4191_v39 = vadd.f32 1e-05, %v4175_v19 }
 0x93a   : > { %v4261_v33 = vadd.f32 %v7508_v28, %v4238_v56  ;;  %v4240_v63 = vmul.f32 %v7502_v53, %v4217_v60 }
 0x93b   : > { %4275 = vxpose.xlu0.b32.cont [3/16] %v4259_v31, 128  ;;  %v4262_v57 = vadd.f32 %v7508_v28, %v4239_v18  ;;  %v4241_v3 = vmul.f32 %v7502_v53, %v4218_v40  ;;  %5693 = vrsqrt.f32 %v4191_v39 }
 0x93c   : > { %v4263_v0 = vadd.f32 %v7508_v28, %v4240_v63  ;;  %5695 = vrsqrt.f32 %v4192_v17 }
 0x93d   : > { %v5686_v24 = vpop.eup %5685  ;;  %v4264_v14 = vadd.f32 %v7508_v28, %v4241_v3  ;;  %5697 = vrsqrt.f32 %v4193_v27 }
 0x93e   : > { %v4219_v13 = vmul.f32 %v5686_v24, %v7466_v12  ;;  %v5688_v52 = vpop.eup %5687  ;;  %5699 = vrsqrt.f32 %v4194_v35 }
 0x93f   : > { %4276 = vxpose.xlu0.b32.cont [4/16] %v4260_v48, 128  ;;  %v4220_v58 = vmul.f32 %v5688_v52, %v7456_v8  ;;  %v5690_v25 = vpop.eup %5689 }
 0x940   : > { %v4242_v7 = vmul.f32 %v7502_v53, %v4219_v13  ;;  %v4221_v37 = vmul.f32 %v5690_v25, %v7461_v20  ;;  %v5692_v30 = vpop.eup %5691 }
 0x941   : > { %v4243_v12 = vmul.f32 %v7502_v53, %v4220_v58  ;;  %v4222_v8 = vmul.f32 %v5692_v30, %v7469_v16 }
 0x942   : > { %v4265_v38 = vadd.f32 %v7508_v28, %v4242_v7  ;;  %v4244_v23 = vmul.f32 %v7502_v53, %v4221_v37 }
 0x943   : > { %4277 = vxpose.xlu0.b32.cont [5/16] %v4261_v33, 128  ;;  %v4266_v44 = vadd.f32 %v7508_v28, %v4243_v12  ;;  %v4245_v51 = vmul.f32 %v7502_v53, %v4222_v8 }
 0x944   : > { %v4267_v49 = vadd.f32 %v7508_v28, %v4244_v23 }
 0x945   : > { %v5694_v34 = vpop.eup %5693  ;;  %v4268_v15 = vadd.f32 %v7508_v28, %v4245_v51 }
 0x946   : > { %v4223_v11 = vmul.f32 %v5694_v34, %v7486_v21  ;;  %v5696_v20 = vpop.eup %5695 }
 0x947   : > { %4278 = vxpose.xlu0.b32.cont [6/16] %v4262_v57, 128  ;;  %v4224_v36 = vmul.f32 %v5696_v20, %v7476_v42  ;;  %v5698_v31 = vpop.eup %5697 }
 0x948   : > { %v4246_v41 = vmul.f32 %v7502_v53, %v4223_v11  ;;  %v4225_v10 = vmul.f32 %v5698_v31, %v7481_v47  ;;  %v5700_v43 = vpop.eup %5699 }
 0x949   : > { %v4247_v59 = vmul.f32 %v7502_v53, %v4224_v36  ;;  %v4226_v61 = vmul.f32 %v5700_v43, %v7489_v45 }
 0x94a   : > { %v4269_v16 = vadd.f32 %v7508_v28, %v4246_v41  ;;  %v4248_v2 = vmul.f32 %v7502_v53, %v4225_v10 }
 0x94b   : > { %4279 = vxpose.xlu0.b32.cont [7/16] %v4263_v0, 128  ;;  %v4270_v21 = vadd.f32 %v7508_v28, %v4247_v59  ;;  %v4249_v50 = vmul.f32 %v7502_v53, %v4226_v61 }
 0x94c   : > { %v4271_v42 = vadd.f32 %v7508_v28, %v4248_v2 }
 0x94d   : > { %v4272_v55 = vadd.f32 %v7508_v28, %v4249_v50 }
 0x94f   : > { %4280 = vxpose.xlu0.b32.cont [8/16] %v4264_v14, 128 }
 0x953   : > { %4281 = vxpose.xlu0.b32.cont [9/16] %v4265_v38, 128 }
 0x957   : > { %4282 = vxpose.xlu0.b32.cont [10/16] %v4266_v44, 128 }
 0x95b   : > { %4283 = vxpose.xlu0.b32.cont [11/16] %v4267_v49, 128 }
 0x95f   : > { %4284 = vxpose.xlu0.b32.cont [12/16] %v4268_v15, 128 }
 0x963   : > { %4285 = vxpose.xlu0.b32.cont [13/16] %v4269_v16, 128 }
 0x967   : > { %4286 = vxpose.xlu0.b32.cont [14/16] %v4270_v21, 128 }
 0x96b   : > { %4287 = vxpose.xlu0.b32.cont [15/16] %v4271_v42, 128 }
 0x96f   : > { %4288 = vxpose.xlu0.b32.end [16/16] %v4272_v55, 128 }
 0x9b3   : > { %v4289_v47 = vpop.trf.xlu0 }
 0x9b4   : > { %4305 = vst [vmem:[%s7558_s9] sm:$0xff] %v4289_v47 }
 0x9b7   : > { %v4290_v45 = vpop.trf.xlu0 }
 0x9b8   : > { %4306 = vst [vmem:[%s7558_s9 + $0x8] sm:$0xff] %v4290_v45 }
 0x9bb   : > { %v4291_v53 = vpop.trf.xlu0 }
 0x9bc   : > { %4307 = vst [vmem:[%s7558_s9 + $0x10] sm:$0xff] %v4291_v53 }
 0x9bf   : > { %v4292_v28 = vpop.trf.xlu0 }
 0x9c0   : > { %4308 = vst [vmem:[%s7558_s9 + $0x18] sm:$0xff] %v4292_v28 }
 0x9c3   : > { %v4293_v48 = vpop.trf.xlu0 }
 0x9c4   : > { %4309 = vst [vmem:[%s7558_s9 + $0x20] sm:$0xff] %v4293_v48 }
 0x9c7   : > { %v4294_v56 = vpop.trf.xlu0 }
 0x9c8   : > { %4310 = vst [vmem:[%s7558_s9 + $0x28] sm:$0xff] %v4294_v56 }
 0x9cb   : > { %v4295_v46 = vpop.trf.xlu0 }
 0x9cc   : > { %4311 = vst [vmem:[%s7558_s9 + $0x30] sm:$0xff] %v4295_v46 }
 0x9cf   : > { %v4296_v29 = vpop.trf.xlu0 }
 0x9d0   : > { %4312 = vst [vmem:[%s7558_s9 + $0x38] sm:$0xff] %v4296_v29 }
 0x9d3   : > { %v4297_v1 = vpop.trf.xlu0 }
 0x9d4   : > { %4313 = vst [vmem:[%s7558_s9 + $0x40] sm:$0xff] %v4297_v1 }
 0x9d7   : > { %v4298_v9 = vpop.trf.xlu0 }
 0x9d8   : > { %4314 = vst [vmem:[%s7558_s9 + $0x48] sm:$0xff] %v4298_v9 }
 0x9db   : > { %v4299_v54 = vpop.trf.xlu0 }
 0x9dc   : > { %4315 = vst [vmem:[%s7558_s9 + $0x50] sm:$0xff] %v4299_v54 }
 0x9df   : > { %v4300_v33 = vpop.trf.xlu0 }
 0x9e0   : > { %4316 = vst [vmem:[%s7558_s9 + $0x58] sm:$0xff] %v4300_v33 }
 0x9e3   : > { %v4301_v18 = vpop.trf.xlu0 }
 0x9e4   : > { %4317 = vst [vmem:[%s7558_s9 + $0x60] sm:$0xff] %v4301_v18 }
 0x9e7   : > { %v4302_v60 = vpop.trf.xlu0 }
 0x9e8   : > { %4318 = vst [vmem:[%s7558_s9 + $0x68] sm:$0xff] %v4302_v60 }
 0x9eb   : > { %v4303_v22 = vpop.trf.xlu0 }
 0x9ec   : > { %4319 = vst [vmem:[%s7558_s9 + $0x70] sm:$0xff] %v4303_v22 }
 0x9ef   : > { %v4304_v5 = vpop.trf.xlu0 }
 0x9f0   : > { %4320 = vst [vmem:[%s7558_s9 + $0x78] sm:$0xff] %v4304_v5 }
 0x9f1   : > { %5714 = shalt.err (!%p5711_p13)
}
 0x9f2   : > { %s5715_s9 = scalar_lea.hbm %s7581_s13, 2048  ;;  %s5719_s19 = scalar_lea.hbm %s7811_s24, 8192 }
 0x9f3   : > { %p5716_p0 = scmp.ne.s32.totalorder %s7581_s13, %s5715_s9  ;;  %p5720_p3 = scmp.lt.u32.totalorder %s7581_s13, %s7811_s24 }
 0x9f4   : > { %p5721_p4 = scmp.lt.u32.totalorder %s5719_s19, %s5715_s9  ;;  %p5723_p6 = scmp.lt.u32.totalorder %s5715_s9, %s7581_s13 }
 0x9f5   : > { %p5717_p1 = pnand %p5716_p0, %p5974_p10 }
 0x9f6   : > { %p5722_p5 = por %p5721_p4, %p5720_p3 }
 0x9f7   : > { %p5718_p2 = pneg %p5717_p1 }
 0x9f8   : > { %p5724_p7 = por %p5723_p6, %p5722_p5 }
 0x9fa   : > { %p5725_p8 = pnand %p5724_p7, %p5718_p2 }
 0x9fc   : > { %5728 = shalt.err (!%p5725_p8)
}
 0x9fd   : > { %s5817_s23 = smov 128   ;;  %s5818_s28 = smov 256  }
 0x9fe   : > { %s5819_s1 = smov 8  }
 0x9ff   : > { %5072 = dma.vmem_to_hbm [thread:$0]  (%p5974_p10), %s7583_s11, 2048, %s7581_s13, %s7588_s18, %s5817_s23, %s5818_s28, %s5819_s1  }
 0xa00 PF: > { %p5078_p9 = scmp.ge.s32.totalorder %s5811_s22, 2  ;;  %s4351_s14 = sand.u32 1, %s5775_s29  }
 0xa01   : > { %s4352_s9 = scalar_lea.sflag [#allocation4], %s4351_s14 }
 0xa02   : > { %p5075_p11 = pnand %p5078_p9, %p5981_p12 }
 0xa04   : > { %5770 = dma.done.wait (!%p5075_p11), %s4352_s9, 2048  }
 0xa05   : > { %5772 = vsyncadd (!%p5075_p11), %s4352_s9, 4294965248  ;;  %s27_s22 = sadd.s32 1, %s5811_s22   ;;  %s7813_s1 = sld [smem:[#allocation6_spill]] }
 0xa06   : > { %p24_p13 = scmp.ge.s32.totalorder %s27_s22, 6   ;;  %s7814_s29 = smov %s5779_s30 }
 0xa07   : > { %s7815_s30 = smov %s5783_s15  ;;  %s7816_s15 = smov %s5979_s7 }
 0xa08   : > { %s7817_s16 = smov %s5791_s17  ;;  %s7818_s17 = smov %s5968_s12 }
 0xa09   : > { %s7819_s18 = smov %s5803_s20  ;;  %s7820_s19 = smov %s5807_s21 }
 0xa0a   : > { %s7822_s21 = smov %s7828_s26  ;;  %26 = sbr.rel (!%p24_p13) target bundleno = 16 (0x10), region = 166 }
 0xa0b   : > { %s7821_s20 = smov %s7813_s1 }
 0xa11   :  { %4357 = vsyncpa [#allocation4], 1 }
 0xa12   :  { %4359 = vsyncpa [#allocation4 + $0x1], 1 }

</bundles_post_ra>
